<compile_context>
chip_gen: v7x
topology: tpu7x:2x2x1
jax: 0.10.0
libtpu: 0.0.40
codegen_flags: <defaults>
</compile_context>

<pallas_src>
import functools
import math

import jax
import jax.numpy as jnp
from jax.experimental import pallas as pl
from jax.experimental.pallas import tpu as pltpu


def sub_encoder_kernel(
    x_ref,
    wq_ref, bq_ref, wk_ref, bk_ref, wv_ref, bv_ref,
    wo_ref, bo_ref,
    g1_ref, be1_ref,
    w1_ref, bf1_ref, w2_ref, bf2_ref,
    g2_ref, be2_ref,
    o_ref,
    ln1_acc, ffn_acc,
    *, h, d_k,
):
    bt, S, D = x_ref.shape
    M = bt * S
    eps = 1e-5
    scale = 1.0 / math.sqrt(d_k)
    bf16 = jnp.bfloat16

    f = pl.program_id(1)
    nf = pl.num_programs(1)

    # --- f == 0: attention + residual + LayerNorm1 -> ln1_acc; zero ffn_acc --
    @pl.when(f == 0)
    def _():
        x = x_ref[...].reshape(M, D)              # f32, kept for the residual
        x_bf = x.astype(bf16)                     # MXU operand

        # q/k/v projections (bf16 MXU, f32 accumulate); 1/sqrt(d_k) folded in q.
        q = (jnp.dot(x_bf, wq_ref[...], preferred_element_type=jnp.float32)
             + bq_ref[...]) * scale
        k = jnp.dot(x_bf, wk_ref[...], preferred_element_type=jnp.float32) + bk_ref[...]
        v = jnp.dot(x_bf, wv_ref[...], preferred_element_type=jnp.float32) + bv_ref[...]

        # [M, D] -> [bt, S, h, d_k] -> head-major [bt*h, S, d_k]; single
        # relayout, no per-head loop and no concatenate.
        def to_heads(t):
            t4 = t.astype(bf16).reshape(bt, S, h, d_k)
            return jnp.swapaxes(t4, 1, 2).reshape(bt * h, S, d_k)

        qh = to_heads(q)
        kh = to_heads(k)
        vh = to_heads(v)

        # Scores for all bt*h heads at once; K^T folded into the contraction.
        # TODO(synk): KV-tiled online softmax for large S.
        s = jnp.einsum("bqd,bkd->bqk", qh, kh,
                       preferred_element_type=jnp.float32)   # [bt*h, S, S] f32
        s = s - jnp.max(s, axis=-1, keepdims=True)
        p = jnp.exp(s)
        p = p * pl.reciprocal(jnp.sum(p, axis=-1, keepdims=True), approx=True)

        ctx = jnp.einsum("bqk,bkd->bqd", p.astype(bf16), vh,
                         preferred_element_type=jnp.float32)  # [bt*h, S, d_k]
        cat = jnp.swapaxes(ctx.reshape(bt, h, S, d_k), 1, 2).reshape(M, D)

        attn = (jnp.dot(cat.astype(bf16), wo_ref[...],
                        preferred_element_type=jnp.float32) + bo_ref[...])

        # residual + LayerNorm 1 (f32 VPU math)
        r1 = attn + x
        mu1 = jnp.mean(r1, axis=-1, keepdims=True)
        var1 = jnp.mean((r1 - mu1) ** 2, axis=-1, keepdims=True)
        ln1 = (r1 - mu1) * jax.lax.rsqrt(var1 + eps) * g1_ref[...] + be1_ref[...]

        ln1_acc[...] = ln1
        ffn_acc[...] = jnp.zeros_like(ffn_acc)

    # --- every f step: one hidden-dim tile of the FFN, accumulated ----------
    ln1_bf = ln1_acc[...].astype(bf16)
    h1 = (jnp.dot(ln1_bf, w1_ref[...], preferred_element_type=jnp.float32)
          + bf1_ref[...])
    h1 = jnp.maximum(h1, 0.0)
    ffn_acc[...] += jnp.dot(h1.astype(bf16), w2_ref[...],
                            preferred_element_type=jnp.float32)

    # --- last f step: bias, residual + LayerNorm2, write output -------------
    @pl.when(f == nf - 1)
    def _():
        ln1 = ln1_acc[...]
        r2 = ffn_acc[...] + bf2_ref[...] + ln1
        mu2 = jnp.mean(r2, axis=-1, keepdims=True)
        var2 = jnp.mean((r2 - mu2) ** 2, axis=-1, keepdims=True)
        ln2 = (r2 - mu2) * jax.lax.rsqrt(var2 + eps) * g2_ref[...] + be2_ref[...]
        o_ref[...] = ln2.reshape(bt, S, D).astype(o_ref.dtype)


def _pick_batch_tile(B, S, target_rows=512):
    """Largest divisor of B giving ~target_rows matmul rows, >= 2 grid steps."""
    bt = max(1, min(B, max(1, target_rows // max(S, 1))))
    if B >= 2:
        bt = min(bt, max(1, B // 2))   # keep >= 2 parallel steps for v7x's 2 TCs
    while B % bt:
        bt -= 1
    return max(bt, 1)


def _pick_ff_tile(F, target=2048):
    """Multiple-of-128 divisor of F near `target`, else F (single step)."""
    if F % 128:
        return F
    tf = min(F, max(128, (target // 128) * 128))
    while F % tf:
        tf -= 128
    return max(tf, 128)


def sub_encoder(x, params, *, h, bt=None, tf=None):
    B, S, D = x.shape
    assert D % h == 0
    d_k = D // h
    F = params["w1"].shape[1]
    if bt is None:
        bt = _pick_batch_tile(B, S)
    assert B % bt == 0
    if tf is None:
        tf = _pick_ff_tile(F)
    assert F % tf == 0
    grid = (B // bt, F // tf)
    M = bt * S

    bf16 = jnp.bfloat16
    # MXU weights in bf16; biases / LayerNorm affine stay f32.
    wq = params["wq"].astype(bf16)
    wk = params["wk"].astype(bf16)
    wv = params["wv"].astype(bf16)
    wo = params["wo"].astype(bf16)
    w1 = params["w1"].astype(bf16)
    w2 = params["w2"].astype(bf16)

    # Explicit VMEM budget, clamped to the real device capacity.
    vmem_need = (
        2 * 4 * D * D                  # resident bf16 Wq/Wk/Wv/Wo (single-buffered)
        + 2 * 2 * 2 * D * tf           # double-buffered bf16 W1/W2 tiles
        + 2 * 2 * 4 * bt * S * D       # x + out blocks (f32, double-buffered)
        + 2 * 4 * M * D                # ln1 / ffn accumulators (scratch)
        + 4 * M * (8 * D + 2 * tf)     # transient activations (q/k/v/ctx/h1)
        + 4 * bt * h * S * S           # attention scores (f32)
        + (6 << 20)                    # headroom
    )
    try:
        vmem_cap = int(pltpu.get_tpu_info().vmem_capacity_bytes)
    except Exception:
        vmem_cap = 64 * 1024 * 1024    # conservative: v7x per-TensorCore VMEM
    vmem_limit = int(max(16 << 20, min(vmem_cap - (2 << 20), vmem_need)))

    kernel = functools.partial(sub_encoder_kernel, h=h, d_k=d_k)
    args = (x,
            wq, params["bq"], wk, params["bk"], wv, params["bv"],
            wo, params["bo"],
            params["g1"], params["be1"],
            w1, params["b1"], w2, params["b2"],
            params["g2"], params["be2"])

    def run(single_buffer_weights):
        def inv(shape):   # grid-invariant (weight/bias) block spec
            idx = lambda b, f: (0,) * len(shape)
            if single_buffer_weights:
                return pl.BlockSpec(shape, idx, pipeline_mode=pl.Buffered(1))
            return pl.BlockSpec(shape, idx)

        in_specs = [
            pl.BlockSpec((bt, S, D), lambda b, f: (b, 0, 0)),   # x
            inv((D, D)), inv((1, D)),                           # Wq, bq
            inv((D, D)), inv((1, D)),                           # Wk, bk
            inv((D, D)), inv((1, D)),                           # Wv, bv
            inv((D, D)), inv((1, D)),                           # Wo, bo
            inv((1, D)), inv((1, D)),                           # gamma1, beta1
            pl.BlockSpec((D, tf), lambda b, f: (0, f)),         # W1 tile
            pl.BlockSpec((1, tf), lambda b, f: (0, f)),         # b1 tile
            pl.BlockSpec((tf, D), lambda b, f: (f, 0)),         # W2 tile
            inv((1, D)),                                        # b2
            inv((1, D)), inv((1, D)),                           # gamma2, beta2
        ]

        return pl.pallas_call(
            kernel,
            out_shape=jax.ShapeDtypeStruct((B, S, D), x.dtype),
            grid_spec=pltpu.PrefetchScalarGridSpec(
                num_scalar_prefetch=0,
                grid=grid,
                in_specs=in_specs,
                out_specs=pl.BlockSpec((bt, S, D), lambda b, f: (b, 0, 0)),
                scratch_shapes=[pltpu.VMEM((M, D), jnp.float32),   # ln1
                                pltpu.VMEM((M, D), jnp.float32)],  # ffn acc
            ),
            compiler_params=pltpu.CompilerParams(
                dimension_semantics=("parallel", "arbitrary"),
                vmem_limit_bytes=vmem_limit),
        )(*args)

    try:
        return run(True)
    except Exception:
        # TODO(synk): drop fallback once pl.Buffered(1) weight residency is
        # confirmed on the target jax/libtpu version.
        return run(False)


def sub_encoder_ref(x, p, *, h):
    """Pure-JAX f32 reference mirroring the PyTorch forward (eval mode)."""
    B, S, D = x.shape
    d_k = D // h
    eps = 1e-5

    q = x @ p["wq"] + p["bq"]
    k = x @ p["wk"] + p["bk"]
    v = x @ p["wv"] + p["bv"]
    outs = []
    for i in range(h):
        qi = q[..., i * d_k:(i + 1) * d_k]
        ki = k[..., i * d_k:(i + 1) * d_k]
        vi = v[..., i * d_k:(i + 1) * d_k]
        s = jnp.einsum("bqd,bkd->bqk", qi, ki) / math.sqrt(d_k)
        s = jax.nn.softmax(s, axis=-1)
        outs.append(jnp.einsum("bqk,bkd->bqd", s, vi))
    cat = jnp.concatenate(outs, axis=-1)
    attn = cat @ p["wo"] + p["bo"]

    def ln(z, g, b):
        mu = jnp.mean(z, axis=-1, keepdims=True)
        var = jnp.mean((z - mu) ** 2, axis=-1, keepdims=True)
        return (z - mu) * jax.lax.rsqrt(var + eps) * g + b

    r1 = attn + x
    l1 = ln(r1, p["g1"], p["be1"])
    ffn = jnp.maximum(l1 @ p["w1"] + p["b1"], 0.0) @ p["w2"] + p["b2"]
    return ln(ffn + l1, p["g2"], p["be2"])


def init_params(key, dim_model, dim_ff, h):
    d_k = dim_model // h
    keys = jax.random.split(key, 12)
    sc = 0.1

    def mk(k, shape):
        return (sc * jax.random.normal(k, shape)).astype(jnp.float32)

    # per-head q/k/v projections concatenated along the output axis -> [D, h*d_k]
    return {
        "wq": mk(keys[0], (dim_model, h * d_k)),
        "bq": mk(keys[1], (1, h * d_k)),
        "wk": mk(keys[2], (dim_model, h * d_k)),
        "bk": mk(keys[3], (1, h * d_k)),
        "wv": mk(keys[4], (dim_model, h * d_k)),
        "bv": mk(keys[5], (1, h * d_k)),
        "wo": mk(keys[6], (h * d_k, dim_model)),
        "bo": mk(keys[7], (1, dim_model)),
        "g1": jnp.ones((1, dim_model), jnp.float32),
        "be1": jnp.zeros((1, dim_model), jnp.float32),
        "w1": mk(keys[8], (dim_model, dim_ff)),
        "b1": mk(keys[9], (1, dim_ff)),
        "w2": mk(keys[10], (dim_ff, dim_model)),
        "b2": mk(keys[11], (1, dim_model)),
        "g2": jnp.ones((1, dim_model), jnp.float32),
        "be2": jnp.zeros((1, dim_model), jnp.float32),
    }


if __name__ == "__main__":
    B, S, D, H, FF = 2, 8, 32, 4, 64  # batch, seq, dim_model, heads, dim_ff

    key = jax.random.PRNGKey(0)
    kx, kp = jax.random.split(key)
    x = jax.random.normal(kx, (B, S, D), dtype=jnp.float32)
    params = init_params(kp, D, FF, H)

    out = jax.block_until_ready(sub_encoder(x, params, h=H))
    ref = sub_encoder_ref(x, params, h=H)

    assert out.shape == (B, S, D)
    # Kernel uses bf16 MXU operands (f32 accumulate) and the approximate EUP
    # reciprocal in softmax; reference is exact f32 -> loosened tolerance.
    assert jnp.allclose(out, ref, atol=5e-2, rtol=5e-2), "mismatch vs reference"

    print("KERNEL_OK")
</pallas_src>

<mosaic_0001>
module attributes {stable_mosaic.version = 11 : i64} {
  func.func @sub_encoder_kernel(%arg0: i32, %arg1: i32, %arg2: memref<1x8x32xf32, #tpu.memory_space<vmem>>, %arg3: memref<32x32xbf16, #tpu.memory_space<vmem>>, %arg4: memref<1x32xf32, #tpu.memory_space<vmem>>, %arg5: memref<32x32xbf16, #tpu.memory_space<vmem>>, %arg6: memref<1x32xf32, #tpu.memory_space<vmem>>, %arg7: memref<32x32xbf16, #tpu.memory_space<vmem>>, %arg8: memref<1x32xf32, #tpu.memory_space<vmem>>, %arg9: memref<32x32xbf16, #tpu.memory_space<vmem>>, %arg10: memref<1x32xf32, #tpu.memory_space<vmem>>, %arg11: memref<1x32xf32, #tpu.memory_space<vmem>>, %arg12: memref<1x32xf32, #tpu.memory_space<vmem>>, %arg13: memref<32x64xbf16, #tpu.memory_space<vmem>>, %arg14: memref<1x64xf32, #tpu.memory_space<vmem>>, %arg15: memref<64x32xbf16, #tpu.memory_space<vmem>>, %arg16: memref<1x32xf32, #tpu.memory_space<vmem>>, %arg17: memref<1x32xf32, #tpu.memory_space<vmem>>, %arg18: memref<1x32xf32, #tpu.memory_space<vmem>>, %arg19: memref<1x8x32xf32, #tpu.memory_space<vmem>>, %arg20: memref<8x32xf32, #tpu.memory_space<vmem>>, %arg21: memref<8x32xf32, #tpu.memory_space<vmem>>) attributes {dimension_semantics = [#tpu.dimension_semantics<parallel>, #tpu.dimension_semantics<arbitrary>], iteration_bounds = array<i64: 2, 1>, scalar_prefetch = 0 : i64, scratch_operands = 2 : i64, tpu.core_type = #tpu.core_type<tc>, window_params = [{transform_indices = @transform_0, window_bounds = array<i64: 1, 8, 32>}, {pipeline_mode = #tpu.pipeline_mode<synchronous>, transform_indices = @transform_1, window_bounds = array<i64: 32, 32>}, {pipeline_mode = #tpu.pipeline_mode<synchronous>, transform_indices = @transform_2, window_bounds = array<i64: 1, 32>}, {pipeline_mode = #tpu.pipeline_mode<synchronous>, transform_indices = @transform_3, window_bounds = array<i64: 32, 32>}, {pipeline_mode = #tpu.pipeline_mode<synchronous>, transform_indices = @transform_4, window_bounds = array<i64: 1, 32>}, {pipeline_mode = #tpu.pipeline_mode<synchronous>, transform_indices = @transform_5, window_bounds = array<i64: 32, 32>}, {pipeline_mode = #tpu.pipeline_mode<synchronous>, transform_indices = @transform_6, window_bounds = array<i64: 1, 32>}, {pipeline_mode = #tpu.pipeline_mode<synchronous>, transform_indices = @transform_7, window_bounds = array<i64: 32, 32>}, {pipeline_mode = #tpu.pipeline_mode<synchronous>, transform_indices = @transform_8, window_bounds = array<i64: 1, 32>}, {pipeline_mode = #tpu.pipeline_mode<synchronous>, transform_indices = @transform_9, window_bounds = array<i64: 1, 32>}, {pipeline_mode = #tpu.pipeline_mode<synchronous>, transform_indices = @transform_10, window_bounds = array<i64: 1, 32>}, {transform_indices = @transform_11, window_bounds = array<i64: 32, 64>}, {transform_indices = @transform_12, window_bounds = array<i64: 1, 64>}, {transform_indices = @transform_13, window_bounds = array<i64: 64, 32>}, {pipeline_mode = #tpu.pipeline_mode<synchronous>, transform_indices = @transform_14, window_bounds = array<i64: 1, 32>}, {pipeline_mode = #tpu.pipeline_mode<synchronous>, transform_indices = @transform_15, window_bounds = array<i64: 1, 32>}, {pipeline_mode = #tpu.pipeline_mode<synchronous>, transform_indices = @transform_16, window_bounds = array<i64: 1, 32>}, {transform_indices = @transform_17, window_bounds = array<i64: 1, 8, 32>}]} {
    %c0_i32 = arith.constant 0 : i32
    %0 = arith.cmpi eq, %arg1, %c0_i32 : i32
    %1 = arith.extui %0 : i1 to i32
    %c0_i32_0 = arith.constant 0 : i32
    %2 = arith.cmpi ne, %1, %c0_i32_0 : i32
    scf.if %2 {
      %c0_16 = arith.constant 0 : index
      %c0_17 = arith.constant 0 : index
      %c0_18 = arith.constant 0 : index
      %21 = vector.load %arg2[%c0_16, %c0_17, %c0_18] : memref<1x8x32xf32, #tpu.memory_space<vmem>>, vector<1x8x32xf32>
      %22 = vector.shape_cast %21 : vector<1x8x32xf32> to vector<8x32xf32>
      %23 = arith.truncf %22 : vector<8x32xf32> to vector<8x32xbf16>
      %c0_19 = arith.constant 0 : index
      %c0_20 = arith.constant 0 : index
      %24 = vector.load %arg3[%c0_19, %c0_20] : memref<32x32xbf16, #tpu.memory_space<vmem>>, vector<32x32xbf16>
      %cst_21 = arith.constant dense<0.000000e+00> : vector<8x32xf32>
      %25 = tpu.matmul %23, %24, %cst_21 {dimension_numbers = #tpu.dot_dimension_numbers<[1], [0], [0], [1], [0, 0, 1, 1], [], []>} : vector<8x32xbf16>, vector<32x32xbf16>, vector<8x32xf32> -> vector<8x32xf32>
      %c0_22 = arith.constant 0 : index
      %c0_23 = arith.constant 0 : index
      %26 = vector.load %arg4[%c0_22, %c0_23] : memref<1x32xf32, #tpu.memory_space<vmem>>, vector<1x32xf32>
      %27 = vector.broadcast %26 : vector<1x32xf32> to vector<8x32xf32>
      %28 = arith.addf %25, %27 : vector<8x32xf32>
      %cst_24 = arith.constant 0.353553385 : f32
      %29 = vector.broadcast %cst_24 : f32 to vector<8x32xf32>
      %30 = arith.mulf %28, %29 : vector<8x32xf32>
      %c0_25 = arith.constant 0 : index
      %c0_26 = arith.constant 0 : index
      %31 = vector.load %arg5[%c0_25, %c0_26] : memref<32x32xbf16, #tpu.memory_space<vmem>>, vector<32x32xbf16>
      %cst_27 = arith.constant dense<0.000000e+00> : vector<8x32xf32>
      %32 = tpu.matmul %23, %31, %cst_27 {dimension_numbers = #tpu.dot_dimension_numbers<[1], [0], [0], [1], [0, 0, 1, 1], [], []>} : vector<8x32xbf16>, vector<32x32xbf16>, vector<8x32xf32> -> vector<8x32xf32>
      %c0_28 = arith.constant 0 : index
      %c0_29 = arith.constant 0 : index
      %33 = vector.load %arg6[%c0_28, %c0_29] : memref<1x32xf32, #tpu.memory_space<vmem>>, vector<1x32xf32>
      %34 = vector.broadcast %33 : vector<1x32xf32> to vector<8x32xf32>
      %35 = arith.addf %32, %34 : vector<8x32xf32>
      %c0_30 = arith.constant 0 : index
      %c0_31 = arith.constant 0 : index
      %36 = vector.load %arg7[%c0_30, %c0_31] : memref<32x32xbf16, #tpu.memory_space<vmem>>, vector<32x32xbf16>
      %cst_32 = arith.constant dense<0.000000e+00> : vector<8x32xf32>
      %37 = tpu.matmul %23, %36, %cst_32 {dimension_numbers = #tpu.dot_dimension_numbers<[1], [0], [0], [1], [0, 0, 1, 1], [], []>} : vector<8x32xbf16>, vector<32x32xbf16>, vector<8x32xf32> -> vector<8x32xf32>
      %c0_33 = arith.constant 0 : index
      %c0_34 = arith.constant 0 : index
      %38 = vector.load %arg8[%c0_33, %c0_34] : memref<1x32xf32, #tpu.memory_space<vmem>>, vector<1x32xf32>
      %39 = vector.broadcast %38 : vector<1x32xf32> to vector<8x32xf32>
      %40 = arith.addf %37, %39 : vector<8x32xf32>
      %41 = arith.truncf %30 : vector<8x32xf32> to vector<8x32xbf16>
      %42 = vector.shape_cast %41 : vector<8x32xbf16> to vector<1x8x4x8xbf16>
      %43 = tpu.transpose %42, [0, 2, 1, 3] : vector<1x8x4x8xbf16> -> vector<1x4x8x8xbf16>
      %44 = vector.shape_cast %43 : vector<1x4x8x8xbf16> to vector<4x8x8xbf16>
      %45 = arith.truncf %35 : vector<8x32xf32> to vector<8x32xbf16>
      %46 = vector.shape_cast %45 : vector<8x32xbf16> to vector<1x8x4x8xbf16>
      %47 = tpu.transpose %46, [0, 2, 1, 3] : vector<1x8x4x8xbf16> -> vector<1x4x8x8xbf16>
      %48 = vector.shape_cast %47 : vector<1x4x8x8xbf16> to vector<4x8x8xbf16>
      %49 = arith.truncf %40 : vector<8x32xf32> to vector<8x32xbf16>
      %50 = vector.shape_cast %49 : vector<8x32xbf16> to vector<1x8x4x8xbf16>
      %51 = tpu.transpose %50, [0, 2, 1, 3] : vector<1x8x4x8xbf16> -> vector<1x4x8x8xbf16>
      %52 = vector.shape_cast %51 : vector<1x4x8x8xbf16> to vector<4x8x8xbf16>
      "tpu.trace_start"() <{level = 10 : i32, message = "bqd,bkd->bqk"}> : () -> ()
      %cst_35 = arith.constant dense<0.000000e+00> : vector<4x8x8xf32>
      %53 = tpu.matmul %44, %48, %cst_35 {dimension_numbers = #tpu.dot_dimension_numbers<[2], [2], [1], [1], [0, 0, 0, 1, 1, 1], [0], [0]>} : vector<4x8x8xbf16>, vector<4x8x8xbf16>, vector<4x8x8xf32> -> vector<4x8x8xf32>
      "tpu.trace_stop"() : () -> ()
      %cst_36 = arith.constant dense<0xFF800000> : vector<4x8xf32>
      %54 = vector.multi_reduction <maximumf>, %53, %cst_36 [2] : vector<4x8x8xf32> to vector<4x8xf32>
      %55 = vector.shape_cast %54 : vector<4x8xf32> to vector<4x8x1xf32>
      %56 = vector.broadcast %55 : vector<4x8x1xf32> to vector<4x8x8xf32>
      %57 = arith.subf %53, %56 : vector<4x8x8xf32>
      %58 = math.exp %57 : vector<4x8x8xf32>
      %cst_37 = arith.constant dense<0.000000e+00> : vector<4x8xf32>
      %59 = vector.multi_reduction <add>, %58, %cst_37 [2] : vector<4x8x8xf32> to vector<4x8xf32>
      %60 = vector.shape_cast %59 : vector<4x8xf32> to vector<4x8x1xf32>
      %61 = tpu.reciprocal %60 {approx = true} : vector<4x8x1xf32> -> vector<4x8x1xf32>
      %62 = vector.broadcast %61 : vector<4x8x1xf32> to vector<4x8x8xf32>
      %63 = arith.mulf %58, %62 : vector<4x8x8xf32>
      %64 = arith.truncf %63 : vector<4x8x8xf32> to vector<4x8x8xbf16>
      "tpu.trace_start"() <{level = 10 : i32, message = "bqk,bkd->bqd"}> : () -> ()
      %cst_38 = arith.constant dense<0.000000e+00> : vector<4x8x8xf32>
      %65 = tpu.matmul %64, %52, %cst_38 {dimension_numbers = #tpu.dot_dimension_numbers<[2], [1], [1], [2], [0, 0, 0, 1, 1, 2], [0], [0]>} : vector<4x8x8xbf16>, vector<4x8x8xbf16>, vector<4x8x8xf32> -> vector<4x8x8xf32>
      "tpu.trace_stop"() : () -> ()
      %66 = vector.shape_cast %65 : vector<4x8x8xf32> to vector<1x4x8x8xf32>
      %67 = tpu.transpose %66, [0, 2, 1, 3] : vector<1x4x8x8xf32> -> vector<1x8x4x8xf32>
      %68 = vector.shape_cast %67 : vector<1x8x4x8xf32> to vector<8x32xf32>
      %69 = arith.truncf %68 : vector<8x32xf32> to vector<8x32xbf16>
      %c0_39 = arith.constant 0 : index
      %c0_40 = arith.constant 0 : index
      %70 = vector.load %arg9[%c0_39, %c0_40] : memref<32x32xbf16, #tpu.memory_space<vmem>>, vector<32x32xbf16>
      %cst_41 = arith.constant dense<0.000000e+00> : vector<8x32xf32>
      %71 = tpu.matmul %69, %70, %cst_41 {dimension_numbers = #tpu.dot_dimension_numbers<[1], [0], [0], [1], [0, 0, 1, 1], [], []>} : vector<8x32xbf16>, vector<32x32xbf16>, vector<8x32xf32> -> vector<8x32xf32>
      %c0_42 = arith.constant 0 : index
      %c0_43 = arith.constant 0 : index
      %72 = vector.load %arg10[%c0_42, %c0_43] : memref<1x32xf32, #tpu.memory_space<vmem>>, vector<1x32xf32>
      %73 = vector.broadcast %72 : vector<1x32xf32> to vector<8x32xf32>
      %74 = arith.addf %71, %73 : vector<8x32xf32>
      %75 = arith.addf %74, %22 : vector<8x32xf32>
      %cst_44 = arith.constant dense<0.000000e+00> : vector<8xf32>
      %76 = vector.multi_reduction <add>, %75, %cst_44 [1] : vector<8x32xf32> to vector<8xf32>
      %77 = vector.shape_cast %76 : vector<8xf32> to vector<8x1xf32>
      %cst_45 = arith.constant 3.200000e+01 : f32
      %78 = vector.broadcast %cst_45 : f32 to vector<8x1xf32>
      %79 = arith.divf %77, %78 : vector<8x1xf32>
      %80 = vector.broadcast %79 : vector<8x1xf32> to vector<8x32xf32>
      %81 = arith.subf %75, %80 : vector<8x32xf32>
      %82 = arith.mulf %81, %81 : vector<8x32xf32>
      %cst_46 = arith.constant dense<0.000000e+00> : vector<8xf32>
      %83 = vector.multi_reduction <add>, %82, %cst_46 [1] : vector<8x32xf32> to vector<8xf32>
      %84 = vector.shape_cast %83 : vector<8xf32> to vector<8x1xf32>
      %cst_47 = arith.constant 3.200000e+01 : f32
      %85 = vector.broadcast %cst_47 : f32 to vector<8x1xf32>
      %86 = arith.divf %84, %85 : vector<8x1xf32>
      %87 = vector.broadcast %79 : vector<8x1xf32> to vector<8x32xf32>
      %88 = arith.subf %75, %87 : vector<8x32xf32>
      %cst_48 = arith.constant 9.99999974E-6 : f32
      %89 = vector.broadcast %cst_48 : f32 to vector<8x1xf32>
      %90 = arith.addf %86, %89 : vector<8x1xf32>
      %91 = math.rsqrt %90 : vector<8x1xf32>
      %92 = vector.broadcast %91 : vector<8x1xf32> to vector<8x32xf32>
      %93 = arith.mulf %88, %92 : vector<8x32xf32>
      %c0_49 = arith.constant 0 : index
      %c0_50 = arith.constant 0 : index
      %94 = vector.load %arg11[%c0_49, %c0_50] : memref<1x32xf32, #tpu.memory_space<vmem>>, vector<1x32xf32>
      %95 = vector.broadcast %94 : vector<1x32xf32> to vector<8x32xf32>
      %96 = arith.mulf %93, %95 : vector<8x32xf32>
      %c0_51 = arith.constant 0 : index
      %c0_52 = arith.constant 0 : index
      %97 = vector.load %arg12[%c0_51, %c0_52] : memref<1x32xf32, #tpu.memory_space<vmem>>, vector<1x32xf32>
      %98 = vector.broadcast %97 : vector<1x32xf32> to vector<8x32xf32>
      %99 = arith.addf %96, %98 : vector<8x32xf32>
      %c0_53 = arith.constant 0 : index
      %c0_54 = arith.constant 0 : index
      %100 = vector.load %arg20[%c0_53, %c0_54] : memref<8x32xf32, #tpu.memory_space<vmem>>, vector<8x32xf32>
      tpu.vector_store %arg20[%c0_53, %c0_54], %99 {strides = array<i32>} : memref<8x32xf32, #tpu.memory_space<vmem>>, vector<8x32xf32>,
      %cst_55 = arith.constant 0.000000e+00 : f32
      %101 = vector.broadcast %cst_55 : f32 to vector<8x32xf32>
      %c0_56 = arith.constant 0 : index
      %c0_57 = arith.constant 0 : index
      %102 = vector.load %arg21[%c0_56, %c0_57] : memref<8x32xf32, #tpu.memory_space<vmem>>, vector<8x32xf32>
      tpu.vector_store %arg21[%c0_56, %c0_57], %101 {strides = array<i32>} : memref<8x32xf32, #tpu.memory_space<vmem>>, vector<8x32xf32>,
    } else {
    }
    %c0 = arith.constant 0 : index
    %c0_1 = arith.constant 0 : index
    %3 = vector.load %arg20[%c0, %c0_1] : memref<8x32xf32, #tpu.memory_space<vmem>>, vector<8x32xf32>
    %4 = arith.truncf %3 : vector<8x32xf32> to vector<8x32xbf16>
    %c0_2 = arith.constant 0 : index
    %c0_3 = arith.constant 0 : index
    %5 = vector.load %arg13[%c0_2, %c0_3] : memref<32x64xbf16, #tpu.memory_space<vmem>>, vector<32x64xbf16>
    %cst = arith.constant dense<0.000000e+00> : vector<8x64xf32>
    %6 = tpu.matmul %4, %5, %cst {dimension_numbers = #tpu.dot_dimension_numbers<[1], [0], [0], [1], [0, 0, 1, 1], [], []>} : vector<8x32xbf16>, vector<32x64xbf16>, vector<8x64xf32> -> vector<8x64xf32>
    %c0_4 = arith.constant 0 : index
    %c0_5 = arith.constant 0 : index
    %7 = vector.load %arg14[%c0_4, %c0_5] : memref<1x64xf32, #tpu.memory_space<vmem>>, vector<1x64xf32>
    %8 = vector.broadcast %7 : vector<1x64xf32> to vector<8x64xf32>
    %9 = arith.addf %6, %8 : vector<8x64xf32>
    %cst_6 = arith.constant 0.000000e+00 : f32
    %10 = vector.broadcast %cst_6 : f32 to vector<8x64xf32>
    %11 = arith.maximumf %9, %10 : vector<8x64xf32>
    %c0_7 = arith.constant 0 : index
    %c0_8 = arith.constant 0 : index
    %12 = vector.load %arg21[%c0_7, %c0_8] : memref<8x32xf32, #tpu.memory_space<vmem>>, vector<8x32xf32>
    %13 = arith.truncf %11 : vector<8x64xf32> to vector<8x64xbf16>
    %c0_9 = arith.constant 0 : index
    %c0_10 = arith.constant 0 : index
    %14 = vector.load %arg15[%c0_9, %c0_10] : memref<64x32xbf16, #tpu.memory_space<vmem>>, vector<64x32xbf16>
    %cst_11 = arith.constant dense<0.000000e+00> : vector<8x32xf32>
    %15 = tpu.matmul %13, %14, %cst_11 {dimension_numbers = #tpu.dot_dimension_numbers<[1], [0], [0], [1], [0, 0, 1, 1], [], []>} : vector<8x64xbf16>, vector<64x32xbf16>, vector<8x32xf32> -> vector<8x32xf32>
    %16 = arith.addf %12, %15 : vector<8x32xf32>
    %c0_12 = arith.constant 0 : index
    %c0_13 = arith.constant 0 : index
    %17 = vector.load %arg21[%c0_12, %c0_13] : memref<8x32xf32, #tpu.memory_space<vmem>>, vector<8x32xf32>
    tpu.vector_store %arg21[%c0_12, %c0_13], %16 {strides = array<i32>} : memref<8x32xf32, #tpu.memory_space<vmem>>, vector<8x32xf32>,
    %c0_i32_14 = arith.constant 0 : i32
    %18 = arith.cmpi eq, %arg1, %c0_i32_14 : i32
    %19 = arith.extui %18 : i1 to i32
    %c0_i32_15 = arith.constant 0 : i32
    %20 = arith.cmpi ne, %19, %c0_i32_15 : i32
    scf.if %20 {
      %c0_16 = arith.constant 0 : index
      %c0_17 = arith.constant 0 : index
      %21 = vector.load %arg20[%c0_16, %c0_17] : memref<8x32xf32, #tpu.memory_space<vmem>>, vector<8x32xf32>
      %c0_18 = arith.constant 0 : index
      %c0_19 = arith.constant 0 : index
      %22 = vector.load %arg21[%c0_18, %c0_19] : memref<8x32xf32, #tpu.memory_space<vmem>>, vector<8x32xf32>
      %c0_20 = arith.constant 0 : index
      %c0_21 = arith.constant 0 : index
      %23 = vector.load %arg16[%c0_20, %c0_21] : memref<1x32xf32, #tpu.memory_space<vmem>>, vector<1x32xf32>
      %24 = vector.broadcast %23 : vector<1x32xf32> to vector<8x32xf32>
      %25 = arith.addf %22, %24 : vector<8x32xf32>
      %26 = arith.addf %25, %21 : vector<8x32xf32>
      %cst_22 = arith.constant dense<0.000000e+00> : vector<8xf32>
      %27 = vector.multi_reduction <add>, %26, %cst_22 [1] : vector<8x32xf32> to vector<8xf32>
      %28 = vector.shape_cast %27 : vector<8xf32> to vector<8x1xf32>
      %cst_23 = arith.constant 3.200000e+01 : f32
      %29 = vector.broadcast %cst_23 : f32 to vector<8x1xf32>
      %30 = arith.divf %28, %29 : vector<8x1xf32>
      %31 = vector.broadcast %30 : vector<8x1xf32> to vector<8x32xf32>
      %32 = arith.subf %26, %31 : vector<8x32xf32>
      %33 = arith.mulf %32, %32 : vector<8x32xf32>
      %cst_24 = arith.constant dense<0.000000e+00> : vector<8xf32>
      %34 = vector.multi_reduction <add>, %33, %cst_24 [1] : vector<8x32xf32> to vector<8xf32>
      %35 = vector.shape_cast %34 : vector<8xf32> to vector<8x1xf32>
      %cst_25 = arith.constant 3.200000e+01 : f32
      %36 = vector.broadcast %cst_25 : f32 to vector<8x1xf32>
      %37 = arith.divf %35, %36 : vector<8x1xf32>
      %38 = vector.broadcast %30 : vector<8x1xf32> to vector<8x32xf32>
      %39 = arith.subf %26, %38 : vector<8x32xf32>
      %cst_26 = arith.constant 9.99999974E-6 : f32
      %40 = vector.broadcast %cst_26 : f32 to vector<8x1xf32>
      %41 = arith.addf %37, %40 : vector<8x1xf32>
      %42 = math.rsqrt %41 : vector<8x1xf32>
      %43 = vector.broadcast %42 : vector<8x1xf32> to vector<8x32xf32>
      %44 = arith.mulf %39, %43 : vector<8x32xf32>
      %c0_27 = arith.constant 0 : index
      %c0_28 = arith.constant 0 : index
      %45 = vector.load %arg17[%c0_27, %c0_28] : memref<1x32xf32, #tpu.memory_space<vmem>>, vector<1x32xf32>
      %46 = vector.broadcast %45 : vector<1x32xf32> to vector<8x32xf32>
      %47 = arith.mulf %44, %46 : vector<8x32xf32>
      %c0_29 = arith.constant 0 : index
      %c0_30 = arith.constant 0 : index
      %48 = vector.load %arg18[%c0_29, %c0_30] : memref<1x32xf32, #tpu.memory_space<vmem>>, vector<1x32xf32>
      %49 = vector.broadcast %48 : vector<1x32xf32> to vector<8x32xf32>
      %50 = arith.addf %47, %49 : vector<8x32xf32>
      %51 = vector.shape_cast %50 : vector<8x32xf32> to vector<1x8x32xf32>
      %c0_31 = arith.constant 0 : index
      %c0_32 = arith.constant 0 : index
      %c0_33 = arith.constant 0 : index
      %52 = vector.load %arg19[%c0_31, %c0_32, %c0_33] : memref<1x8x32xf32, #tpu.memory_space<vmem>>, vector<1x8x32xf32>
      tpu.vector_store %arg19[%c0_31, %c0_32, %c0_33], %51 {strides = array<i32>} : memref<1x8x32xf32, #tpu.memory_space<vmem>>, vector<1x8x32xf32>,
    } else {
    }
    return
  }
  func.func @transform_0(%arg0: i32, %arg1: i32) -> (i32, i32, i32) {
    %c0_i32 = arith.constant 0 : i32
    %c0_i32_0 = arith.constant 0 : i32
    %c0_i32_1 = arith.constant 0 : i32
    return %arg0, %c0_i32, %c0_i32_0 : i32, i32, i32
  }
  func.func @transform_1(%arg0: i32, %arg1: i32) -> (i32, i32) {
    %c0_i32 = arith.constant 0 : i32
    %c0_i32_0 = arith.constant 0 : i32
    %c0_i32_1 = arith.constant 0 : i32
    return %c0_i32, %c0_i32_0 : i32, i32
  }
  func.func @transform_2(%arg0: i32, %arg1: i32) -> (i32, i32) {
    %c0_i32 = arith.constant 0 : i32
    %c0_i32_0 = arith.constant 0 : i32
    %c0_i32_1 = arith.constant 0 : i32
    return %c0_i32, %c0_i32_0 : i32, i32
  }
  func.func @transform_3(%arg0: i32, %arg1: i32) -> (i32, i32) {
    %c0_i32 = arith.constant 0 : i32
    %c0_i32_0 = arith.constant 0 : i32
    %c0_i32_1 = arith.constant 0 : i32
    return %c0_i32, %c0_i32_0 : i32, i32
  }
  func.func @transform_4(%arg0: i32, %arg1: i32) -> (i32, i32) {
    %c0_i32 = arith.constant 0 : i32
    %c0_i32_0 = arith.constant 0 : i32
    %c0_i32_1 = arith.constant 0 : i32
    return %c0_i32, %c0_i32_0 : i32, i32
  }
  func.func @transform_5(%arg0: i32, %arg1: i32) -> (i32, i32) {
    %c0_i32 = arith.constant 0 : i32
    %c0_i32_0 = arith.constant 0 : i32
    %c0_i32_1 = arith.constant 0 : i32
    return %c0_i32, %c0_i32_0 : i32, i32
  }
  func.func @transform_6(%arg0: i32, %arg1: i32) -> (i32, i32) {
    %c0_i32 = arith.constant 0 : i32
    %c0_i32_0 = arith.constant 0 : i32
    %c0_i32_1 = arith.constant 0 : i32
    return %c0_i32, %c0_i32_0 : i32, i32
  }
  func.func @transform_7(%arg0: i32, %arg1: i32) -> (i32, i32) {
    %c0_i32 = arith.constant 0 : i32
    %c0_i32_0 = arith.constant 0 : i32
    %c0_i32_1 = arith.constant 0 : i32
    return %c0_i32, %c0_i32_0 : i32, i32
  }
  func.func @transform_8(%arg0: i32, %arg1: i32) -> (i32, i32) {
    %c0_i32 = arith.constant 0 : i32
    %c0_i32_0 = arith.constant 0 : i32
    %c0_i32_1 = arith.constant 0 : i32
    return %c0_i32, %c0_i32_0 : i32, i32
  }
  func.func @transform_9(%arg0: i32, %arg1: i32) -> (i32, i32) {
    %c0_i32 = arith.constant 0 : i32
    %c0_i32_0 = arith.constant 0 : i32
    %c0_i32_1 = arith.constant 0 : i32
    return %c0_i32, %c0_i32_0 : i32, i32
  }
  func.func @transform_10(%arg0: i32, %arg1: i32) -> (i32, i32) {
    %c0_i32 = arith.constant 0 : i32
    %c0_i32_0 = arith.constant 0 : i32
    %c0_i32_1 = arith.constant 0 : i32
    return %c0_i32, %c0_i32_0 : i32, i32
  }
  func.func @transform_11(%arg0: i32, %arg1: i32) -> (i32, i32) {
    %c0_i32 = arith.constant 0 : i32
    %c0_i32_0 = arith.constant 0 : i32
    return %c0_i32, %arg1 : i32, i32
  }
  func.func @transform_12(%arg0: i32, %arg1: i32) -> (i32, i32) {
    %c0_i32 = arith.constant 0 : i32
    %c0_i32_0 = arith.constant 0 : i32
    return %c0_i32, %arg1 : i32, i32
  }
  func.func @transform_13(%arg0: i32, %arg1: i32) -> (i32, i32) {
    %c0_i32 = arith.constant 0 : i32
    %c0_i32_0 = arith.constant 0 : i32
    return %arg1, %c0_i32 : i32, i32
  }
  func.func @transform_14(%arg0: i32, %arg1: i32) -> (i32, i32) {
    %c0_i32 = arith.constant 0 : i32
    %c0_i32_0 = arith.constant 0 : i32
    %c0_i32_1 = arith.constant 0 : i32
    return %c0_i32, %c0_i32_0 : i32, i32
  }
  func.func @transform_15(%arg0: i32, %arg1: i32) -> (i32, i32) {
    %c0_i32 = arith.constant 0 : i32
    %c0_i32_0 = arith.constant 0 : i32
    %c0_i32_1 = arith.constant 0 : i32
    return %c0_i32, %c0_i32_0 : i32, i32
  }
  func.func @transform_16(%arg0: i32, %arg1: i32) -> (i32, i32) {
    %c0_i32 = arith.constant 0 : i32
    %c0_i32_0 = arith.constant 0 : i32
    %c0_i32_1 = arith.constant 0 : i32
    return %c0_i32, %c0_i32_0 : i32, i32
  }
  func.func @transform_17(%arg0: i32, %arg1: i32) -> (i32, i32, i32) {
    %c0_i32 = arith.constant 0 : i32
    %c0_i32_0 = arith.constant 0 : i32
    %c0_i32_1 = arith.constant 0 : i32
    return %arg0, %c0_i32, %c0_i32_0 : i32, i32, i32
  }
}

module attributes {stable_mosaic.version = 11 : i64} {
  func.func @sub_encoder_kernel(%arg0: i32, %arg1: i32, %arg2: memref<1x8x32xf32, #tpu.memory_space<vmem>>, %arg3: memref<32x32xbf16, #tpu.memory_space<vmem>>, %arg4: memref<1x32xf32, #tpu.memory_space<vmem>>, %arg5: memref<32x32xbf16, #tpu.memory_space<vmem>>, %arg6: memref<1x32xf32, #tpu.memory_space<vmem>>, %arg7: memref<32x32xbf16, #tpu.memory_space<vmem>>, %arg8: memref<1x32xf32, #tpu.memory_space<vmem>>, %arg9: memref<32x32xbf16, #tpu.memory_space<vmem>>, %arg10: memref<1x32xf32, #tpu.memory_space<vmem>>, %arg11: memref<1x32xf32, #tpu.memory_space<vmem>>, %arg12: memref<1x32xf32, #tpu.memory_space<vmem>>, %arg13: memref<32x64xbf16, #tpu.memory_space<vmem>>, %arg14: memref<1x64xf32, #tpu.memory_space<vmem>>, %arg15: memref<64x32xbf16, #tpu.memory_space<vmem>>, %arg16: memref<1x32xf32, #tpu.memory_space<vmem>>, %arg17: memref<1x32xf32, #tpu.memory_space<vmem>>, %arg18: memref<1x32xf32, #tpu.memory_space<vmem>>, %arg19: memref<1x8x32xf32, #tpu.memory_space<vmem>>, %arg20: memref<8x32xf32, #tpu.memory_space<vmem>>, %arg21: memref<8x32xf32, #tpu.memory_space<vmem>>) attributes {dimension_semantics = [#tpu.dimension_semantics<parallel>, #tpu.dimension_semantics<arbitrary>], iteration_bounds = array<i64: 2, 1>, scalar_prefetch = 0 : i64, scratch_operands = 2 : i64, tpu.core_type = #tpu.core_type<tc>, window_params = [{transform_indices = @transform_0, window_bounds = array<i64: 1, 8, 32>}, {pipeline_mode = #tpu.pipeline_mode<synchronous>, transform_indices = @transform_1, window_bounds = array<i64: 32, 32>}, {pipeline_mode = #tpu.pipeline_mode<synchronous>, transform_indices = @transform_2, window_bounds = array<i64: 1, 32>}, {pipeline_mode = #tpu.pipeline_mode<synchronous>, transform_indices = @transform_3, window_bounds = array<i64: 32, 32>}, {pipeline_mode = #tpu.pipeline_mode<synchronous>, transform_indices = @transform_4, window_bounds = array<i64: 1, 32>}, {pipeline_mode = #tpu.pipeline_mode<synchronous>, transform_indices = @transform_5, window_bounds = array<i64: 32, 32>}, {pipeline_mode = #tpu.pipeline_mode<synchronous>, transform_indices = @transform_6, window_bounds = array<i64: 1, 32>}, {pipeline_mode = #tpu.pipeline_mode<synchronous>, transform_indices = @transform_7, window_bounds = array<i64: 32, 32>}, {pipeline_mode = #tpu.pipeline_mode<synchronous>, transform_indices = @transform_8, window_bounds = array<i64: 1, 32>}, {pipeline_mode = #tpu.pipeline_mode<synchronous>, transform_indices = @transform_9, window_bounds = array<i64: 1, 32>}, {pipeline_mode = #tpu.pipeline_mode<synchronous>, transform_indices = @transform_10, window_bounds = array<i64: 1, 32>}, {transform_indices = @transform_11, window_bounds = array<i64: 32, 64>}, {transform_indices = @transform_12, window_bounds = array<i64: 1, 64>}, {transform_indices = @transform_13, window_bounds = array<i64: 64, 32>}, {pipeline_mode = #tpu.pipeline_mode<synchronous>, transform_indices = @transform_14, window_bounds = array<i64: 1, 32>}, {pipeline_mode = #tpu.pipeline_mode<synchronous>, transform_indices = @transform_15, window_bounds = array<i64: 1, 32>}, {pipeline_mode = #tpu.pipeline_mode<synchronous>, transform_indices = @transform_16, window_bounds = array<i64: 1, 32>}, {transform_indices = @transform_17, window_bounds = array<i64: 1, 8, 32>}]} {
    %c0_i32 = arith.constant 0 : i32
    %0 = arith.cmpi eq, %arg1, %c0_i32 : i32
    %1 = arith.extui %0 : i1 to i32
    %c0_i32_0 = arith.constant 0 : i32
    %2 = arith.cmpi ne, %1, %c0_i32_0 : i32
    scf.if %2 {
      %c0_16 = arith.constant 0 : index
      %c0_17 = arith.constant 0 : index
      %c0_18 = arith.constant 0 : index
      %21 = vector.load %arg2[%c0_16, %c0_17, %c0_18] : memref<1x8x32xf32, #tpu.memory_space<vmem>>, vector<1x8x32xf32>
      %22 = vector.shape_cast %21 : vector<1x8x32xf32> to vector<8x32xf32>
      %23 = arith.truncf %22 : vector<8x32xf32> to vector<8x32xbf16>
      %c0_19 = arith.constant 0 : index
      %c0_20 = arith.constant 0 : index
      %24 = vector.load %arg3[%c0_19, %c0_20] : memref<32x32xbf16, #tpu.memory_space<vmem>>, vector<32x32xbf16>
      %cst_21 = arith.constant dense<0.000000e+00> : vector<8x32xf32>
      %25 = tpu.matmul %23, %24, %cst_21 {dimension_numbers = #tpu.dot_dimension_numbers<[1], [0], [0], [1], [0, 0, 1, 1], [], []>} : vector<8x32xbf16>, vector<32x32xbf16>, vector<8x32xf32> -> vector<8x32xf32>
      %c0_22 = arith.constant 0 : index
      %c0_23 = arith.constant 0 : index
      %26 = vector.load %arg4[%c0_22, %c0_23] : memref<1x32xf32, #tpu.memory_space<vmem>>, vector<1x32xf32>
      %27 = vector.broadcast %26 : vector<1x32xf32> to vector<8x32xf32>
      %28 = arith.addf %25, %27 : vector<8x32xf32>
      %cst_24 = arith.constant 0.353553385 : f32
      %29 = vector.broadcast %cst_24 : f32 to vector<8x32xf32>
      %30 = arith.mulf %28, %29 : vector<8x32xf32>
      %c0_25 = arith.constant 0 : index
      %c0_26 = arith.constant 0 : index
      %31 = vector.load %arg5[%c0_25, %c0_26] : memref<32x32xbf16, #tpu.memory_space<vmem>>, vector<32x32xbf16>
      %cst_27 = arith.constant dense<0.000000e+00> : vector<8x32xf32>
      %32 = tpu.matmul %23, %31, %cst_27 {dimension_numbers = #tpu.dot_dimension_numbers<[1], [0], [0], [1], [0, 0, 1, 1], [], []>} : vector<8x32xbf16>, vector<32x32xbf16>, vector<8x32xf32> -> vector<8x32xf32>
      %c0_28 = arith.constant 0 : index
      %c0_29 = arith.constant 0 : index
      %33 = vector.load %arg6[%c0_28, %c0_29] : memref<1x32xf32, #tpu.memory_space<vmem>>, vector<1x32xf32>
      %34 = vector.broadcast %33 : vector<1x32xf32> to vector<8x32xf32>
      %35 = arith.addf %32, %34 : vector<8x32xf32>
      %c0_30 = arith.constant 0 : index
      %c0_31 = arith.constant 0 : index
      %36 = vector.load %arg7[%c0_30, %c0_31] : memref<32x32xbf16, #tpu.memory_space<vmem>>, vector<32x32xbf16>
      %cst_32 = arith.constant dense<0.000000e+00> : vector<8x32xf32>
      %37 = tpu.matmul %23, %36, %cst_32 {dimension_numbers = #tpu.dot_dimension_numbers<[1], [0], [0], [1], [0, 0, 1, 1], [], []>} : vector<8x32xbf16>, vector<32x32xbf16>, vector<8x32xf32> -> vector<8x32xf32>
      %c0_33 = arith.constant 0 : index
      %c0_34 = arith.constant 0 : index
      %38 = vector.load %arg8[%c0_33, %c0_34] : memref<1x32xf32, #tpu.memory_space<vmem>>, vector<1x32xf32>
      %39 = vector.broadcast %38 : vector<1x32xf32> to vector<8x32xf32>
      %40 = arith.addf %37, %39 : vector<8x32xf32>
      %41 = arith.truncf %30 : vector<8x32xf32> to vector<8x32xbf16>
      %42 = vector.shape_cast %41 : vector<8x32xbf16> to vector<1x8x4x8xbf16>
      %43 = tpu.transpose %42, [0, 2, 1, 3] : vector<1x8x4x8xbf16> -> vector<1x4x8x8xbf16>
      %44 = vector.shape_cast %43 : vector<1x4x8x8xbf16> to vector<4x8x8xbf16>
      %45 = arith.truncf %35 : vector<8x32xf32> to vector<8x32xbf16>
      %46 = vector.shape_cast %45 : vector<8x32xbf16> to vector<1x8x4x8xbf16>
      %47 = tpu.transpose %46, [0, 2, 1, 3] : vector<1x8x4x8xbf16> -> vector<1x4x8x8xbf16>
      %48 = vector.shape_cast %47 : vector<1x4x8x8xbf16> to vector<4x8x8xbf16>
      %49 = arith.truncf %40 : vector<8x32xf32> to vector<8x32xbf16>
      %50 = vector.shape_cast %49 : vector<8x32xbf16> to vector<1x8x4x8xbf16>
      %51 = tpu.transpose %50, [0, 2, 1, 3] : vector<1x8x4x8xbf16> -> vector<1x4x8x8xbf16>
      %52 = vector.shape_cast %51 : vector<1x4x8x8xbf16> to vector<4x8x8xbf16>
      "tpu.trace_start"() <{level = 10 : i32, message = "bqd,bkd->bqk"}> : () -> ()
      %cst_35 = arith.constant dense<0.000000e+00> : vector<4x8x8xf32>
      %53 = tpu.matmul %44, %48, %cst_35 {dimension_numbers = #tpu.dot_dimension_numbers<[2], [2], [1], [1], [0, 0, 0, 1, 1, 1], [0], [0]>} : vector<4x8x8xbf16>, vector<4x8x8xbf16>, vector<4x8x8xf32> -> vector<4x8x8xf32>
      "tpu.trace_stop"() : () -> ()
      %cst_36 = arith.constant dense<0xFF800000> : vector<4x8xf32>
      %54 = vector.multi_reduction <maximumf>, %53, %cst_36 [2] : vector<4x8x8xf32> to vector<4x8xf32>
      %55 = vector.shape_cast %54 : vector<4x8xf32> to vector<4x8x1xf32>
      %56 = vector.broadcast %55 : vector<4x8x1xf32> to vector<4x8x8xf32>
      %57 = arith.subf %53, %56 : vector<4x8x8xf32>
      %58 = math.exp %57 : vector<4x8x8xf32>
      %cst_37 = arith.constant dense<0.000000e+00> : vector<4x8xf32>
      %59 = vector.multi_reduction <add>, %58, %cst_37 [2] : vector<4x8x8xf32> to vector<4x8xf32>
      %60 = vector.shape_cast %59 : vector<4x8xf32> to vector<4x8x1xf32>
      %61 = tpu.reciprocal %60 {approx = true} : vector<4x8x1xf32> -> vector<4x8x1xf32>
      %62 = vector.broadcast %61 : vector<4x8x1xf32> to vector<4x8x8xf32>
      %63 = arith.mulf %58, %62 : vector<4x8x8xf32>
      %64 = arith.truncf %63 : vector<4x8x8xf32> to vector<4x8x8xbf16>
      "tpu.trace_start"() <{level = 10 : i32, message = "bqk,bkd->bqd"}> : () -> ()
      %cst_38 = arith.constant dense<0.000000e+00> : vector<4x8x8xf32>
      %65 = tpu.matmul %64, %52, %cst_38 {dimension_numbers = #tpu.dot_dimension_numbers<[2], [1], [1], [2], [0, 0, 0, 1, 1, 2], [0], [0]>} : vector<4x8x8xbf16>, vector<4x8x8xbf16>, vector<4x8x8xf32> -> vector<4x8x8xf32>
      "tpu.trace_stop"() : () -> ()
      %66 = vector.shape_cast %65 : vector<4x8x8xf32> to vector<1x4x8x8xf32>
      %67 = tpu.transpose %66, [0, 2, 1, 3] : vector<1x4x8x8xf32> -> vector<1x8x4x8xf32>
      %68 = vector.shape_cast %67 : vector<1x8x4x8xf32> to vector<8x32xf32>
      %69 = arith.truncf %68 : vector<8x32xf32> to vector<8x32xbf16>
      %c0_39 = arith.constant 0 : index
      %c0_40 = arith.constant 0 : index
      %70 = vector.load %arg9[%c0_39, %c0_40] : memref<32x32xbf16, #tpu.memory_space<vmem>>, vector<32x32xbf16>
      %cst_41 = arith.constant dense<0.000000e+00> : vector<8x32xf32>
      %71 = tpu.matmul %69, %70, %cst_41 {dimension_numbers = #tpu.dot_dimension_numbers<[1], [0], [0], [1], [0, 0, 1, 1], [], []>} : vector<8x32xbf16>, vector<32x32xbf16>, vector<8x32xf32> -> vector<8x32xf32>
      %c0_42 = arith.constant 0 : index
      %c0_43 = arith.constant 0 : index
      %72 = vector.load %arg10[%c0_42, %c0_43] : memref<1x32xf32, #tpu.memory_space<vmem>>, vector<1x32xf32>
      %73 = vector.broadcast %72 : vector<1x32xf32> to vector<8x32xf32>
      %74 = arith.addf %71, %73 : vector<8x32xf32>
      %75 = arith.addf %74, %22 : vector<8x32xf32>
      %cst_44 = arith.constant dense<0.000000e+00> : vector<8xf32>
      %76 = vector.multi_reduction <add>, %75, %cst_44 [1] : vector<8x32xf32> to vector<8xf32>
      %77 = vector.shape_cast %76 : vector<8xf32> to vector<8x1xf32>
      %cst_45 = arith.constant 3.200000e+01 : f32
      %78 = vector.broadcast %cst_45 : f32 to vector<8x1xf32>
      %79 = arith.divf %77, %78 : vector<8x1xf32>
      %80 = vector.broadcast %79 : vector<8x1xf32> to vector<8x32xf32>
      %81 = arith.subf %75, %80 : vector<8x32xf32>
      %82 = arith.mulf %81, %81 : vector<8x32xf32>
      %cst_46 = arith.constant dense<0.000000e+00> : vector<8xf32>
      %83 = vector.multi_reduction <add>, %82, %cst_46 [1] : vector<8x32xf32> to vector<8xf32>
      %84 = vector.shape_cast %83 : vector<8xf32> to vector<8x1xf32>
      %cst_47 = arith.constant 3.200000e+01 : f32
      %85 = vector.broadcast %cst_47 : f32 to vector<8x1xf32>
      %86 = arith.divf %84, %85 : vector<8x1xf32>
      %87 = vector.broadcast %79 : vector<8x1xf32> to vector<8x32xf32>
      %88 = arith.subf %75, %87 : vector<8x32xf32>
      %cst_48 = arith.constant 9.99999974E-6 : f32
      %89 = vector.broadcast %cst_48 : f32 to vector<8x1xf32>
      %90 = arith.addf %86, %89 : vector<8x1xf32>
      %91 = math.rsqrt %90 : vector<8x1xf32>
      %92 = vector.broadcast %91 : vector<8x1xf32> to vector<8x32xf32>
      %93 = arith.mulf %88, %92 : vector<8x32xf32>
      %c0_49 = arith.constant 0 : index
      %c0_50 = arith.constant 0 : index
      %94 = vector.load %arg11[%c0_49, %c0_50] : memref<1x32xf32, #tpu.memory_space<vmem>>, vector<1x32xf32>
      %95 = vector.broadcast %94 : vector<1x32xf32> to vector<8x32xf32>
      %96 = arith.mulf %93, %95 : vector<8x32xf32>
      %c0_51 = arith.constant 0 : index
      %c0_52 = arith.constant 0 : index
      %97 = vector.load %arg12[%c0_51, %c0_52] : memref<1x32xf32, #tpu.memory_space<vmem>>, vector<1x32xf32>
      %98 = vector.broadcast %97 : vector<1x32xf32> to vector<8x32xf32>
      %99 = arith.addf %96, %98 : vector<8x32xf32>
      %c0_53 = arith.constant 0 : index
      %c0_54 = arith.constant 0 : index
      %100 = vector.load %arg20[%c0_53, %c0_54] : memref<8x32xf32, #tpu.memory_space<vmem>>, vector<8x32xf32>
      tpu.vector_store %arg20[%c0_53, %c0_54], %99 {strides = array<i32>} : memref<8x32xf32, #tpu.memory_space<vmem>>, vector<8x32xf32>,
      %cst_55 = arith.constant 0.000000e+00 : f32
      %101 = vector.broadcast %cst_55 : f32 to vector<8x32xf32>
      %c0_56 = arith.constant 0 : index
      %c0_57 = arith.constant 0 : index
      %102 = vector.load %arg21[%c0_56, %c0_57] : memref<8x32xf32, #tpu.memory_space<vmem>>, vector<8x32xf32>
      tpu.vector_store %arg21[%c0_56, %c0_57], %101 {strides = array<i32>} : memref<8x32xf32, #tpu.memory_space<vmem>>, vector<8x32xf32>,
    } else {
    }
    %c0 = arith.constant 0 : index
    %c0_1 = arith.constant 0 : index
    %3 = vector.load %arg20[%c0, %c0_1] : memref<8x32xf32, #tpu.memory_space<vmem>>, vector<8x32xf32>
    %4 = arith.truncf %3 : vector<8x32xf32> to vector<8x32xbf16>
    %c0_2 = arith.constant 0 : index
    %c0_3 = arith.constant 0 : index
    %5 = vector.load %arg13[%c0_2, %c0_3] : memref<32x64xbf16, #tpu.memory_space<vmem>>, vector<32x64xbf16>
    %cst = arith.constant dense<0.000000e+00> : vector<8x64xf32>
    %6 = tpu.matmul %4, %5, %cst {dimension_numbers = #tpu.dot_dimension_numbers<[1], [0], [0], [1], [0, 0, 1, 1], [], []>} : vector<8x32xbf16>, vector<32x64xbf16>, vector<8x64xf32> -> vector<8x64xf32>
    %c0_4 = arith.constant 0 : index
    %c0_5 = arith.constant 0 : index
    %7 = vector.load %arg14[%c0_4, %c0_5] : memref<1x64xf32, #tpu.memory_space<vmem>>, vector<1x64xf32>
    %8 = vector.broadcast %7 : vector<1x64xf32> to vector<8x64xf32>
    %9 = arith.addf %6, %8 : vector<8x64xf32>
    %cst_6 = arith.constant 0.000000e+00 : f32
    %10 = vector.broadcast %cst_6 : f32 to vector<8x64xf32>
    %11 = arith.maximumf %9, %10 : vector<8x64xf32>
    %c0_7 = arith.constant 0 : index
    %c0_8 = arith.constant 0 : index
    %12 = vector.load %arg21[%c0_7, %c0_8] : memref<8x32xf32, #tpu.memory_space<vmem>>, vector<8x32xf32>
    %13 = arith.truncf %11 : vector<8x64xf32> to vector<8x64xbf16>
    %c0_9 = arith.constant 0 : index
    %c0_10 = arith.constant 0 : index
    %14 = vector.load %arg15[%c0_9, %c0_10] : memref<64x32xbf16, #tpu.memory_space<vmem>>, vector<64x32xbf16>
    %cst_11 = arith.constant dense<0.000000e+00> : vector<8x32xf32>
    %15 = tpu.matmul %13, %14, %cst_11 {dimension_numbers = #tpu.dot_dimension_numbers<[1], [0], [0], [1], [0, 0, 1, 1], [], []>} : vector<8x64xbf16>, vector<64x32xbf16>, vector<8x32xf32> -> vector<8x32xf32>
    %16 = arith.addf %12, %15 : vector<8x32xf32>
    %c0_12 = arith.constant 0 : index
    %c0_13 = arith.constant 0 : index
    %17 = vector.load %arg21[%c0_12, %c0_13] : memref<8x32xf32, #tpu.memory_space<vmem>>, vector<8x32xf32>
    tpu.vector_store %arg21[%c0_12, %c0_13], %16 {strides = array<i32>} : memref<8x32xf32, #tpu.memory_space<vmem>>, vector<8x32xf32>,
    %c0_i32_14 = arith.constant 0 : i32
    %18 = arith.cmpi eq, %arg1, %c0_i32_14 : i32
    %19 = arith.extui %18 : i1 to i32
    %c0_i32_15 = arith.constant 0 : i32
    %20 = arith.cmpi ne, %19, %c0_i32_15 : i32
    scf.if %20 {
      %c0_16 = arith.constant 0 : index
      %c0_17 = arith.constant 0 : index
      %21 = vector.load %arg20[%c0_16, %c0_17] : memref<8x32xf32, #tpu.memory_space<vmem>>, vector<8x32xf32>
      %c0_18 = arith.constant 0 : index
      %c0_19 = arith.constant 0 : index
      %22 = vector.load %arg21[%c0_18, %c0_19] : memref<8x32xf32, #tpu.memory_space<vmem>>, vector<8x32xf32>
      %c0_20 = arith.constant 0 : index
      %c0_21 = arith.constant 0 : index
      %23 = vector.load %arg16[%c0_20, %c0_21] : memref<1x32xf32, #tpu.memory_space<vmem>>, vector<1x32xf32>
      %24 = vector.broadcast %23 : vector<1x32xf32> to vector<8x32xf32>
      %25 = arith.addf %22, %24 : vector<8x32xf32>
      %26 = arith.addf %25, %21 : vector<8x32xf32>
      %cst_22 = arith.constant dense<0.000000e+00> : vector<8xf32>
      %27 = vector.multi_reduction <add>, %26, %cst_22 [1] : vector<8x32xf32> to vector<8xf32>
      %28 = vector.shape_cast %27 : vector<8xf32> to vector<8x1xf32>
      %cst_23 = arith.constant 3.200000e+01 : f32
      %29 = vector.broadcast %cst_23 : f32 to vector<8x1xf32>
      %30 = arith.divf %28, %29 : vector<8x1xf32>
      %31 = vector.broadcast %30 : vector<8x1xf32> to vector<8x32xf32>
      %32 = arith.subf %26, %31 : vector<8x32xf32>
      %33 = arith.mulf %32, %32 : vector<8x32xf32>
      %cst_24 = arith.constant dense<0.000000e+00> : vector<8xf32>
      %34 = vector.multi_reduction <add>, %33, %cst_24 [1] : vector<8x32xf32> to vector<8xf32>
      %35 = vector.shape_cast %34 : vector<8xf32> to vector<8x1xf32>
      %cst_25 = arith.constant 3.200000e+01 : f32
      %36 = vector.broadcast %cst_25 : f32 to vector<8x1xf32>
      %37 = arith.divf %35, %36 : vector<8x1xf32>
      %38 = vector.broadcast %30 : vector<8x1xf32> to vector<8x32xf32>
      %39 = arith.subf %26, %38 : vector<8x32xf32>
      %cst_26 = arith.constant 9.99999974E-6 : f32
      %40 = vector.broadcast %cst_26 : f32 to vector<8x1xf32>
      %41 = arith.addf %37, %40 : vector<8x1xf32>
      %42 = math.rsqrt %41 : vector<8x1xf32>
      %43 = vector.broadcast %42 : vector<8x1xf32> to vector<8x32xf32>
      %44 = arith.mulf %39, %43 : vector<8x32xf32>
      %c0_27 = arith.constant 0 : index
      %c0_28 = arith.constant 0 : index
      %45 = vector.load %arg17[%c0_27, %c0_28] : memref<1x32xf32, #tpu.memory_space<vmem>>, vector<1x32xf32>
      %46 = vector.broadcast %45 : vector<1x32xf32> to vector<8x32xf32>
      %47 = arith.mulf %44, %46 : vector<8x32xf32>
      %c0_29 = arith.constant 0 : index
      %c0_30 = arith.constant 0 : index
      %48 = vector.load %arg18[%c0_29, %c0_30] : memref<1x32xf32, #tpu.memory_space<vmem>>, vector<1x32xf32>
      %49 = vector.broadcast %48 : vector<1x32xf32> to vector<8x32xf32>
      %50 = arith.addf %47, %49 : vector<8x32xf32>
      %51 = vector.shape_cast %50 : vector<8x32xf32> to vector<1x8x32xf32>
      %c0_31 = arith.constant 0 : index
      %c0_32 = arith.constant 0 : index
      %c0_33 = arith.constant 0 : index
      %52 = vector.load %arg19[%c0_31, %c0_32, %c0_33] : memref<1x8x32xf32, #tpu.memory_space<vmem>>, vector<1x8x32xf32>
      tpu.vector_store %arg19[%c0_31, %c0_32, %c0_33], %51 {strides = array<i32>} : memref<1x8x32xf32, #tpu.memory_space<vmem>>, vector<1x8x32xf32>,
    } else {
    }
    return
  }
  func.func @transform_0(%arg0: i32, %arg1: i32) -> (i32, i32, i32) {
    %c0_i32 = arith.constant 0 : i32
    %c0_i32_0 = arith.constant 0 : i32
    %c0_i32_1 = arith.constant 0 : i32
    return %arg0, %c0_i32, %c0_i32_0 : i32, i32, i32
  }
  func.func @transform_1(%arg0: i32, %arg1: i32) -> (i32, i32) {
    %c0_i32 = arith.constant 0 : i32
    %c0_i32_0 = arith.constant 0 : i32
    %c0_i32_1 = arith.constant 0 : i32
    return %c0_i32, %c0_i32_0 : i32, i32
  }
  func.func @transform_2(%arg0: i32, %arg1: i32) -> (i32, i32) {
    %c0_i32 = arith.constant 0 : i32
    %c0_i32_0 = arith.constant 0 : i32
    %c0_i32_1 = arith.constant 0 : i32
    return %c0_i32, %c0_i32_0 : i32, i32
  }
  func.func @transform_3(%arg0: i32, %arg1: i32) -> (i32, i32) {
    %c0_i32 = arith.constant 0 : i32
    %c0_i32_0 = arith.constant 0 : i32
    %c0_i32_1 = arith.constant 0 : i32
    return %c0_i32, %c0_i32_0 : i32, i32
  }
  func.func @transform_4(%arg0: i32, %arg1: i32) -> (i32, i32) {
    %c0_i32 = arith.constant 0 : i32
    %c0_i32_0 = arith.constant 0 : i32
    %c0_i32_1 = arith.constant 0 : i32
    return %c0_i32, %c0_i32_0 : i32, i32
  }
  func.func @transform_5(%arg0: i32, %arg1: i32) -> (i32, i32) {
    %c0_i32 = arith.constant 0 : i32
    %c0_i32_0 = arith.constant 0 : i32
    %c0_i32_1 = arith.constant 0 : i32
    return %c0_i32, %c0_i32_0 : i32, i32
  }
  func.func @transform_6(%arg0: i32, %arg1: i32) -> (i32, i32) {
    %c0_i32 = arith.constant 0 : i32
    %c0_i32_0 = arith.constant 0 : i32
    %c0_i32_1 = arith.constant 0 : i32
    return %c0_i32, %c0_i32_0 : i32, i32
  }
  func.func @transform_7(%arg0: i32, %arg1: i32) -> (i32, i32) {
    %c0_i32 = arith.constant 0 : i32
    %c0_i32_0 = arith.constant 0 : i32
    %c0_i32_1 = arith.constant 0 : i32
    return %c0_i32, %c0_i32_0 : i32, i32
  }
  func.func @transform_8(%arg0: i32, %arg1: i32) -> (i32, i32) {
    %c0_i32 = arith.constant 0 : i32
    %c0_i32_0 = arith.constant 0 : i32
    %c0_i32_1 = arith.constant 0 : i32
    return %c0_i32, %c0_i32_0 : i32, i32
  }
  func.func @transform_9(%arg0: i32, %arg1: i32) -> (i32, i32) {
    %c0_i32 = arith.constant 0 : i32
    %c0_i32_0 = arith.constant 0 : i32
    %c0_i32_1 = arith.constant 0 : i32
    return %c0_i32, %c0_i32_0 : i32, i32
  }
  func.func @transform_10(%arg0: i32, %arg1: i32) -> (i32, i32) {
    %c0_i32 = arith.constant 0 : i32
    %c0_i32_0 = arith.constant 0 : i32
    %c0_i32_1 = arith.constant 0 : i32
    return %c0_i32, %c0_i32_0 : i32, i32
  }
  func.func @transform_11(%arg0: i32, %arg1: i32) -> (i32, i32) {
    %c0_i32 = arith.constant 0 : i32
    %c0_i32_0 = arith.constant 0 : i32
    return %c0_i32, %arg1 : i32, i32
  }
  func.func @transform_12(%arg0: i32, %arg1: i32) -> (i32, i32) {
    %c0_i32 = arith.constant 0 : i32
    %c0_i32_0 = arith.constant 0 : i32
    return %c0_i32, %arg1 : i32, i32
  }
  func.func @transform_13(%arg0: i32, %arg1: i32) -> (i32, i32) {
    %c0_i32 = arith.constant 0 : i32
    %c0_i32_0 = arith.constant 0 : i32
    return %arg1, %c0_i32 : i32, i32
  }
  func.func @transform_14(%arg0: i32, %arg1: i32) -> (i32, i32) {
    %c0_i32 = arith.constant 0 : i32
    %c0_i32_0 = arith.constant 0 : i32
    %c0_i32_1 = arith.constant 0 : i32
    return %c0_i32, %c0_i32_0 : i32, i32
  }
  func.func @transform_15(%arg0: i32, %arg1: i32) -> (i32, i32) {
    %c0_i32 = arith.constant 0 : i32
    %c0_i32_0 = arith.constant 0 : i32
    %c0_i32_1 = arith.constant 0 : i32
    return %c0_i32, %c0_i32_0 : i32, i32
  }
  func.func @transform_16(%arg0: i32, %arg1: i32) -> (i32, i32) {
    %c0_i32 = arith.constant 0 : i32
    %c0_i32_0 = arith.constant 0 : i32
    %c0_i32_1 = arith.constant 0 : i32
    return %c0_i32, %c0_i32_0 : i32, i32
  }
  func.func @transform_17(%arg0: i32, %arg1: i32) -> (i32, i32, i32) {
    %c0_i32 = arith.constant 0 : i32
    %c0_i32_0 = arith.constant 0 : i32
    %c0_i32_1 = arith.constant 0 : i32
    return %arg0, %c0_i32, %c0_i32_0 : i32, i32, i32
  }
}

</mosaic_0001>

<bundles_post_ra>
// kernel: tpu_custom_call.1
= control target key start
LH: loop header
LB: loop body
LE: loop exit
PB: predicated region body
PF: predicated region fallthrough
CT: control target
= control target key end

     0   :  { %s3621_s0 = inlined_call_operand.vmem [shape: f32[2,8,32], index: 0, kind: input, shape index: {}]   ;;  %s3622_s1 = inlined_call_operand.vmem [shape: bf16[32,32], index: 1, kind: input, shape index: {}]   ;;  %s3623_s2 = inlined_call_operand.vmem [shape: f32[1,32], index: 2, kind: input, shape index: {}]   ;;  %s3624_s3 = inlined_call_operand.vmem [shape: bf16[32,32], index: 3, kind: input, shape index: {}]   ;;  %s3625_s4 = inlined_call_operand.vmem [shape: f32[1,32], index: 4, kind: input, shape index: {}]   ;;  %s3626_s5 = inlined_call_operand.hbm [shape: bf16[32,32], index: 5, kind: input, shape index: {}]   ;;  %s3627_s6 = inlined_call_operand.hbm [shape: f32[1,32], index: 6, kind: input, shape index: {}]   ;;  %s3628_s7 = inlined_call_operand.hbm [shape: bf16[32,32], index: 7, kind: input, shape index: {}]   ;;  %s3629_s8 = inlined_call_operand.hbm [shape: f32[1,32], index: 8, kind: input, shape index: {}]   ;;  %s3630_s9 = inlined_call_operand.hbm [shape: f32[1,32], index: 9, kind: input, shape index: {}]   ;;  %s3631_s10 = inlined_call_operand.vmem [shape: f32[1,32], index: 10, kind: input, shape index: {}]   ;;  %s3632_s11 = inlined_call_operand.vmem [shape: bf16[32,64], index: 11, kind: input, shape index: {}]   ;;  %s3633_s12 = inlined_call_operand.vmem [shape: f32[1,64], index: 12, kind: input, shape index: {}]   ;;  %s3634_s13 = inlined_call_operand.vmem [shape: bf16[64,32], index: 13, kind: input, shape index: {}]   ;;  %s3635_s14 = inlined_call_operand.vmem [shape: f32[1,32], index: 14, kind: input, shape index: {}]   ;;  %s3636_s15 = inlined_call_operand.vmem [shape: f32[1,32], index: 15, kind: input, shape index: {}]   ;;  %s3637_s16 = inlined_call_operand.vmem [shape: f32[1,32], index: 16, kind: input, shape index: {}]   ;;  %s3638_s17 = inlined_call_operand.hbm [shape: f32[2,8,32], index: 17, kind: output, shape index: {}]  }
   0x1   :  { %3654 = sst [smem:[#allocation26_spill]] %s3621_s0 }
   0x2   :  { %3655 = sst [smem:[#allocation27_spill]] %s3622_s1 }
   0x3   :  { %3656 = sst [smem:[#allocation28_spill]] %s3627_s6 }
   0x4   :  { %3657 = sst [smem:[#allocation29_spill]] %s3629_s8 }
   0x5   :  { %3658 = sst [smem:[#allocation30_spill]] %s3636_s15 }
   0x6   :  { %3659 = sst [smem:[#allocation31_spill]] %s3637_s16 }
   0x7   :  { %3660 = sst [smem:[#allocation32_spill]] %s3638_s17 }
   0x8   :  { %22 = vsyncpa [#allocation5], 0 }
   0x9   :  { %23 = vsyncpa [#allocation8], 0 }
   0xa   :  { %24 = vsyncpa [#allocation11], 0 }
   0xb   :  { %25 = vsyncpa [#allocation6], 0 }
   0xc   :  { %27 = vsyncpa [#allocation6 + $0x1], 0  ;;  %s3117_s24 = smov 0   ;;  %s3119_s25 = smov 0  }
   0xd   :  { %s3121_s26 = smov 0   ;;  %s3123_s27 = smov 0  }
   0xe   :  { %s3125_s28 = smov 0   ;;  %s3127_s29 = smov 0  }
   0xf LB: > { %3661 = sst [smem:[#allocation18_spill]] %s2986_s24  ;;  %s2423_s0 = sadd.s32 4294967295, %s3006_s29   ;;  %s3006_s29 = sphi %s3127_s29, %s33_s29   ;;  %s3002_s28 = sphi %s3125_s28, %s3693_s28   ;;  %s2998_s27 = sphi %s3123_s27, %s3692_s27   ;;  %s2994_s26 = sphi %s3121_s26, %s3691_s26   ;;  %s2990_s25 = sphi %s3119_s25, %s3695_s25   ;;  %s2986_s24 = sphi %s3117_s24, %s3694_s24  }
  0x10   : > { %3662 = sst [smem:[#allocation19_spill]] %s2994_s26  ;;  %s2424_s30 = sadd.s32 4294967294, %s3006_s29  }
  0x11   : > { %3663 = sst [smem:[#allocation20_spill]] %s3002_s28  ;;  %s45_s18 = sadd.s32 1, %s3002_s28 }
  0x12   : > { %3664 = sst [smem:[#allocation21_spill]] %s3006_s29  ;;  %s429_s19 = sadd.s32 1, %s2994_s26 }
  0x13   : > { %p47_p0 = scmp.ge.s32.totalorder %s45_s18, 2  ;;  %p439_p1 = scmp.ne.s32.totalorder %s2994_s26, %s2990_s25 }
  0x14   : > { %p440_p2 = scmp.eq.s32.totalorder %s2423_s0, 1  ;;  %p445_p3 = scmp.ne.s32.totalorder %s2990_s25, %s2986_s24 }
  0x15   : > { %s3697_s18 = smov (%p47_p0, %s45_s18), 0  ;;  %p446_p5 = scmp.eq.s32.totalorder %s2424_s30, 1 }
  0x16   : > { %3665 = sst [smem:[#allocation22_spill]] %s3697_s18  ;;  %p3157_p4 = por %p440_p2, %p439_p1 }
  0x17   : > { %s426_s20 = ssub.s32 %s3002_s28, %s3697_s18  ;;  %p2425_p6 = scmp.ge.s32.totalorder %s3006_s29, 1 }
  0x18   : > { %s3666_s1 = scalar_select %p3157_p4, 1, 0 }
  0x19   : > { %p427_p7 = scmp.eq.s32.totalorder %s426_s20, 0  ;;  %p3164_p8 = por %p446_p5, %p445_p3 }
  0x1a   : > { %3667 = sst [smem:[#allocation23_spill]] %s3666_s1  ;;  %p453_p9 = scmp.lt.s32.totalorder %s3006_s29, 3 }
  0x1b   : > { %s3668_s21 = scalar_select %p3164_p8, 1, 0 }
  0x1c   : > { %s3170_s22 = scalar_select %p427_p7, %s2994_s26, %s429_s19  }
  0x1d   : > { %3669 = sst [smem:[#allocation24_spill]] %s3668_s21  ;;  %p3172_p10 = pnand %p2425_p6, %p453_p9 }
  0x1e   : > { %3670 = sst [smem:[#allocation25_spill]] %s3170_s22  ;;  %p3176_p11 = scmp.eq.s32.totalorder %s2423_s0, 0 }
  0x1f   : > { %s3671_s23 = scalar_select %p3172_p10, 1, 0 }
  0x20   : > { %s3672_s24 = scalar_select %p3176_p11, 1, 0 }
  0x21   : > { %p2645_p12 = pneg %p3172_p10  ;;  %s3008_s30 = smov [#allocation7]  }
  0x22   : > { %s491_s20 = sshll.u32 %s3008_s30, 4  ;;  %s3009_s18 = smov [#allocation10]   ;;  %s492_s20 = int_to_ptr.vmem [resolvable:$true] %s491_s20 }
  0x23   : > { %s515_s28 = sshll.u32 %s3009_s18, 4  ;;  %p3184_p13 = pnand %p3176_p11, %p2645_p12  ;;  %s3188_s28 = int_to_ptr.vmem [resolvable:$true] %s515_s28 }
  0x24   : > { %s3674_s6 = sld [smem:[#allocation28_spill]] }
  0x25   : > { %p3198_p1 = pneg %p3184_p13 }
  0x2a   : > { %s2776_s26 = scalar_lea.hbm %s3674_s6, 16 }
  0x2b   : > { %p2777_p0 = scmp.ne.s32.totalorder %s3674_s6, %s2776_s26  ;;  %p2783_p5 = scmp.lt.u32.totalorder %s2776_s26, %s3674_s6 }
  0x2d   : > { %p2779_p2 = pnand %p3198_p1, %p2777_p0 }
  0x2f   : > { %p2780_p3 = pneg %p2779_p2 }
  0x31   : > { %p2785_p6 = pnand %p2783_p5, %p2780_p3 }
  0x33   : > { %2788 = shalt.err (!%p2785_p6)
}
  0x34   : > { %s2789_s22 = scalar_lea.vmem %s492_s20, 16  ;;  %s2796_s29 = scalar_lea.vmem %s492_s20, 32 }
  0x35   : > { %p2790_p7 = scmp.ne.s32.totalorder %s492_s20, %s2789_s22  ;;  %p2797_p8 = scmp.lt.s32.totalorder %s492_s20, %s492_s20 }
  0x36   : > { %p2798_p4 = scmp.lt.s32.totalorder %s2796_s29, %s2789_s22 }
  0x37   : > { %p2792_p9 = pnand %p2790_p7, %p3198_p1 }
  0x38   : > { %p2799_p11 = por %p2798_p4, %p2797_p8 }
  0x39   : > { %p2793_p12 = pneg %p2792_p9 }
  0x3b   : > { %p2800_p10 = pnand %p2799_p11, %p2793_p12 }
  0x3d   : > { %2803 = shalt.err (!%p2800_p10)
}
  0x3e   : > { %2651 = dma.hbm_to_vmem [thread:$0]  (!%p3184_p13), %s3674_s6, 16, %s492_s20, [#allocation8]  }
  0x3f   : > { %s3676_s8 = sld [smem:[#allocation29_spill]] }
  0x45   : > { %s2804_s18 = scalar_lea.hbm %s3676_s8, 16 }
  0x46   : > { %p2805_p0 = scmp.ne.s32.totalorder %s3676_s8, %s2804_s18  ;;  %p2811_p8 = scmp.lt.u32.totalorder %s2804_s18, %s3676_s8 }
  0x48   : > { %p2807_p2 = pnand %p2805_p0, %p3198_p1 }
  0x4a   : > { %p2808_p4 = pneg %p2807_p2 }
  0x4c   : > { %p2813_p10 = pnand %p2811_p8, %p2808_p4 }
  0x4e   : > { %2816 = shalt.err (!%p2813_p10)
}
  0x4f   : > { %s2817_s20 = scalar_lea.vmem %s3188_s28, 16  ;;  %s2824_s15 = scalar_lea.vmem %s3188_s28, 32 }
  0x50   : > { %p2818_p11 = scmp.ne.s32.totalorder %s3188_s28, %s2817_s20  ;;  %p2825_p6 = scmp.lt.s32.totalorder %s3188_s28, %s3188_s28 }
  0x51   : > { %p2826_p7 = scmp.lt.s32.totalorder %s2824_s15, %s2817_s20 }
  0x52   : > { %p2820_p3 = pnand %p2818_p11, %p3198_p1 }
  0x53   : > { %p2827_p9 = por %p2826_p7, %p2825_p6 }
  0x54   : > { %p2821_p5 = pneg %p2820_p3 }
  0x56   : > { %p2828_p12 = pnand %p2827_p9, %p2821_p5 }
  0x58   : > { %2831 = shalt.err (!%p2828_p12)
}
  0x59   : > { %2657 = dma.hbm_to_vmem [thread:$0]  (!%p3184_p13), %s3676_s8, 16, %s3188_s28, [#allocation11]  }
  0x5a   : > { %s3010_s0 = smov [#allocation4]   ;;  %s2832_s22 = scalar_lea.hbm %s3626_s5, 256 }
  0x5b   : > { %s477_s17 = sshll.u32 %s3010_s0, 4  ;;  %p2833_p0 = scmp.ne.s32.totalorder %s3626_s5, %s2832_s22  ;;  %s478_s17 = int_to_ptr.vmem [resolvable:$true] %s477_s17 }
  0x5c   : > { %p2839_p8 = scmp.lt.u32.totalorder %s2832_s22, %s3626_s5 }
  0x5d   : > { %p2835_p2 = pnand %p2833_p0, %p3198_p1 }
  0x5f   : > { %p2836_p4 = pneg %p2835_p2 }
  0x61   : > { %p2841_p10 = pnand %p2839_p8, %p2836_p4 }
  0x63   : > { %2844 = shalt.err (!%p2841_p10)
}
  0x64   : > { %s2845_s28 = scalar_lea.vmem %s478_s17, 256  ;;  %p2853_p6 = scmp.lt.s32.totalorder %s478_s17, %s478_s17 }
  0x65   : > { %p2846_p11 = scmp.ne.s32.totalorder %s478_s17, %s2845_s28  ;;  %p2854_p7 = scmp.lt.s32.totalorder %s2845_s28, %s2845_s28 }
  0x67   : > { %p2848_p3 = pnand %p2846_p11, %p3198_p1  ;;  %p2855_p9 = por %p2854_p7, %p2853_p6 }
  0x69   : > { %p2849_p5 = pneg %p2848_p3 }
  0x6b   : > { %p2856_p12 = pnand %p2855_p9, %p2849_p5 }
  0x6d   : > { %2859 = shalt.err (!%p2856_p12)
}
  0x6e   : > { %s3011_s16 = smov 64   ;;  %s3012_s21 = smov 4  }
  0x6f   : > { %2648 = dma.hbm_to_vmem [thread:$0]  (!%p3184_p13), %s3626_s5, 256, %s478_s17, [#allocation5], %s3011_s16, %s3011_s16, %s3012_s21  }
  0x70   : > { %s3013_s26 = smov [#allocation9]   ;;  %s3014_s22 = smov [#allocation12]  }
  0x71   : > { %s501_s18 = sshll.u32 %s3013_s26, 4  ;;  %s526_s29 = sshll.u32 %s3014_s22, 4  ;;  %s502_s18 = int_to_ptr.vmem [resolvable:$true] %s501_s18  ;;  %s3256_s29 = int_to_ptr.vmem [resolvable:$true] %s526_s29 }
  0x72   : > { %s2860_s28 = scalar_lea.hbm %s3628_s7, 256 }
  0x73   : > { %p2861_p0 = scmp.ne.s32.totalorder %s3628_s7, %s2860_s28  ;;  %p2867_p8 = scmp.lt.u32.totalorder %s2860_s28, %s3628_s7 }
  0x75   : > { %p2863_p2 = pnand %p2861_p0, %p3198_p1 }
  0x77   : > { %p2864_p4 = pneg %p2863_p2 }
  0x79   : > { %p2869_p10 = pnand %p2867_p8, %p2864_p4 }
  0x7b   : > { %2872 = shalt.err (!%p2869_p10)
}
  0x7c   : > { %s2873_s0 = scalar_lea.vmem %s502_s18, 256  ;;  %p2881_p6 = scmp.lt.s32.totalorder %s502_s18, %s502_s18 }
  0x7d   : > { %p2874_p11 = scmp.ne.s32.totalorder %s502_s18, %s2873_s0  ;;  %p2882_p7 = scmp.lt.s32.totalorder %s2873_s0, %s2873_s0 }
  0x7f   : > { %p2876_p3 = pnand %p2874_p11, %p3198_p1  ;;  %p2883_p9 = por %p2882_p7, %p2881_p6 }
  0x81   : > { %p2877_p5 = pneg %p2876_p3 }
  0x83   : > { %p2884_p12 = pnand %p2883_p9, %p2877_p5 }
  0x85   : > { %2887 = shalt.err (!%p2884_p12)
}
  0x86   : > { %2654 = dma.hbm_to_vmem [thread:$0]  (!%p3184_p13), %s3628_s7, 256, %s502_s18, [#allocation8], %s3011_s16, %s3011_s16, %s3012_s21  }
  0x87   : > { %s2888_s20 = scalar_lea.hbm %s3630_s9, 16 }
  0x88   : > { %p2889_p0 = scmp.ne.s32.totalorder %s3630_s9, %s2888_s20  ;;  %p2895_p8 = scmp.lt.u32.totalorder %s2888_s20, %s3630_s9 }
  0x8a   : > { %p2891_p2 = pnand %p2889_p0, %p3198_p1 }
  0x8c   : > { %p2892_p4 = pneg %p2891_p2 }
  0x8e   : > { %p2897_p10 = pnand %p2895_p8, %p2892_p4 }
  0x90   : > { %2900 = shalt.err (!%p2897_p10)
}
  0x91   : > { %s2901_s16 = scalar_lea.vmem %s3256_s29, 16  ;;  %s2908_s21 = scalar_lea.vmem %s3256_s29, 32 }
  0x92   : > { %p2902_p11 = scmp.ne.s32.totalorder %s3256_s29, %s2901_s16  ;;  %p2909_p6 = scmp.lt.s32.totalorder %s3256_s29, %s3256_s29 }
  0x93   : > { %p2910_p7 = scmp.lt.s32.totalorder %s2908_s21, %s2901_s16 }
  0x94   : > { %p2904_p3 = pnand %p2902_p11, %p3198_p1 }
  0x95   : > { %p2911_p9 = por %p2910_p7, %p2909_p6 }
  0x96   : > { %p2905_p5 = pneg %p2904_p3 }
  0x98   : > { %p2912_p12 = pnand %p2911_p9, %p2905_p5 }
  0x9a   : > { %2915 = shalt.err (!%p2912_p12)
}
  0x9b   : > { %2660 = dma.hbm_to_vmem [thread:$0]  (!%p3184_p13), %s3630_s9, 16, %s3256_s29, [#allocation11]  }
  0x9c   : > { %p3677_p0 = scmp.ne.s32.totalorder %s3671_s23, 0 }
  0x9d   : > { %p3678_p1 = scmp.ne.s32.totalorder (!%p3677_p0), %s3672_s24, 0 }
  0x9e   : > { %580 = sbr.rel (%p3677_p0) target bundleno = 2794 (0xaea), region = 88 }
  0xa5   : > { %2969 = dma.done.wait (%p3678_p1), [#allocation5], 256  }
  0xa6   : > { %2971 = vsyncadd (%p3678_p1), [#allocation5], 4294967040 }
  0xa7   : > { %2973 = dma.done.wait (%p3678_p1), [#allocation8], 272  }
  0xa8   : > { %2975 = vsyncadd (%p3678_p1), [#allocation8], 4294967024 }
  0xa9   : > { %2977 = dma.done.wait (%p3678_p1), [#allocation11], 32  }
  0xaa   : > { %2979 = vsyncadd (%p3678_p1), [#allocation11], 4294967264  ;;  %p659_p13 = scmp.lt.s32.totalorder %s2998_s27, 1  ;;  %vm706_vm0 = vcmask 261120   ;;  %v3015_v0 = vmov 0.0   ;;  %vm3016_vm1 = vmmov 0   ;;  %v888_v26 = vlaneseq }
  0xab   : > { %2531 = vmatprep.subr.bf16.mxu1 %v3015_v0  ;;  %2523 = vmatprep.subr.bf16.mxu0 %v3015_v0  ;;  %2054 = vst.msk [vmem:[#allocation3] sm:$0xff] %vm706_vm0, %v3015_v0  ;;  %v2742_v1 = vld [vmem:[%s3624_s3] sm:$0xff]   ;;  %s3679_s1 = sld [smem:[#allocation27_spill]]  ;;  %s3680_s20 = sld [smem:[#allocation26_spill]]  ;;  %v2744_v3 = vld [vmem:[%s3624_s3 + $0x8] sm:$0xff]   ;;  %v2746_v22 = vld [vmem:[#allocation4] sm:$0xff]  }
  0xac   : > { %2535 = vmatprep.mubr.msk.bf16.mxu1 %vm3016_vm1, %v3015_v0  ;;  %s660_s23 = scalar_select %p659_p13, %s2998_s27, 1  ;;  %2527 = vmatprep.mubr.msk.bf16.mxu0 %vm3016_vm1, %v3015_v0  ;;  %v2447_v7 = vld [vmem:[%s3625_s4] ss:$0 sm:$0xff]  ;;  %v2747_v23 = vld [vmem:[#allocation4 + $0x8] sm:$0xff]   ;;  %v3020_v24 = vmov 1983009808  }
  0xad   : > { %2532 = vmatpush3.bf16.msra.mxu1 %v2742_v1  ;;  %v2443_v8 = vld [vmem:[%s3623_s2] ss:$0 sm:$0xff]  ;;  %s3018_s19 = smov 120   ;;  %s3019_s30 = smov 112   ;;  %v886_v25 = vunpack.c.l.s4 %v3020_v24  ;;  %v3021_v27 = vmov 1934713408  }
  0xae   : > { %s2442_s24 = sshll.u32 %s660_s23, 3  ;;  %2533 = vmatprep.subr.bf16.mxu1 %v3015_v0  ;;  %v903_v28 = vunpack.c.l.s4 %v3021_v27  ;;  %v889_v30 = vshrl.u32 %v888_v26, 7  ;;  %v3022_v46 = vmov 0   ;;  %vm1384_vm2 = vcmask 64512   ;;  %s3023_s29 = smov 16  }
  0xaf   : > { %v887_v29 = vunpack.c.0.s8 %v886_v25  ;;  %vm1620_vm3 = vcmask 1043456   ;;  %s3024_s8 = smov 8   ;;  %s3025_s26 = smov 24   ;;  %vm1951_vm4 = vcmask 130048   ;;  %vm1953_vm5 = vcmask 195584  }
  0xb0   : > { %v904_v31 = vunpack.c.0.s8 %v903_v28  ;;  %vm2159_vm6 = vcmask 523264   ;;  %s3681_s28 = sld [smem:[#allocation23_spill]]  ;;  %s3682_s16 = sld [smem:[#allocation30_spill]] }
  0xb1   : > { %v2743_v2 = vld [vmem:[%s3679_s1] sm:$0xff]   ;;  %s662_s15 = scalar_lea.vmem %s3680_s20, %s2442_s24  ;;  %v2745_v4 = vld [vmem:[%s3679_s1 + $0x8] sm:$0xff]   ;;  %2534 = vmatpush3.bf16.msra.mxu1 %v2744_v3  ;;  %s3017_s24 = smov 104   ;;  %v3370_v32 = vsub.s32 %v887_v29, %v889_v30 }
  0xb2   : > { %2524 = vmatpush3.bf16.msra.mxu0 %v2743_v2  ;;  %v3341_v5 = vld [vmem:[%s662_s15] sm:$0xff]  ;;  %2547 = vmatprep.subr.bf16.mxu1 %v3015_v0  ;;  %v3373_v36 = vsub.s32 %v904_v31, %v889_v30  ;;  %s656_s20 = sand.u32 1, %s2990_s25   ;;  %s3683_s0 = sld [smem:[#allocation31_spill]] }
  0xb3   : > { %2525 = vmatprep.subr.bf16.mxu0 %v3015_v0  ;;  %v682_v6 = vpack.c.bf16 %v3341_v5, %v3341_v5  ;;  %s2441_s15 = sshll.u32 %s656_s20, 3  ;;  %s2484_s23 = sshll.u32 %s2998_s27, 7 }
  0xb4   : > { %s2251_s22 = scalar_lea.sflag [#allocation6], %s656_s20  ;;  %s3026_s27 = smov [#allocation13]  }
  0xb5   : > { %2536 = vmatmul.mubr.msk.bf16.vlgmr.msra.gmra.mrb[0].mxu1 %vm706_vm0, %v682_v6 }
  0xb6   : > { %2526 = vmatpush3.bf16.msra.mxu0 %v2745_v4  ;;  %2549 = vmatprep.mubr.msk.bf16.mxu1 %vm3016_vm1, %v3015_v0  ;;  %p3685_p4 = scmp.ne.s32.totalorder %s3681_s28, 0 }
  0xb7   : > { %2539 = vmatprep.subr.bf16.mxu0 %v3015_v0 }
  0xb9   : > { %2528 = vmatmul.mubr.msk.bf16.vlgmr.msra.gmra.mrb[0].mxu0 %vm706_vm0, %v682_v6 }
  0xba   : > { %2543 = vmatprep.mubr.msk.bf16.mxu0 %vm3016_vm1, %v3015_v0  ;;  %2540 = vmatpush3.bf16.msra.mxu0 %v2746_v22 }
  0xbb   : > { %2541 = vmatprep.subr.bf16.mxu0 %v3015_v0 }
  0xbe   : > { %2542 = vmatpush3.bf16.msra.mxu0 %v2747_v23 }
  0xbf   : > { %2553 = vmatprep.subr.bf16.mxu0 %v3015_v0 }
  0xc1   : > { %2544 = vmatmul.mubr.msk.bf16.vlgmr.msra.gmra.mrb[4].mxu0 %vm706_vm0, %v682_v6 }
  0xc2   : > { %2555 = vmatprep.mubr.msk.bf16.mxu0 %vm3016_vm1, %v3015_v0 }
 0x188   : > { %v808_v9 = vpop.f32.mrb[0].mxu1 }
 0x189   : > { %v809_v10 = vadd.f32 %v2447_v7, %v808_v9  ;;  %v2537_v11 = vpop.f32.mrb[1].mxu1 }
 0x18a   : > { %v811_v14 = vpop.f32.mrb[2].mxu1 }
 0x18b   : > { %v1046_v16 = vpack.c.bf16 %v809_v10, %v809_v10  ;;  %v2538_v17 = vpop.f32.mrb[3].mxu1 }
 0x18c   : > { %v744_v12 = vpop.f32.mrb[0].mxu0 }
 0x18d   : > { %v745_v13 = vadd.f32 %v2443_v8, %v744_v12  ;;  %v2529_v15 = vpop.f32.mrb[1].mxu0  ;;  %1052 = vrot.lane.b32.xlu1 %v1046_v16, %s3017_s24  ;;  %1048 = vrot.lane.b32.xlu0 %v1046_v16, %s3018_s19  ;;  %v1060_v45 = vrot.slane %v1046_v16, %v3370_v32 }
 0x18e   : > { %v747_v18 = vpop.f32.mrb[2].mxu0 }
 0x18f   : > { %v750_v19 = vmul.f32 0.35355338, %v745_v13  ;;  %v2530_v20 = vpop.f32.mrb[3].mxu0 }
 0x191   : > { %v877_v21 = vpack.c.bf16 %v750_v19, %v750_v19  ;;  %1050 = vrot.lane.b32.xlu0 %v1046_v16, %s3019_s30 }
 0x193   : > { %879 = vrot.lane.b32.xlu1 %v877_v21, %s3018_s19  ;;  %v891_v53 = vrot.slane %v877_v21, %v3370_v32 }
 0x195   : > { %881 = vrot.lane.b32.xlu0 %v877_v21, %s3019_s30 }
 0x197   : > { %883 = vrot.lane.b32.xlu1 %v877_v21, %s3017_s24 }
 0x1ff   : > { %v1053_v33 = vpop.permute.xlu1 %1052  ;;  %v1049_v34 = vpop.permute.xlu0 %1048 }
 0x200   : > { %v1102_v35 = vrot.slane %v1053_v33, %v3370_v32  ;;  %v1094_v37 = vrot.slane %v1049_v34, %v3370_v32 }
 0x202   : > { %v1103_v38 = vcombine.low %v1094_v37, %v1102_v35  ;;  %v1104_v39 = vcombine.high %v1094_v37, %v1102_v35 }
 0x203   : > { %v1051_v40 = vpop.permute.xlu0 %1050 }
 0x204   : > { %v1111_v42 = vrot.slane %v1103_v38, %v3373_v36  ;;  %v1118_v43 = vrot.slane %v1104_v39, %v3373_v36  ;;  %v1068_v44 = vrot.slane %v1051_v40, %v3370_v32 }
 0x205   : > { %v880_v41 = vpop.permute.xlu1 %879 }
 0x206   : > { %v1119_v47 = vcombine.high %v1111_v42, %v3022_v46  ;;  %v1120_v48 = vcombine.high %v1118_v43, %v3022_v46  ;;  %v925_v49 = vrot.slane %v880_v41, %v3370_v32  ;;  %v1069_v50 = vcombine.low %v1060_v45, %v1068_v44 }
 0x207   : > { %v1070_v51 = vcombine.high %v1060_v45, %v1068_v44  ;;  %v882_v52 = vpop.permute.xlu0 %881  ;;  %v1126_v55 = vshrl.u32 %v1111_v42, 16  ;;  %v1142_v56 = vshrl.u32 %v1118_v43, 16 }
 0x208   : > { %v899_v57 = vrot.slane %v882_v52, %v3370_v32  ;;  %v1134_v59 = vshrl.u32 %v1119_v47, 16  ;;  %v1150_v60 = vshrl.u32 %v1120_v48, 16  ;;  %v1077_v61 = vrot.slane %v1069_v50, %v3373_v36 }
 0x209   : > { %v884_v54 = vpop.permute.xlu1 %883  ;;  %v1084_v62 = vrot.slane %v1070_v51, %v3373_v36 }
 0x20a   : > { %v933_v58 = vrot.slane %v884_v54, %v3370_v32  ;;  %v900_v63 = vcombine.low %v891_v53, %v899_v57  ;;  %v901_v1 = vcombine.high %v891_v53, %v899_v57  ;;  %v1085_v4 = vcombine.high %v1077_v61, %v3022_v46 }
 0x20b   : > { %v1086_v6 = vcombine.high %v1084_v62, %v3022_v46  ;;  %v1123_v7 = vpack.i.b16 %v1111_v42, %v1077_v61  ;;  %v1125_v8 = vshrl.u32 %v1077_v61, 16  ;;  %v1139_v9 = vpack.i.b16 %v1118_v43, %v1084_v62 }
 0x20c   : > { %v934_v2 = vcombine.low %v925_v49, %v933_v58  ;;  %v935_v3 = vcombine.high %v925_v49, %v933_v58  ;;  %v1141_v10 = vshrl.u32 %v1084_v62, 16  ;;  %v908_v11 = vrot.slane %v900_v63, %v3373_v36 }
 0x20d   : > { %v915_v12 = vrot.slane %v901_v1, %v3373_v36  ;;  %v1127_v13 = vpack.i.b16 %v1126_v55, %v1125_v8  ;;  %v1131_v14 = vpack.i.b16 %v1119_v47, %v1085_v4  ;;  %v1133_v15 = vshrl.u32 %v1085_v4, 16 }
 0x20e   : > { %v1147_v16 = vpack.i.b16 %v1120_v48, %v1086_v6  ;;  %v1143_v17 = vpack.i.b16 %v1142_v56, %v1141_v10  ;;  %v1149_v18 = vshrl.u32 %v1086_v6, 16  ;;  %v1153_v19 = vcombine.low %v1123_v7, %v1139_v9 }
 0x20f   : > { %v916_v20 = vcombine.high %v908_v11, %v3022_v46  ;;  %v1135_v21 = vpack.i.b16 %v1134_v59, %v1133_v15  ;;  %v917_v23 = vcombine.high %v915_v12, %v3022_v46  ;;  %v956_v27 = vshrl.u32 %v908_v11, 16 }
 0x210   : > { %v1161_v22 = vcombine.low %v1131_v14, %v1147_v16  ;;  %v1151_v24 = vpack.i.b16 %v1150_v60, %v1149_v18  ;;  %v1160_v25 = vrot.slane %v1153_v19, %v3370_v32  ;;  %v1178_v26 = vcombine.low %v1127_v13, %v1143_v17 }
 0x211   : > { %v964_v28 = vshrl.u32 %v916_v20, 16  ;;  %v972_v29 = vshrl.u32 %v915_v12, 16  ;;  %v942_v30 = vrot.slane %v934_v2, %v3373_v36  ;;  %v949_v31 = vrot.slane %v935_v3, %v3373_v36 }
 0x212   : > { %v1186_v33 = vcombine.low %v1135_v21, %v1151_v24  ;;  %v980_v34 = vshrl.u32 %v917_v23, 16  ;;  %v1168_v35 = vrot.slane %v1161_v22, %v3370_v32  ;;  %v1185_v37 = vrot.slane %v1178_v26, %v3370_v32 }
 0x213   : > { %v950_v38 = vcombine.high %v942_v30, %v3022_v46  ;;  %v951_v39 = vcombine.high %v949_v31, %v3022_v46  ;;  %v954_v40 = vpack.i.b16 %v942_v30, %v908_v11  ;;  %v957_v41 = vshrl.u32 %v942_v30, 16 }
 0x214   : > { %v970_v42 = vpack.i.b16 %v949_v31, %v915_v12  ;;  %v973_v43 = vshrl.u32 %v949_v31, 16  ;;  %v1169_v44 = vcombine.low %v1160_v25, %v1168_v35  ;;  %v1193_v45 = vrot.slane %v1186_v33, %v3370_v32  ;;  %v871_v33 = vpop.f32.mrb[4].mxu0 }
 0x215   : > { %v958_v47 = vpack.i.b16 %v957_v41, %v956_v27  ;;  %v962_v48 = vpack.i.b16 %v950_v38, %v916_v20  ;;  %v965_v49 = vshrl.u32 %v950_v38, 16  ;;  %v978_v50 = vpack.i.b16 %v951_v39, %v917_v23 }
 0x216   : > { %v974_v51 = vpack.i.b16 %v973_v43, %v972_v29  ;;  %v981_v52 = vshrl.u32 %v951_v39, 16  ;;  %v984_v53 = vcombine.low %v954_v40, %v970_v42  ;;  %v1176_v54 = vrot.slane %v1169_v44, %v3373_v36 }
 0x217   : > { %v966_v55 = vpack.i.b16 %v965_v49, %v964_v28  ;;  %v992_v56 = vcombine.low %v962_v48, %v978_v50  ;;  %v1194_v57 = vcombine.low %v1185_v37, %v1193_v45 }
 0x218   : > { %v982_v58 = vpack.i.b16 %v981_v52, %v980_v34  ;;  %v1009_v59 = vcombine.low %v958_v47, %v974_v51  ;;  %v991_v60 = vrot.slane %v984_v53, %v3370_v32  ;;  %v1206_v1 = vshrl.u32 %v1176_v54, 16  ;;  %v2545_v34 = vpop.f32.mrb[5].mxu0 }
 0x219   : > { %v999_v61 = vrot.slane %v992_v56, %v3370_v32  ;;  %v1201_v62 = vrot.slane %v1194_v57, %v3373_v36  ;;  %v1177_v11 = vcombine.high %v1176_v54, %v3022_v46  ;;  %v874_v35 = vpop.f32.mrb[6].mxu0  ;;  %v2451_v56 = vld [vmem:[#allocation7] ss:$0 sm:$0xff] }
 0x21a   : > { %v1017_v63 = vcombine.low %v966_v55, %v982_v58  ;;  %v1016_v7 = vrot.slane %v1009_v59, %v3370_v32  ;;  %v2546_v37 = vpop.f32.mrb[7].mxu0 }
 0x21b   : > { %v1000_v2 = vcombine.low %v991_v60, %v999_v61  ;;  %v1205_v3 = vpack.i.b16 %v1201_v62, %v1176_v54  ;;  %v1207_v4 = vshrl.u32 %v1201_v62, 16  ;;  %v1202_v6 = vcombine.high %v1201_v62, %v3022_v46 }
 0x21c   : > { %v1024_v8 = vrot.slane %v1017_v63, %v3370_v32  ;;  %v1212_v18 = vshrl.u32 %v1177_v11, 16  ;;  %v872_v60 = vadd.f32 %v2451_v56, %v871_v33 }
 0x21d   : > { %v1389_v9 = vsel %vm1384_vm2, %v1205_v3, 0  ;;  %v1208_v10 = vpack.i.b16 %v1207_v4, %v1206_v1  ;;  %v1007_v14 = vrot.slane %v1000_v2, %v3373_v36  ;;  %v1213_v15 = vshrl.u32 %v1202_v6, 16 }
 0x21e   : > { %v1025_v12 = vcombine.low %v1016_v7, %v1024_v8  ;;  %2548 = vmatpush3.bf16.xpose.msra.mxu1 %v1389_v9  ;;  %v1211_v17 = vpack.i.b16 %v1202_v6, %v1177_v11  ;;  %v1215_v61 = vpack.c.bf16 %v872_v60, %v872_v60 }
 0x21f   : > { %v1435_v13 = vsel %vm1384_vm2, %v1208_v10, 0  ;;  %2559 = vmatprep.subr.bf16.mxu1 %v3015_v0  ;;  %v1037_v21 = vshrl.u32 %v1007_v14, 16  ;;  %v1214_v22 = vpack.i.b16 %v1213_v15, %v1212_v18  ;;  %v1008_v27 = vcombine.high %v1007_v14, %v3022_v46 }
 0x220   : > { %2554 = vmatpush3.bf16.xpose.msra.mxu0 %v1435_v13  ;;  %v1032_v16 = vrot.slane %v1025_v12, %v3373_v36  ;;  %v1481_v23 = vsel %vm1384_vm2, %v1211_v17, 0 }
 0x221   : > { %2565 = vmatprep.subr.bf16.mxu0 %v3015_v0  ;;  %v1527_v26 = vsel %vm1384_vm2, %v1214_v22, 0  ;;  %v1043_v30 = vshrl.u32 %v1008_v27, 16 }
 0x222   : > { %v1038_v19 = vshrl.u32 %v1032_v16, 16  ;;  %v1036_v20 = vpack.i.b16 %v1032_v16, %v1007_v14  ;;  %v1033_v25 = vcombine.high %v1032_v16, %v3022_v46 }
 0x224   : > { %v1039_v24 = vpack.i.b16 %v1038_v19, %v1037_v21  ;;  %v1044_v28 = vshrl.u32 %v1033_v25, 16  ;;  %v1042_v29 = vpack.i.b16 %v1033_v25, %v1008_v27 }
 0x225   : > { %2550 = vmatmul.mubr.msk.bf16.vlgmr.msra.gmra.mrb[4].mxu1 %vm1384_vm2, %v1036_v20 }
 0x226   : > { %2560 = vmatpush3.bf16.xpose.msra.mxu1 %v1481_v23  ;;  %2561 = vmatprep.mubr.msk.bf16.mxu1 %vm3016_vm1, %v3015_v0  ;;  %v1045_v31 = vpack.i.b16 %v1044_v28, %v1043_v30 }
 0x227   : > { %2556 = vmatmul.mubr.msk.bf16.vlgmr.msra.gmra.mrb[8].mxu0 %vm1384_vm2, %v1039_v24  ;;  %2571 = vmatprep.subr.bf16.mxu1 %v3015_v0 }
 0x228   : > { %2566 = vmatpush3.bf16.xpose.msra.mxu0 %v1527_v26  ;;  %2567 = vmatprep.mubr.msk.bf16.mxu0 %vm3016_vm1, %v3015_v0 }
 0x229   : > { %2577 = vmatprep.subr.bf16.mxu0 %v3015_v0 }
 0x22d   : > { %2562 = vmatmul.mubr.msk.bf16.vlgmr.msra.gmra.mrb[8].mxu1 %vm1384_vm2, %v1042_v29  ;;  %v1229_v29 = vrot.slane %v1215_v61, %v3370_v32 }
 0x22e   : > { %2573 = vmatprep.mubr.msk.bf16.mxu1 %vm3016_vm1, %v3015_v0 }
 0x22f   : > { %2568 = vmatmul.mubr.msk.bf16.vlgmr.msra.gmra.mrb[12].mxu0 %vm1384_vm2, %v1045_v31 }
 0x230   : > { %2579 = vmatprep.mubr.msk.bf16.mxu0 %vm3016_vm1, %v3015_v0 }
 0x2f8   : > { %v1425_v38 = vpop.f32.mrb[4].mxu1 }
 0x2f9   : > { %v2551_v39 = vpop.f32.mrb[5].mxu1  ;;  %v1569_v40 = vsel %vm1384_vm2, %v1425_v38, -inf }
 0x2fa   : > { %1570 = vmax.xlane.f32.xlu0 %v1569_v40  ;;  %v1428_v41 = vpop.f32.mrb[6].mxu1  ;;  %v1471_v42 = vpop.f32.mrb[8].mxu0 }
 0x2fb   : > { %v2552_v43 = vpop.f32.mrb[7].mxu1  ;;  %v2557_v44 = vpop.f32.mrb[9].mxu0  ;;  %v1572_v45 = vsel %vm1384_vm2, %v1471_v42, -inf }
 0x2fc   : > { %1573 = vmax.xlane.f32.xlu1 %v1572_v45  ;;  %v1474_v47 = vpop.f32.mrb[10].mxu0 }
 0x2fd   : > { %v2558_v48 = vpop.f32.mrb[11].mxu0 }
 0x300   : > { %v1517_v49 = vpop.f32.mrb[8].mxu1 }
 0x301   : > { %v2563_v50 = vpop.f32.mrb[9].mxu1  ;;  %v1575_v51 = vsel %vm1384_vm2, %v1517_v49, -inf }
 0x302   : > { %1576 = vmax.xlane.f32.xlu0 %v1575_v51  ;;  %v1520_v52 = vpop.f32.mrb[10].mxu1  ;;  %v1563_v53 = vpop.f32.mrb[12].mxu0 }
 0x303   : > { %v2564_v54 = vpop.f32.mrb[11].mxu1  ;;  %v2569_v55 = vpop.f32.mrb[13].mxu0  ;;  %v1578_v59 = vsel %vm1384_vm2, %v1563_v53, -inf }
 0x304   : > { %v1566_v57 = vpop.f32.mrb[14].mxu0 }
 0x305   : > { %v2570_v58 = vpop.f32.mrb[15].mxu0 }
 0x306   : > { %1579 = vmax.xlane.f32.xlu0 %v1578_v59 }
 0x30d   : > { %1217 = vrot.lane.b32.xlu1 %v1215_v61, %s3018_s19 }
 0x387   : > { %v1571_v62 = vpop.xlane.xlu0 %1570 }
 0x388   : > { %v1581_v63 = vsub.f32 %v1425_v38, %v1571_v62 }
 0x389   : > { %v1574_v1 = vpop.xlane.xlu1 %1573 }
 0x38a   : > { %v1585_v2 = vmul.f32 1.442695, %v1581_v63  ;;  %v1582_v3 = vsub.f32 %v1471_v42, %v1574_v1 }
 0x38c   : > { %2756 = vpow2.f32 %v1585_v2  ;;  %v1587_v4 = vmul.f32 1.442695, %v1582_v3 }
 0x38d   : > { %v1218_v20 = vpop.permute.xlu1 %1217 }
 0x38e   : > { %2758 = vpow2.f32 %v1587_v4  ;;  %v1263_v24 = vrot.slane %v1218_v20, %v3370_v32 }
 0x38f   : > { %v1577_v10 = vpop.xlane.xlu0 %1576 }
 0x390   : > { %v1583_v12 = vsub.f32 %v1517_v49, %v1577_v10 }
 0x392   : > { %v1589_v14 = vmul.f32 1.442695, %v1583_v12 }
 0x393   : > { %v1580_v11 = vpop.xlane.xlu0 %1579 }
 0x394   : > { %v1584_v13 = vsub.f32 %v1563_v53, %v1580_v11  ;;  %2760 = vpow2.f32 %v1589_v14 }
 0x396   : > { %v3439_v6 = vpop.eup %2756  ;;  %v1591_v15 = vmul.f32 1.442695, %v1584_v13 }
 0x397   : > { %v1593_v7 = vsel %vm1384_vm2, %v3439_v6, 0.0 }
 0x398   : > { %v3443_v8 = vpop.eup %2758  ;;  %1594 = vadd.xlane.f32.xlu1 %v1593_v7  ;;  %2762 = vpow2.f32 %v1591_v15 }
 0x399   : > { %v1596_v9 = vsel %vm1384_vm2, %v3443_v8, 0.0 }
 0x39a   : > { %1597 = vadd.xlane.f32.xlu0 %v1596_v9 }
 0x39e   : > { %v3449_v16 = vpop.eup %2760 }
 0x39f   : > { %v1599_v18 = vsel %vm1384_vm2, %v3449_v16, 0.0 }
 0x3a2   : > { %v3451_v17 = vpop.eup %2762 }
 0x3a3   : > { %v1602_v19 = vsel %vm1384_vm2, %v3451_v17, 0.0 }
 0x3a9   : > { %1221 = vrot.lane.b32.xlu1 %v1215_v61, %s3017_s24  ;;  %s658_s24 = scalar_lea.vmem [#allocation13], %s2441_s15  ;;  %s2920_s15 = sshll.u32 %s3026_s27, 4  ;;  %s2921_s15 = int_to_ptr.vmem [resolvable:$false] %s2920_s15 }
 0x3aa   : > { %s2264_s19 = sshll.u32 %s658_s24, 4  ;;  %s2922_s17 = scalar_lea.vmem %s2921_s15, 256  ;;  %s3575_s19 = int_to_ptr.vmem [resolvable:$true] %s2264_s19 }
 0x3ab   : > { %s2916_s6 = scalar_lea.vmem %s3575_s19, 128  ;;  %p2923_p11 = scmp.lt.s32.totalorder %s3575_s19, %s2921_s15 }
 0x3ac   : > { %p2917_p2 = scmp.ne.s32.totalorder %s3575_s19, %s2916_s6  ;;  %p2924_p3 = scmp.lt.s32.totalorder %s2922_s17, %s2916_s6 }
 0x3ae   : > { %p2918_p8 = pnand %p2917_p2, %p3685_p4  ;;  %p2925_p5 = por %p2924_p3, %p2923_p11 }
 0x3b0   : > { %1219 = vrot.lane.b32.xlu0 %v1215_v61, %s3019_s30  ;;  %p2919_p10 = pneg %p2918_p8 }
 0x3b2   : > { %p2926_p6 = pnand %p2925_p5, %p2919_p10 }
 0x3cd   : > { %1600 = vadd.xlane.f32.xlu1 %v1599_v18 }
 0x3cf   : > { %1603 = vadd.xlane.f32.xlu0 %v1602_v19 }
 0x425   : > { %v1595_v21 = vpop.xlane.xlu1 %1594 }
 0x426   : > { %2764 = vrcp.f32 %v1595_v21 }
 0x427   : > { %v1598_v22 = vpop.xlane.xlu0 %1597 }
 0x428   : > { %2766 = vrcp.f32 %v1598_v22 }
 0x429   : > { %v1222_v23 = vpop.permute.xlu1 %1221 }
 0x42a   : > { %v1271_v25 = vrot.slane %v1222_v23, %v3370_v32 }
 0x42b   : > { %v1220_v26 = vpop.permute.xlu0 %1219 }
 0x42c   : > { %v1272_v27 = vcombine.low %v1263_v24, %v1271_v25  ;;  %v1273_v28 = vcombine.high %v1263_v24, %v1271_v25  ;;  %v1237_v30 = vrot.slane %v1220_v26, %v3370_v32 }
 0x42e   : > { %v1280_v31 = vrot.slane %v1272_v27, %v3373_v36  ;;  %v1287_v33 = vrot.slane %v1273_v28, %v3373_v36  ;;  %v1238_v34 = vcombine.low %v1229_v29, %v1237_v30  ;;  %v1239_v35 = vcombine.high %v1229_v29, %v1237_v30 }
 0x430   : > { %v1288_v37 = vcombine.high %v1280_v31, %v3022_v46  ;;  %v1289_v38 = vcombine.high %v1287_v33, %v3022_v46  ;;  %v1246_v39 = vrot.slane %v1238_v34, %v3373_v36  ;;  %v1253_v40 = vrot.slane %v1239_v35, %v3373_v36  ;;  %v2765_v3 = vpop.eup %2764 }
 0x431   : > { %v1295_v41 = vshrl.u32 %v1280_v31, 16  ;;  %v1311_v42 = vshrl.u32 %v1287_v33, 16  ;;  %v1609_v15 = vmul.f32 %v2765_v3, %v3439_v6 }
 0x432   : > { %v1303_v43 = vshrl.u32 %v1288_v37, 16  ;;  %v1254_v44 = vcombine.high %v1246_v39, %v3022_v46  ;;  %v1255_v45 = vcombine.high %v1253_v40, %v3022_v46  ;;  %v1292_v47 = vpack.i.b16 %v1280_v31, %v1246_v39  ;;  %v2767_v10 = vpop.eup %2766 }
 0x433   : > { %v1319_v48 = vshrl.u32 %v1289_v38, 16  ;;  %v1294_v49 = vshrl.u32 %v1246_v39, 16  ;;  %v1308_v50 = vpack.i.b16 %v1287_v33, %v1253_v40  ;;  %v1310_v51 = vshrl.u32 %v1253_v40, 16 }
 0x434   : > { %v1300_v52 = vpack.i.b16 %v1288_v37, %v1254_v44  ;;  %v1302_v53 = vshrl.u32 %v1254_v44, 16  ;;  %v1316_v54 = vpack.i.b16 %v1289_v38, %v1255_v45  ;;  %v1318_v55 = vshrl.u32 %v1255_v45, 16 }
 0x435   : > { %v1296_v56 = vpack.i.b16 %v1295_v41, %v1294_v49  ;;  %v1312_v57 = vpack.i.b16 %v1311_v42, %v1310_v51  ;;  %v1322_v58 = vcombine.low %v1292_v47, %v1308_v50  ;;  %v1610_v22 = vmul.f32 %v2767_v10, %v3443_v8 }
 0x436   : > { %v1304_v59 = vpack.i.b16 %v1303_v43, %v1302_v53  ;;  %v1320_v60 = vpack.i.b16 %v1319_v48, %v1318_v55  ;;  %v1330_v61 = vcombine.low %v1300_v52, %v1316_v54  ;;  %v1613_v29 = vpack.c.bf16 %v1609_v15, %v1609_v15 }
 0x437   : > { %v1347_v62 = vcombine.low %v1296_v56, %v1312_v57  ;;  %v1329_v63 = vrot.slane %v1322_v58, %v3370_v32  ;;  %v1614_v30 = vpack.c.bf16 %v1610_v22, %v1610_v22 }
 0x438   : > { %v1355_v1 = vcombine.low %v1304_v59, %v1320_v60  ;;  %v1337_v2 = vrot.slane %v1330_v61, %v3370_v32 }
 0x439   : > { %v1354_v7 = vrot.slane %v1347_v62, %v3370_v32 }
 0x43a   : > { %v1338_v4 = vcombine.low %v1329_v63, %v1337_v2  ;;  %v1362_v9 = vrot.slane %v1355_v1, %v3370_v32 }
 0x43c   : > { %v1345_v11 = vrot.slane %v1338_v4, %v3373_v36  ;;  %v1363_v12 = vcombine.low %v1354_v7, %v1362_v9  ;;  %v2748_v7 = vld [vmem:[#allocation9] sm:$0xff]  }
 0x43e   : > { %v1370_v13 = vrot.slane %v1363_v12, %v3373_v36  ;;  %v1346_v14 = vcombine.high %v1345_v11, %v3022_v46  ;;  %v1375_v19 = vshrl.u32 %v1345_v11, 16 }
 0x440   : > { %v1374_v18 = vpack.i.b16 %v1370_v13, %v1345_v11  ;;  %v1376_v20 = vshrl.u32 %v1370_v13, 16  ;;  %v1371_v21 = vcombine.high %v1370_v13, %v3022_v46  ;;  %v1381_v23 = vshrl.u32 %v1346_v14, 16 }
 0x442   : > { %v1622_v24 = vsel %vm1620_vm3, %v1374_v18, 0  ;;  %v1377_v25 = vpack.i.b16 %v1376_v20, %v1375_v19  ;;  %v1380_v26 = vpack.i.b16 %v1371_v21, %v1346_v14  ;;  %v1382_v27 = vshrl.u32 %v1371_v21, 16 }
 0x443   : > { %2572 = vmatpush3.bf16.msra.mxu1 %v1622_v24 }
 0x444   : > { %v1668_v28 = vsel %vm1620_vm3, %v1377_v25, 0  ;;  %2583 = vmatprep.subr.bf16.mxu1 %v3015_v0  ;;  %v1383_v6 = vpack.i.b16 %v1382_v27, %v1381_v23  ;;  %v1714_v46 = vsel %vm1620_vm3, %v1380_v26, 0  ;;  %v2749_v23 = vld [vmem:[#allocation9 + $0x8] sm:$0xff]  }
 0x445   : > { %2578 = vmatpush3.bf16.msra.mxu0 %v1668_v28 }
 0x446   : > { %2574 = vmatmul.mubr.msk.bf16.vlgmr.msra.gmra.mrb[12].mxu1 %vm1384_vm2, %v1613_v29  ;;  %2589 = vmatprep.subr.bf16.mxu0 %v3015_v0  ;;  %v1760_v8 = vsel %vm1620_vm3, %v1383_v6, 0 }
 0x447   : > { %2584 = vmatpush3.bf16.msra.mxu1 %v1714_v46  ;;  %2585 = vmatprep.mubr.msk.bf16.mxu1 %vm3016_vm1, %v3015_v0 }
 0x448   : > { %2580 = vmatmul.mubr.msk.bf16.vlgmr.msra.gmra.mrb[16].mxu0 %vm1384_vm2, %v1614_v30  ;;  %2595 = vmatprep.subr.bf16.mxu1 %v3015_v0 }
 0x449   : > { %2590 = vmatpush3.bf16.msra.mxu0 %v1760_v8  ;;  %2591 = vmatprep.mubr.msk.bf16.mxu0 %vm3016_vm1, %v3015_v0 }
 0x44a   : > { %2603 = vmatprep.subr.bf16.mxu0 %v3015_v0 }
 0x45a   : > { %v1601_v31 = vpop.xlane.xlu1 %1600 }
 0x45b   : > { %2768 = vrcp.f32 %v1601_v31 }
 0x45c   : > { %v1604_v33 = vpop.xlane.xlu0 %1603 }
 0x45d   : > { %2770 = vrcp.f32 %v1604_v33 }
 0x465   : > { %v2769_v34 = vpop.eup %2768 }
 0x466   : > { %v1611_v35 = vmul.f32 %v2769_v34, %v3449_v16 }
 0x467   : > { %v2771_v37 = vpop.eup %2770 }
 0x468   : > { %v1612_v38 = vmul.f32 %v2771_v37, %v3451_v17  ;;  %v1615_v39 = vpack.c.bf16 %v1611_v35, %v1611_v35 }
 0x46a   : > { %2586 = vmatmul.mubr.msk.bf16.vlgmr.msra.gmra.mrb[16].mxu1 %vm1384_vm2, %v1615_v39  ;;  %v1616_v40 = vpack.c.bf16 %v1612_v38, %v1612_v38 }
 0x46b   : > { %2599 = vmatprep.mubr.msk.bf16.mxu1 %vm3016_vm1, %v3015_v0  ;;  %2596 = vmatpush3.bf16.msra.mxu1 %v2748_v7  ;;  %v2471_v7 = vld [vmem:[%s3633_s12] ss:$0 sm:$0xff] }
 0x46c   : > { %2592 = vmatmul.mubr.msk.bf16.vlgmr.msra.gmra.mrb[20].mxu0 %vm1384_vm2, %v1616_v40  ;;  %2597 = vmatprep.subr.bf16.mxu1 %v3015_v0  ;;  %v2465_v40 = vld [vmem:[#allocation10] ss:$0 sm:$0xff] }
 0x46d   : > { %2607 = vmatprep.mubr.msk.bf16.mxu0 %vm3016_vm1, %v3015_v0 }
 0x46f   : > { %2598 = vmatpush3.bf16.msra.mxu1 %v2749_v23  ;;  %v2480_v23 = vld [vmem:[%s3635_s14] ss:$0 sm:$0xff] }
 0x470   : > { %2611 = vmatprep.subr.bf16.mxu1 %v3015_v0 }
 0x519   : > { %v1658_v41 = vpop.f32.mrb[12].mxu1 }
 0x51a   : > { %v2575_v42 = vpop.f32.mrb[13].mxu1 }
 0x51b   : > { %v1661_v43 = vpop.f32.mrb[14].mxu1  ;;  %v1704_v44 = vpop.f32.mrb[16].mxu0 }
 0x51c   : > { %v2576_v16 = vpop.f32.mrb[15].mxu1  ;;  %v2581_v45 = vpop.f32.mrb[17].mxu0 }
 0x51d   : > { %v1707_v47 = vpop.f32.mrb[18].mxu0 }
 0x51e   : > { %v2582_v17 = vpop.f32.mrb[19].mxu0 }
 0x53d   : > { %v1750_v48 = vpop.f32.mrb[16].mxu1 }
 0x53e   : > { %v1802_v49 = vcombine.low %v1658_v41, %v1750_v48  ;;  %v1803_v50 = vcombine.high %v1658_v41, %v1750_v48  ;;  %v2587_v51 = vpop.f32.mrb[17].mxu1 }
 0x53f   : > { %v1753_v52 = vpop.f32.mrb[18].mxu1  ;;  %v1796_v53 = vpop.f32.mrb[20].mxu0 }
 0x540   : > { %v1818_v54 = vcombine.low %v1704_v44, %v1796_v53  ;;  %v1819_v55 = vcombine.high %v1704_v44, %v1796_v53  ;;  %v2588_v56 = vpop.f32.mrb[19].mxu1  ;;  %v2593_v57 = vpop.f32.mrb[21].mxu0  ;;  %v1810_v59 = vrot.slane %v1802_v49, %v3370_v32  ;;  %v1817_v60 = vrot.slane %v1803_v50, %v3370_v32  ;;  %v2750_v52 = vld [vmem:[%s3632_s11] sm:$0xff]   ;;  %v2751_v53 = vld [vmem:[%s3632_s11 + $0x8] sm:$0xff]  }
 0x541   : > { %v1799_v58 = vpop.f32.mrb[22].mxu0  ;;  %2604 = vmatpush3.bf16.msra.mxu0 %v2750_v52 }
 0x542   : > { %v1826_v61 = vrot.slane %v1818_v54, %v3370_v32  ;;  %v1833_v62 = vrot.slane %v1819_v55, %v3370_v32  ;;  %v2594_v63 = vpop.f32.mrb[23].mxu0  ;;  %2605 = vmatprep.subr.bf16.mxu0 %v3015_v0  ;;  %v2753_v54 = vld [vmem:[%s3634_s13 + $0x8] sm:$0xff]  }
 0x544   : > { %v1834_v1 = vcombine.low %v1810_v59, %v1826_v61  ;;  %v1835_v2 = vcombine.high %v1810_v59, %v1826_v61  ;;  %v1850_v3 = vcombine.low %v1817_v60, %v1833_v62  ;;  %v1851_v4 = vcombine.high %v1817_v60, %v1833_v62  ;;  %v2469_v59 = vld [vmem:[#allocation12] ss:$0 sm:$0xff]  ;;  %v2470_v61 = vld [vmem:[%s3631_s10] ss:$0 sm:$0xff] }
 0x545   : > { %2606 = vmatpush3.bf16.msra.mxu0 %v2751_v53 }
 0x546   : > { %v1842_v9 = vrot.slane %v1834_v1, %v3373_v36  ;;  %v1849_v10 = vrot.slane %v1835_v2, %v3373_v36  ;;  %v1858_v11 = vrot.slane %v1850_v3, %v3373_v36  ;;  %v1865_v12 = vrot.slane %v1851_v4, %v3373_v36  ;;  %v2754_v3 = vld [vmem:[%s3634_s13 + $0x10] sm:$0xff]   ;;  %v2755_v4 = vld [vmem:[%s3634_s13 + $0x18] sm:$0xff]  }
 0x548   : > { %v1870_v13 = vcombine.low %v1842_v9, %v1849_v10  ;;  %v2463_v14 = vcombine.high %v1842_v9, %v1849_v10  ;;  %v1886_v15 = vcombine.low %v1858_v11, %v1865_v12  ;;  %v2464_v18 = vcombine.high %v1858_v11, %v1865_v12 }
 0x54a   : > { %v1877_v19 = vrot.slane %v1870_v13, %v3370_v32  ;;  %v1885_v20 = vrot.slane %v2463_v14, %v3370_v32  ;;  %v1893_v21 = vrot.slane %v1886_v15, %v3370_v32  ;;  %v1901_v22 = vrot.slane %v2464_v18, %v3370_v32  ;;  %v2125_v18 = vld [vmem:[#allocation3] sm:$0xff] }
 0x54c   : > { %v1903_v24 = vcombine.high %v1877_v19, %v1885_v20  ;;  %v1919_v25 = vcombine.high %v1893_v21, %v1901_v22  ;;  %v1902_v26 = vcombine.low %v1877_v19, %v1885_v20  ;;  %v1918_v27 = vcombine.low %v1893_v21, %v1901_v22 }
 0x54e   : > { %v1917_v28 = vrot.slane %v1903_v24, %v3373_v36  ;;  %v1933_v29 = vrot.slane %v1919_v25, %v3373_v36  ;;  %v1910_v6 = vrot.slane %v1902_v26, %v3373_v36  ;;  %v1926_v46 = vrot.slane %v1918_v27, %v3373_v36 }
 0x550   : > { %v1936_v30 = vcombine.low %v1917_v28, %v1933_v29  ;;  %v1935_v8 = vcombine.high %v1910_v6, %v1926_v46  ;;  %v1937_v31 = vcombine.high %v1917_v28, %v1933_v29  ;;  %v1934_v32 = vcombine.low %v1910_v6, %v1926_v46 }
 0x552   : > { %1943 = vrot.lane.b32.xlu1 %v1936_v30, %s3023_s29  ;;  %1939 = vrot.lane.b32.xlu0 %v1935_v8, %s3024_s8  ;;  %s3684_s8 = sld [smem:[#allocation32_spill]] }
 0x556   : > { %1947 = vrot.lane.b32.xlu1 %v1937_v31, %s3025_s26 }
 0x558   : > { %s3573_s26 = scalar_lea.hbm %s3684_s8, %s2484_s23 }
 0x5c4   : > { %v1944_v33 = vpop.permute.xlu1 %1943  ;;  %v1940_v34 = vpop.permute.xlu0 %1939 }
 0x5c5   : > { %v1950_v35 = vsel %vm1384_vm2, %v1934_v32, %v1940_v34  ;;  %v2481_v34 = vld [vmem:[%s3682_s16] ss:$0 sm:$0xff] }
 0x5c6   : > { %v1952_v38 = vsel %vm1951_vm4, %v1950_v35, %v1944_v33 }
 0x5c8   : > { %v1948_v37 = vpop.permute.xlu1 %1947 }
 0x5c9   : > { %v1954_v39 = vsel %vm1953_vm5, %v1952_v38, %v1948_v37  ;;  %v2482_v37 = vld [vmem:[%s3683_s0] ss:$0 sm:$0xff] }
 0x5ca   : > { %v1955_v36 = vpack.c.bf16 %v1954_v39, %v1954_v39 }
 0x5cc   : > { %2600 = vmatmul.mubr.msk.bf16.vlgmr.msra.gmra.mrb[20].mxu1 %vm706_vm0, %v1955_v36 }
 0x5cd   : > { %2619 = vmatprep.mubr.msk.bf16.mxu1 %vm3016_vm1, %v3015_v0 }
 0x69f   : > { %v2016_v41 = vpop.f32.mrb[20].mxu1 }
 0x6a0   : > { %v2017_v42 = vadd.f32 %v2465_v40, %v2016_v41  ;;  %v2601_v43 = vpop.f32.mrb[21].mxu1 }
 0x6a1   : > { %v2019_v44 = vpop.f32.mrb[22].mxu1 }
 0x6a2   : > { %v2602_v16 = vpop.f32.mrb[23].mxu1  ;;  %v2022_v45 = vadd.f32 %v2017_v42, %v3341_v5  ;;  %v2752_v5 = vld [vmem:[%s3634_s13] sm:$0xff]  }
 0x6a3   : > { %2612 = vmatpush3.bf16.msra.mxu1 %v2752_v5 }
 0x6a4   : > { %v2023_v47 = vsel %vm706_vm0, %v2022_v45, 0.0  ;;  %2613 = vmatprep.subr.bf16.mxu1 %v3015_v0 }
 0x6a5   : > { %2024 = vadd.xlane.f32.xlu0 %v2023_v47 }
 0x6a7   : > { %2614 = vmatpush3.bf16.msra.mxu1 %v2753_v54 }
 0x6a8   : > { %2615 = vmatprep.subr.bf16.mxu1 %v3015_v0 }
 0x6ab   : > { %2616 = vmatpush3.bf16.msra.mxu1 %v2754_v3 }
 0x6ac   : > { %2617 = vmatprep.subr.bf16.mxu1 %v3015_v0 }
 0x6af   : > { %2618 = vmatpush3.bf16.msra.mxu1 %v2755_v4 }
 0x732   : > { %v2025_v17 = vpop.xlane.xlu0 %2024 }
 0x733   : > { %v2027_v48 = vmul.f32 0.03125, %v2025_v17 }
 0x735   : > { %v2028_v49 = vsub.f32 %v2022_v45, %v2027_v48 }
 0x737   : > { %v2029_v50 = vmul.f32 %v2028_v49, %v2028_v49 }
 0x739   : > { %v2030_v51 = vsel %vm706_vm0, %v2029_v50, 0.0 }
 0x73a   : > { %2031 = vadd.xlane.f32.xlu1 %v2030_v51 }
 0x7c7   : > { %v2032_v55 = vpop.xlane.xlu1 %2031 }
 0x7c8   : > { %v2033_v56 = vmul.f32 0.03125, %v2032_v55 }
 0x7ca   : > { %v2034_v57 = vadd.f32 1e-05, %v2033_v56 }
 0x7cc   : > { %2772 = vrsqrt.f32 %v2034_v57 }
 0x7d6   : > { %v2773_v58 = vpop.eup %2772 }
 0x7d7   : > { %v2036_v60 = vmul.f32 %v2773_v58, %v2028_v49 }
 0x7d9   : > { %v2044_v62 = vmul.f32 %v2469_v59, %v2036_v60 }
 0x7db   : > { %v2052_v63 = vadd.f32 %v2470_v61, %v2044_v62 }
 0x7dd   : > { %2053 = vst.msk [vmem:[#allocation2] sm:$0xff] %vm706_vm0, %v2052_v63 }
 0x7e4   : > { %v2055_v1 = vld [vmem:[#allocation2] sm:$0xff] }
 0x7e5   : > { %v2056_v2 = vpack.c.bf16 %v2055_v1, %v2055_v1 }
 0x7e7   : > { %2608 = vmatmul.mubr.msk.bf16.vlgmr.msra.gmra.mrb[24].mxu0 %vm706_vm0, %v2056_v2 }
 0x8ba   : > { %v2118_v9 = vpop.f32.mrb[24].mxu0 }
 0x8bb   : > { %v2119_v10 = vadd.f32 %v2471_v7, %v2118_v9  ;;  %v2609_v11 = vpop.f32.mrb[25].mxu0 }
 0x8bc   : > { %v2121_v12 = vpop.f32.mrb[26].mxu0 }
 0x8bd   : > { %v2124_v13 = vmax.f32 %v2119_v10, 0.0  ;;  %v2610_v14 = vpop.f32.mrb[27].mxu0 }
 0x8bf   : > { %v2126_v15 = vpack.c.bf16 %v2124_v13, %v2124_v13 }
 0x8c1   : > { %2620 = vmatmul.mubr.msk.bf16.vlgmr.msra.gmra.mrb[24].mxu1 %vm2159_vm6, %v2126_v15 }
 0x994   : > { %v2197_v0 = vpop.f32.mrb[24].mxu1 }
 0x995   : > { %v2203_v19 = vadd.f32 %v2197_v0, %v2125_v18  ;;  %v2621_v20 = vpop.f32.mrb[25].mxu1 }
 0x996   : > { %v2200_v21 = vpop.f32.mrb[26].mxu1 }
 0x997   : > { %2204 = vst.msk [vmem:[#allocation3] sm:$0xff] %vm706_vm0, %v2203_v19  ;;  %v2622_v22 = vpop.f32.mrb[27].mxu1 }
 0x99e   : > { %v2209_v24 = vld [vmem:[#allocation3] sm:$0xff] }
 0x99f   : > { %v2217_v25 = vadd.f32 %v2480_v23, %v2209_v24 }
 0x9a1   : > { %v2218_v26 = vadd.f32 %v2217_v25, %v2055_v1 }
 0x9a3   : > { %v2219_v27 = vsel %vm706_vm0, %v2218_v26, 0.0 }
 0x9a4   : > { %2220 = vadd.xlane.f32.xlu0 %v2219_v27 }
 0xa31   : > { %v2221_v28 = vpop.xlane.xlu0 %2220 }
 0xa32   : > { %v2223_v29 = vmul.f32 0.03125, %v2221_v28 }
 0xa34   : > { %v2224_v6 = vsub.f32 %v2218_v26, %v2223_v29 }
 0xa36   : > { %v2225_v46 = vmul.f32 %v2224_v6, %v2224_v6 }
 0xa38   : > { %v2226_v30 = vsel %vm706_vm0, %v2225_v46, 0.0 }
 0xa39   : > { %2227 = vadd.xlane.f32.xlu0 %v2226_v30 }
 0xac6   : > { %v2228_v8 = vpop.xlane.xlu0 %2227 }
 0xac7   : > { %v2229_v31 = vmul.f32 0.03125, %v2228_v8 }
 0xac9   : > { %v2230_v32 = vadd.f32 1e-05, %v2229_v31 }
 0xacb   : > { %2774 = vrsqrt.f32 %v2230_v32 }
 0xad5   : > { %v2775_v33 = vpop.eup %2774 }
 0xad6   : > { %v2232_v35 = vmul.f32 %v2775_v33, %v2224_v6 }
 0xad8   : > { %v2240_v38 = vmul.f32 %v2481_v34, %v2232_v35 }
 0xada   : > { %v2248_v39 = vadd.f32 %v2482_v37, %v2240_v38 }
 0xadc   : > { %2249 = vst.msk [vmem:[%s658_s24] sm:$0xff] %vm706_vm0, %v2248_v39 }
 0xadd   : > { %2929 = shalt.err (!%p2926_p6)
}
 0xade   : > { %s2930_s20 = scalar_lea.hbm %s3573_s26, 128  ;;  %s2934_s18 = scalar_lea.hbm %s3684_s8, 256 }
 0xadf   : > { %p2931_p7 = scmp.ne.s32.totalorder %s3573_s26, %s2930_s20  ;;  %p2935_p0 = scmp.lt.u32.totalorder %s3573_s26, %s3684_s8 }
 0xae0   : > { %p2936_p1 = scmp.lt.u32.totalorder %s2934_s18, %s2930_s20  ;;  %p2938_p2 = scmp.lt.u32.totalorder %s2930_s20, %s3573_s26 }
 0xae1   : > { %p2932_p9 = pnand %p2931_p7, %p3685_p4 }
 0xae2   : > { %p2937_p13 = por %p2936_p1, %p2935_p0 }
 0xae3   : > { %p2933_p12 = pneg %p2932_p9 }
 0xae4   : > { %p2939_p8 = por %p2938_p2, %p2937_p13 }
 0xae6   : > { %p2940_p10 = pnand %p2939_p8, %p2933_p12 }
 0xae8   : > { %2943 = shalt.err (!%p2940_p10)
}
 0xae9   : > { %2643 = dma.vmem_to_hbm [thread:$0]  (%p3685_p4), %s3575_s19, 128, %s3573_s26, %s2251_s22  }
 0xaea PF: > { %s3686_s24 = sld [smem:[#allocation21_spill]]  ;;  %s3687_s30 = sld [smem:[#allocation18_spill]] }
 0xaeb   : > { %s3688_s29 = sld [smem:[#allocation24_spill]] }
 0xaf0   : > { %p2675_p11 = scmp.ge.s32.totalorder %s3686_s24, 2  ;;  %s2276_s6 = sand.u32 1, %s3687_s30  }
 0xaf1   : > { %p3689_p3 = scmp.ne.s32.totalorder %s3688_s29, 0  ;;  %s2277_s27 = scalar_lea.sflag [#allocation6], %s2276_s6 }
 0xaf3   : > { %p2662_p5 = pnand %p2675_p11, %p3689_p3 }
 0xaf5   : > { %2981 = dma.done.wait (!%p2662_p5), %s2277_s27, 128  }
 0xaf6   : > { %2983 = vsyncadd (!%p2662_p5), %s2277_s27, 4294967168  ;;  %s33_s29 = sadd.s32 1, %s3686_s24   ;;  %s3690_s15 = sld [smem:[#allocation19_spill]] }
 0xaf7   : > { %p30_p6 = scmp.ge.s32.totalorder %s33_s29, 4   ;;  %s3691_s26 = sld [smem:[#allocation25_spill]] }
 0xaf8   : > { %s3692_s27 = sld [smem:[#allocation20_spill]]  ;;  %s3693_s28 = sld [smem:[#allocation22_spill]] }
 0xaf9   : > { %s3694_s24 = smov %s2990_s25  ;;  %32 = sbr.rel (!%p30_p6) target bundleno = 15 (0xf), region = 161 }
 0xafc   : > { %s3695_s25 = smov %s3690_s15 }
 0xb00   :  { %2282 = vsyncpa [#allocation5], 1 }
 0xb01   :  { %2284 = vsyncpa [#allocation5 + $0x1], 1 }
 0xb02   :  { %2285 = vsyncpa [#allocation8], 1 }
 0xb03   :  { %2286 = vsyncpa [#allocation11], 1 }
 0xb04   :  { %2287 = vsyncpa [#allocation6], 1 }
 0xb05   :  { %2289 = vsyncpa [#allocation6 + $0x1], 1 }

// kernel: tpu_custom_call.1
= control target key start
LH: loop header
LB: loop body
LE: loop exit
PB: predicated region body
PF: predicated region fallthrough
CT: control target
= control target key end

     0   :  { %s3621_s0 = inlined_call_operand.vmem [shape: f32[2,8,32], index: 0, kind: input, shape index: {}]   ;;  %s3622_s1 = inlined_call_operand.vmem [shape: bf16[32,32], index: 1, kind: input, shape index: {}]   ;;  %s3623_s2 = inlined_call_operand.vmem [shape: f32[1,32], index: 2, kind: input, shape index: {}]   ;;  %s3624_s3 = inlined_call_operand.vmem [shape: bf16[32,32], index: 3, kind: input, shape index: {}]   ;;  %s3625_s4 = inlined_call_operand.vmem [shape: f32[1,32], index: 4, kind: input, shape index: {}]   ;;  %s3626_s5 = inlined_call_operand.hbm [shape: bf16[32,32], index: 5, kind: input, shape index: {}]   ;;  %s3627_s6 = inlined_call_operand.hbm [shape: f32[1,32], index: 6, kind: input, shape index: {}]   ;;  %s3628_s7 = inlined_call_operand.hbm [shape: bf16[32,32], index: 7, kind: input, shape index: {}]   ;;  %s3629_s8 = inlined_call_operand.hbm [shape: f32[1,32], index: 8, kind: input, shape index: {}]   ;;  %s3630_s9 = inlined_call_operand.hbm [shape: f32[1,32], index: 9, kind: input, shape index: {}]   ;;  %s3631_s10 = inlined_call_operand.vmem [shape: f32[1,32], index: 10, kind: input, shape index: {}]   ;;  %s3632_s11 = inlined_call_operand.vmem [shape: bf16[32,64], index: 11, kind: input, shape index: {}]   ;;  %s3633_s12 = inlined_call_operand.vmem [shape: f32[1,64], index: 12, kind: input, shape index: {}]   ;;  %s3634_s13 = inlined_call_operand.vmem [shape: bf16[64,32], index: 13, kind: input, shape index: {}]   ;;  %s3635_s14 = inlined_call_operand.vmem [shape: f32[1,32], index: 14, kind: input, shape index: {}]   ;;  %s3636_s15 = inlined_call_operand.vmem [shape: f32[1,32], index: 15, kind: input, shape index: {}]   ;;  %s3637_s16 = inlined_call_operand.vmem [shape: f32[1,32], index: 16, kind: input, shape index: {}]   ;;  %s3638_s17 = inlined_call_operand.hbm [shape: f32[2,8,32], index: 17, kind: output, shape index: {}]  }
   0x1   :  { %3654 = sst [smem:[#allocation26_spill]] %s3621_s0 }
   0x2   :  { %3655 = sst [smem:[#allocation27_spill]] %s3622_s1 }
   0x3   :  { %3656 = sst [smem:[#allocation28_spill]] %s3627_s6 }
   0x4   :  { %3657 = sst [smem:[#allocation29_spill]] %s3629_s8 }
   0x5   :  { %3658 = sst [smem:[#allocation30_spill]] %s3636_s15 }
   0x6   :  { %3659 = sst [smem:[#allocation31_spill]] %s3637_s16 }
   0x7   :  { %3660 = sst [smem:[#allocation32_spill]] %s3638_s17 }
   0x8   :  { %22 = vsyncpa [#allocation5], 0 }
   0x9   :  { %23 = vsyncpa [#allocation8], 0 }
   0xa   :  { %24 = vsyncpa [#allocation11], 0 }
   0xb   :  { %25 = vsyncpa [#allocation6], 0 }
   0xc   :  { %27 = vsyncpa [#allocation6 + $0x1], 0  ;;  %s3117_s24 = smov 0   ;;  %s3119_s25 = smov 0  }
   0xd   :  { %s3121_s26 = smov 0   ;;  %s3123_s27 = smov 0  }
   0xe   :  { %s3125_s28 = smov 0   ;;  %s3127_s29 = smov 0  }
   0xf LB: > { %3661 = sst [smem:[#allocation18_spill]] %s2986_s24  ;;  %s2423_s0 = sadd.s32 4294967295, %s3006_s29   ;;  %s3006_s29 = sphi %s3127_s29, %s33_s29   ;;  %s3002_s28 = sphi %s3125_s28, %s3693_s28   ;;  %s2998_s27 = sphi %s3123_s27, %s3692_s27   ;;  %s2994_s26 = sphi %s3121_s26, %s3691_s26   ;;  %s2990_s25 = sphi %s3119_s25, %s3695_s25   ;;  %s2986_s24 = sphi %s3117_s24, %s3694_s24  }
  0x10   : > { %3662 = sst [smem:[#allocation19_spill]] %s2994_s26  ;;  %s2424_s30 = sadd.s32 4294967294, %s3006_s29  }
  0x11   : > { %3663 = sst [smem:[#allocation20_spill]] %s3002_s28  ;;  %s45_s18 = sadd.s32 1, %s3002_s28 }
  0x12   : > { %3664 = sst [smem:[#allocation21_spill]] %s3006_s29  ;;  %s429_s19 = sadd.s32 1, %s2994_s26 }
  0x13   : > { %p47_p0 = scmp.ge.s32.totalorder %s45_s18, 2  ;;  %p439_p1 = scmp.ne.s32.totalorder %s2994_s26, %s2990_s25 }
  0x14   : > { %p440_p2 = scmp.eq.s32.totalorder %s2423_s0, 1  ;;  %p445_p3 = scmp.ne.s32.totalorder %s2990_s25, %s2986_s24 }
  0x15   : > { %s3697_s18 = smov (%p47_p0, %s45_s18), 0  ;;  %p446_p5 = scmp.eq.s32.totalorder %s2424_s30, 1 }
  0x16   : > { %3665 = sst [smem:[#allocation22_spill]] %s3697_s18  ;;  %p3157_p4 = por %p440_p2, %p439_p1 }
  0x17   : > { %s426_s20 = ssub.s32 %s3002_s28, %s3697_s18  ;;  %p2425_p6 = scmp.ge.s32.totalorder %s3006_s29, 1 }
  0x18   : > { %s3666_s1 = scalar_select %p3157_p4, 1, 0 }
  0x19   : > { %p427_p7 = scmp.eq.s32.totalorder %s426_s20, 0  ;;  %p3164_p8 = por %p446_p5, %p445_p3 }
  0x1a   : > { %3667 = sst [smem:[#allocation23_spill]] %s3666_s1  ;;  %p453_p9 = scmp.lt.s32.totalorder %s3006_s29, 3 }
  0x1b   : > { %s3668_s21 = scalar_select %p3164_p8, 1, 0 }
  0x1c   : > { %s3170_s22 = scalar_select %p427_p7, %s2994_s26, %s429_s19  }
  0x1d   : > { %3669 = sst [smem:[#allocation24_spill]] %s3668_s21  ;;  %p3172_p10 = pnand %p2425_p6, %p453_p9 }
  0x1e   : > { %3670 = sst [smem:[#allocation25_spill]] %s3170_s22  ;;  %p3176_p11 = scmp.eq.s32.totalorder %s2423_s0, 0 }
  0x1f   : > { %s3671_s23 = scalar_select %p3172_p10, 1, 0 }
  0x20   : > { %s3672_s24 = scalar_select %p3176_p11, 1, 0 }
  0x21   : > { %p2645_p12 = pneg %p3172_p10  ;;  %s3008_s30 = smov [#allocation7]  }
  0x22   : > { %s491_s20 = sshll.u32 %s3008_s30, 4  ;;  %s3009_s18 = smov [#allocation10]   ;;  %s492_s20 = int_to_ptr.vmem [resolvable:$true] %s491_s20 }
  0x23   : > { %s515_s28 = sshll.u32 %s3009_s18, 4  ;;  %p3184_p13 = pnand %p3176_p11, %p2645_p12  ;;  %s3188_s28 = int_to_ptr.vmem [resolvable:$true] %s515_s28 }
  0x24   : > { %s3674_s6 = sld [smem:[#allocation28_spill]] }
  0x25   : > { %p3198_p1 = pneg %p3184_p13 }
  0x2a   : > { %s2776_s26 = scalar_lea.hbm %s3674_s6, 16 }
  0x2b   : > { %p2777_p0 = scmp.ne.s32.totalorder %s3674_s6, %s2776_s26  ;;  %p2783_p5 = scmp.lt.u32.totalorder %s2776_s26, %s3674_s6 }
  0x2d   : > { %p2779_p2 = pnand %p3198_p1, %p2777_p0 }
  0x2f   : > { %p2780_p3 = pneg %p2779_p2 }
  0x31   : > { %p2785_p6 = pnand %p2783_p5, %p2780_p3 }
  0x33   : > { %2788 = shalt.err (!%p2785_p6)
}
  0x34   : > { %s2789_s22 = scalar_lea.vmem %s492_s20, 16  ;;  %s2796_s29 = scalar_lea.vmem %s492_s20, 32 }
  0x35   : > { %p2790_p7 = scmp.ne.s32.totalorder %s492_s20, %s2789_s22  ;;  %p2797_p8 = scmp.lt.s32.totalorder %s492_s20, %s492_s20 }
  0x36   : > { %p2798_p4 = scmp.lt.s32.totalorder %s2796_s29, %s2789_s22 }
  0x37   : > { %p2792_p9 = pnand %p2790_p7, %p3198_p1 }
  0x38   : > { %p2799_p11 = por %p2798_p4, %p2797_p8 }
  0x39   : > { %p2793_p12 = pneg %p2792_p9 }
  0x3b   : > { %p2800_p10 = pnand %p2799_p11, %p2793_p12 }
  0x3d   : > { %2803 = shalt.err (!%p2800_p10)
}
  0x3e   : > { %2651 = dma.hbm_to_vmem [thread:$0]  (!%p3184_p13), %s3674_s6, 16, %s492_s20, [#allocation8]  }
  0x3f   : > { %s3676_s8 = sld [smem:[#allocation29_spill]] }
  0x45   : > { %s2804_s18 = scalar_lea.hbm %s3676_s8, 16 }
  0x46   : > { %p2805_p0 = scmp.ne.s32.totalorder %s3676_s8, %s2804_s18  ;;  %p2811_p8 = scmp.lt.u32.totalorder %s2804_s18, %s3676_s8 }
  0x48   : > { %p2807_p2 = pnand %p2805_p0, %p3198_p1 }
  0x4a   : > { %p2808_p4 = pneg %p2807_p2 }
  0x4c   : > { %p2813_p10 = pnand %p2811_p8, %p2808_p4 }
  0x4e   : > { %2816 = shalt.err (!%p2813_p10)
}
  0x4f   : > { %s2817_s20 = scalar_lea.vmem %s3188_s28, 16  ;;  %s2824_s15 = scalar_lea.vmem %s3188_s28, 32 }
  0x50   : > { %p2818_p11 = scmp.ne.s32.totalorder %s3188_s28, %s2817_s20  ;;  %p2825_p6 = scmp.lt.s32.totalorder %s3188_s28, %s3188_s28 }
  0x51   : > { %p2826_p7 = scmp.lt.s32.totalorder %s2824_s15, %s2817_s20 }
  0x52   : > { %p2820_p3 = pnand %p2818_p11, %p3198_p1 }
  0x53   : > { %p2827_p9 = por %p2826_p7, %p2825_p6 }
  0x54   : > { %p2821_p5 = pneg %p2820_p3 }
  0x56   : > { %p2828_p12 = pnand %p2827_p9, %p2821_p5 }
  0x58   : > { %2831 = shalt.err (!%p2828_p12)
}
  0x59   : > { %2657 = dma.hbm_to_vmem [thread:$0]  (!%p3184_p13), %s3676_s8, 16, %s3188_s28, [#allocation11]  }
  0x5a   : > { %s3010_s0 = smov [#allocation4]   ;;  %s2832_s22 = scalar_lea.hbm %s3626_s5, 256 }
  0x5b   : > { %s477_s17 = sshll.u32 %s3010_s0, 4  ;;  %p2833_p0 = scmp.ne.s32.totalorder %s3626_s5, %s2832_s22  ;;  %s478_s17 = int_to_ptr.vmem [resolvable:$true] %s477_s17 }
  0x5c   : > { %p2839_p8 = scmp.lt.u32.totalorder %s2832_s22, %s3626_s5 }
  0x5d   : > { %p2835_p2 = pnand %p2833_p0, %p3198_p1 }
  0x5f   : > { %p2836_p4 = pneg %p2835_p2 }
  0x61   : > { %p2841_p10 = pnand %p2839_p8, %p2836_p4 }
  0x63   : > { %2844 = shalt.err (!%p2841_p10)
}
  0x64   : > { %s2845_s28 = scalar_lea.vmem %s478_s17, 256  ;;  %p2853_p6 = scmp.lt.s32.totalorder %s478_s17, %s478_s17 }
  0x65   : > { %p2846_p11 = scmp.ne.s32.totalorder %s478_s17, %s2845_s28  ;;  %p2854_p7 = scmp.lt.s32.totalorder %s2845_s28, %s2845_s28 }
  0x67   : > { %p2848_p3 = pnand %p2846_p11, %p3198_p1  ;;  %p2855_p9 = por %p2854_p7, %p2853_p6 }
  0x69   : > { %p2849_p5 = pneg %p2848_p3 }
  0x6b   : > { %p2856_p12 = pnand %p2855_p9, %p2849_p5 }
  0x6d   : > { %2859 = shalt.err (!%p2856_p12)
}
  0x6e   : > { %s3011_s16 = smov 64   ;;  %s3012_s21 = smov 4  }
  0x6f   : > { %2648 = dma.hbm_to_vmem [thread:$0]  (!%p3184_p13), %s3626_s5, 256, %s478_s17, [#allocation5], %s3011_s16, %s3011_s16, %s3012_s21  }
  0x70   : > { %s3013_s26 = smov [#allocation9]   ;;  %s3014_s22 = smov [#allocation12]  }
  0x71   : > { %s501_s18 = sshll.u32 %s3013_s26, 4  ;;  %s526_s29 = sshll.u32 %s3014_s22, 4  ;;  %s502_s18 = int_to_ptr.vmem [resolvable:$true] %s501_s18  ;;  %s3256_s29 = int_to_ptr.vmem [resolvable:$true] %s526_s29 }
  0x72   : > { %s2860_s28 = scalar_lea.hbm %s3628_s7, 256 }
  0x73   : > { %p2861_p0 = scmp.ne.s32.totalorder %s3628_s7, %s2860_s28  ;;  %p2867_p8 = scmp.lt.u32.totalorder %s2860_s28, %s3628_s7 }
  0x75   : > { %p2863_p2 = pnand %p2861_p0, %p3198_p1 }
  0x77   : > { %p2864_p4 = pneg %p2863_p2 }
  0x79   : > { %p2869_p10 = pnand %p2867_p8, %p2864_p4 }
  0x7b   : > { %2872 = shalt.err (!%p2869_p10)
}
  0x7c   : > { %s2873_s0 = scalar_lea.vmem %s502_s18, 256  ;;  %p2881_p6 = scmp.lt.s32.totalorder %s502_s18, %s502_s18 }
  0x7d   : > { %p2874_p11 = scmp.ne.s32.totalorder %s502_s18, %s2873_s0  ;;  %p2882_p7 = scmp.lt.s32.totalorder %s2873_s0, %s2873_s0 }
  0x7f   : > { %p2876_p3 = pnand %p2874_p11, %p3198_p1  ;;  %p2883_p9 = por %p2882_p7, %p2881_p6 }
  0x81   : > { %p2877_p5 = pneg %p2876_p3 }
  0x83   : > { %p2884_p12 = pnand %p2883_p9, %p2877_p5 }
  0x85   : > { %2887 = shalt.err (!%p2884_p12)
}
  0x86   : > { %2654 = dma.hbm_to_vmem [thread:$0]  (!%p3184_p13), %s3628_s7, 256, %s502_s18, [#allocation8], %s3011_s16, %s3011_s16, %s3012_s21  }
  0x87   : > { %s2888_s20 = scalar_lea.hbm %s3630_s9, 16 }
  0x88   : > { %p2889_p0 = scmp.ne.s32.totalorder %s3630_s9, %s2888_s20  ;;  %p2895_p8 = scmp.lt.u32.totalorder %s2888_s20, %s3630_s9 }
  0x8a   : > { %p2891_p2 = pnand %p2889_p0, %p3198_p1 }
  0x8c   : > { %p2892_p4 = pneg %p2891_p2 }
  0x8e   : > { %p2897_p10 = pnand %p2895_p8, %p2892_p4 }
  0x90   : > { %2900 = shalt.err (!%p2897_p10)
}
  0x91   : > { %s2901_s16 = scalar_lea.vmem %s3256_s29, 16  ;;  %s2908_s21 = scalar_lea.vmem %s3256_s29, 32 }
  0x92   : > { %p2902_p11 = scmp.ne.s32.totalorder %s3256_s29, %s2901_s16  ;;  %p2909_p6 = scmp.lt.s32.totalorder %s3256_s29, %s3256_s29 }
  0x93   : > { %p2910_p7 = scmp.lt.s32.totalorder %s2908_s21, %s2901_s16 }
  0x94   : > { %p2904_p3 = pnand %p2902_p11, %p3198_p1 }
  0x95   : > { %p2911_p9 = por %p2910_p7, %p2909_p6 }
  0x96   : > { %p2905_p5 = pneg %p2904_p3 }
  0x98   : > { %p2912_p12 = pnand %p2911_p9, %p2905_p5 }
  0x9a   : > { %2915 = shalt.err (!%p2912_p12)
}
  0x9b   : > { %2660 = dma.hbm_to_vmem [thread:$0]  (!%p3184_p13), %s3630_s9, 16, %s3256_s29, [#allocation11]  }
  0x9c   : > { %p3677_p0 = scmp.ne.s32.totalorder %s3671_s23, 0 }
  0x9d   : > { %p3678_p1 = scmp.ne.s32.totalorder (!%p3677_p0), %s3672_s24, 0 }
  0x9e   : > { %580 = sbr.rel (%p3677_p0) target bundleno = 2794 (0xaea), region = 88 }
  0xa5   : > { %2969 = dma.done.wait (%p3678_p1), [#allocation5], 256  }
  0xa6   : > { %2971 = vsyncadd (%p3678_p1), [#allocation5], 4294967040 }
  0xa7   : > { %2973 = dma.done.wait (%p3678_p1), [#allocation8], 272  }
  0xa8   : > { %2975 = vsyncadd (%p3678_p1), [#allocation8], 4294967024 }
  0xa9   : > { %2977 = dma.done.wait (%p3678_p1), [#allocation11], 32  }
  0xaa   : > { %2979 = vsyncadd (%p3678_p1), [#allocation11], 4294967264  ;;  %p659_p13 = scmp.lt.s32.totalorder %s2998_s27, 1  ;;  %vm706_vm0 = vcmask 261120   ;;  %v3015_v0 = vmov 0.0   ;;  %vm3016_vm1 = vmmov 0   ;;  %v888_v26 = vlaneseq }
  0xab   : > { %2531 = vmatprep.subr.bf16.mxu1 %v3015_v0  ;;  %2523 = vmatprep.subr.bf16.mxu0 %v3015_v0  ;;  %2054 = vst.msk [vmem:[#allocation3] sm:$0xff] %vm706_vm0, %v3015_v0  ;;  %v2742_v1 = vld [vmem:[%s3624_s3] sm:$0xff]   ;;  %s3679_s1 = sld [smem:[#allocation27_spill]]  ;;  %s3680_s20 = sld [smem:[#allocation26_spill]]  ;;  %v2744_v3 = vld [vmem:[%s3624_s3 + $0x8] sm:$0xff]   ;;  %v2746_v22 = vld [vmem:[#allocation4] sm:$0xff]  }
  0xac   : > { %2535 = vmatprep.mubr.msk.bf16.mxu1 %vm3016_vm1, %v3015_v0  ;;  %s660_s23 = scalar_select %p659_p13, %s2998_s27, 1  ;;  %2527 = vmatprep.mubr.msk.bf16.mxu0 %vm3016_vm1, %v3015_v0  ;;  %v2447_v7 = vld [vmem:[%s3625_s4] ss:$0 sm:$0xff]  ;;  %v2747_v23 = vld [vmem:[#allocation4 + $0x8] sm:$0xff]   ;;  %v3020_v24 = vmov 1983009808  }
  0xad   : > { %2532 = vmatpush3.bf16.msra.mxu1 %v2742_v1  ;;  %v2443_v8 = vld [vmem:[%s3623_s2] ss:$0 sm:$0xff]  ;;  %s3018_s19 = smov 120   ;;  %s3019_s30 = smov 112   ;;  %v886_v25 = vunpack.c.l.s4 %v3020_v24  ;;  %v3021_v27 = vmov 1934713408  }
  0xae   : > { %s2442_s24 = sshll.u32 %s660_s23, 3  ;;  %2533 = vmatprep.subr.bf16.mxu1 %v3015_v0  ;;  %v903_v28 = vunpack.c.l.s4 %v3021_v27  ;;  %v889_v30 = vshrl.u32 %v888_v26, 7  ;;  %v3022_v46 = vmov 0   ;;  %vm1384_vm2 = vcmask 64512   ;;  %s3023_s29 = smov 16  }
  0xaf   : > { %v887_v29 = vunpack.c.0.s8 %v886_v25  ;;  %vm1620_vm3 = vcmask 1043456   ;;  %s3024_s8 = smov 8   ;;  %s3025_s26 = smov 24   ;;  %vm1951_vm4 = vcmask 130048   ;;  %vm1953_vm5 = vcmask 195584  }
  0xb0   : > { %v904_v31 = vunpack.c.0.s8 %v903_v28  ;;  %vm2159_vm6 = vcmask 523264   ;;  %s3681_s28 = sld [smem:[#allocation23_spill]]  ;;  %s3682_s16 = sld [smem:[#allocation30_spill]] }
  0xb1   : > { %v2743_v2 = vld [vmem:[%s3679_s1] sm:$0xff]   ;;  %s662_s15 = scalar_lea.vmem %s3680_s20, %s2442_s24  ;;  %v2745_v4 = vld [vmem:[%s3679_s1 + $0x8] sm:$0xff]   ;;  %2534 = vmatpush3.bf16.msra.mxu1 %v2744_v3  ;;  %s3017_s24 = smov 104   ;;  %v3370_v32 = vsub.s32 %v887_v29, %v889_v30 }
  0xb2   : > { %2524 = vmatpush3.bf16.msra.mxu0 %v2743_v2  ;;  %v3341_v5 = vld [vmem:[%s662_s15] sm:$0xff]  ;;  %2547 = vmatprep.subr.bf16.mxu1 %v3015_v0  ;;  %v3373_v36 = vsub.s32 %v904_v31, %v889_v30  ;;  %s656_s20 = sand.u32 1, %s2990_s25   ;;  %s3683_s0 = sld [smem:[#allocation31_spill]] }
  0xb3   : > { %2525 = vmatprep.subr.bf16.mxu0 %v3015_v0  ;;  %v682_v6 = vpack.c.bf16 %v3341_v5, %v3341_v5  ;;  %s2441_s15 = sshll.u32 %s656_s20, 3  ;;  %s2484_s23 = sshll.u32 %s2998_s27, 7 }
  0xb4   : > { %s2251_s22 = scalar_lea.sflag [#allocation6], %s656_s20  ;;  %s3026_s27 = smov [#allocation13]  }
  0xb5   : > { %2536 = vmatmul.mubr.msk.bf16.vlgmr.msra.gmra.mrb[0].mxu1 %vm706_vm0, %v682_v6 }
  0xb6   : > { %2526 = vmatpush3.bf16.msra.mxu0 %v2745_v4  ;;  %2549 = vmatprep.mubr.msk.bf16.mxu1 %vm3016_vm1, %v3015_v0  ;;  %p3685_p4 = scmp.ne.s32.totalorder %s3681_s28, 0 }
  0xb7   : > { %2539 = vmatprep.subr.bf16.mxu0 %v3015_v0 }
  0xb9   : > { %2528 = vmatmul.mubr.msk.bf16.vlgmr.msra.gmra.mrb[0].mxu0 %vm706_vm0, %v682_v6 }
  0xba   : > { %2543 = vmatprep.mubr.msk.bf16.mxu0 %vm3016_vm1, %v3015_v0  ;;  %2540 = vmatpush3.bf16.msra.mxu0 %v2746_v22 }
  0xbb   : > { %2541 = vmatprep.subr.bf16.mxu0 %v3015_v0 }
  0xbe   : > { %2542 = vmatpush3.bf16.msra.mxu0 %v2747_v23 }
  0xbf   : > { %2553 = vmatprep.subr.bf16.mxu0 %v3015_v0 }
  0xc1   : > { %2544 = vmatmul.mubr.msk.bf16.vlgmr.msra.gmra.mrb[4].mxu0 %vm706_vm0, %v682_v6 }
  0xc2   : > { %2555 = vmatprep.mubr.msk.bf16.mxu0 %vm3016_vm1, %v3015_v0 }
 0x188   : > { %v808_v9 = vpop.f32.mrb[0].mxu1 }
 0x189   : > { %v809_v10 = vadd.f32 %v2447_v7, %v808_v9  ;;  %v2537_v11 = vpop.f32.mrb[1].mxu1 }
 0x18a   : > { %v811_v14 = vpop.f32.mrb[2].mxu1 }
 0x18b   : > { %v1046_v16 = vpack.c.bf16 %v809_v10, %v809_v10  ;;  %v2538_v17 = vpop.f32.mrb[3].mxu1 }
 0x18c   : > { %v744_v12 = vpop.f32.mrb[0].mxu0 }
 0x18d   : > { %v745_v13 = vadd.f32 %v2443_v8, %v744_v12  ;;  %v2529_v15 = vpop.f32.mrb[1].mxu0  ;;  %1052 = vrot.lane.b32.xlu1 %v1046_v16, %s3017_s24  ;;  %1048 = vrot.lane.b32.xlu0 %v1046_v16, %s3018_s19  ;;  %v1060_v45 = vrot.slane %v1046_v16, %v3370_v32 }
 0x18e   : > { %v747_v18 = vpop.f32.mrb[2].mxu0 }
 0x18f   : > { %v750_v19 = vmul.f32 0.35355338, %v745_v13  ;;  %v2530_v20 = vpop.f32.mrb[3].mxu0 }
 0x191   : > { %v877_v21 = vpack.c.bf16 %v750_v19, %v750_v19  ;;  %1050 = vrot.lane.b32.xlu0 %v1046_v16, %s3019_s30 }
 0x193   : > { %879 = vrot.lane.b32.xlu1 %v877_v21, %s3018_s19  ;;  %v891_v53 = vrot.slane %v877_v21, %v3370_v32 }
 0x195   : > { %881 = vrot.lane.b32.xlu0 %v877_v21, %s3019_s30 }
 0x197   : > { %883 = vrot.lane.b32.xlu1 %v877_v21, %s3017_s24 }
 0x1ff   : > { %v1053_v33 = vpop.permute.xlu1 %1052  ;;  %v1049_v34 = vpop.permute.xlu0 %1048 }
 0x200   : > { %v1102_v35 = vrot.slane %v1053_v33, %v3370_v32  ;;  %v1094_v37 = vrot.slane %v1049_v34, %v3370_v32 }
 0x202   : > { %v1103_v38 = vcombine.low %v1094_v37, %v1102_v35  ;;  %v1104_v39 = vcombine.high %v1094_v37, %v1102_v35 }
 0x203   : > { %v1051_v40 = vpop.permute.xlu0 %1050 }
 0x204   : > { %v1111_v42 = vrot.slane %v1103_v38, %v3373_v36  ;;  %v1118_v43 = vrot.slane %v1104_v39, %v3373_v36  ;;  %v1068_v44 = vrot.slane %v1051_v40, %v3370_v32 }
 0x205   : > { %v880_v41 = vpop.permute.xlu1 %879 }
 0x206   : > { %v1119_v47 = vcombine.high %v1111_v42, %v3022_v46  ;;  %v1120_v48 = vcombine.high %v1118_v43, %v3022_v46  ;;  %v925_v49 = vrot.slane %v880_v41, %v3370_v32  ;;  %v1069_v50 = vcombine.low %v1060_v45, %v1068_v44 }
 0x207   : > { %v1070_v51 = vcombine.high %v1060_v45, %v1068_v44  ;;  %v882_v52 = vpop.permute.xlu0 %881  ;;  %v1126_v55 = vshrl.u32 %v1111_v42, 16  ;;  %v1142_v56 = vshrl.u32 %v1118_v43, 16 }
 0x208   : > { %v899_v57 = vrot.slane %v882_v52, %v3370_v32  ;;  %v1134_v59 = vshrl.u32 %v1119_v47, 16  ;;  %v1150_v60 = vshrl.u32 %v1120_v48, 16  ;;  %v1077_v61 = vrot.slane %v1069_v50, %v3373_v36 }
 0x209   : > { %v884_v54 = vpop.permute.xlu1 %883  ;;  %v1084_v62 = vrot.slane %v1070_v51, %v3373_v36 }
 0x20a   : > { %v933_v58 = vrot.slane %v884_v54, %v3370_v32  ;;  %v900_v63 = vcombine.low %v891_v53, %v899_v57  ;;  %v901_v1 = vcombine.high %v891_v53, %v899_v57  ;;  %v1085_v4 = vcombine.high %v1077_v61, %v3022_v46 }
 0x20b   : > { %v1086_v6 = vcombine.high %v1084_v62, %v3022_v46  ;;  %v1123_v7 = vpack.i.b16 %v1111_v42, %v1077_v61  ;;  %v1125_v8 = vshrl.u32 %v1077_v61, 16  ;;  %v1139_v9 = vpack.i.b16 %v1118_v43, %v1084_v62 }
 0x20c   : > { %v934_v2 = vcombine.low %v925_v49, %v933_v58  ;;  %v935_v3 = vcombine.high %v925_v49, %v933_v58  ;;  %v1141_v10 = vshrl.u32 %v1084_v62, 16  ;;  %v908_v11 = vrot.slane %v900_v63, %v3373_v36 }
 0x20d   : > { %v915_v12 = vrot.slane %v901_v1, %v3373_v36  ;;  %v1127_v13 = vpack.i.b16 %v1126_v55, %v1125_v8  ;;  %v1131_v14 = vpack.i.b16 %v1119_v47, %v1085_v4  ;;  %v1133_v15 = vshrl.u32 %v1085_v4, 16 }
 0x20e   : > { %v1147_v16 = vpack.i.b16 %v1120_v48, %v1086_v6  ;;  %v1143_v17 = vpack.i.b16 %v1142_v56, %v1141_v10  ;;  %v1149_v18 = vshrl.u32 %v1086_v6, 16  ;;  %v1153_v19 = vcombine.low %v1123_v7, %v1139_v9 }
 0x20f   : > { %v916_v20 = vcombine.high %v908_v11, %v3022_v46  ;;  %v1135_v21 = vpack.i.b16 %v1134_v59, %v1133_v15  ;;  %v917_v23 = vcombine.high %v915_v12, %v3022_v46  ;;  %v956_v27 = vshrl.u32 %v908_v11, 16 }
 0x210   : > { %v1161_v22 = vcombine.low %v1131_v14, %v1147_v16  ;;  %v1151_v24 = vpack.i.b16 %v1150_v60, %v1149_v18  ;;  %v1160_v25 = vrot.slane %v1153_v19, %v3370_v32  ;;  %v1178_v26 = vcombine.low %v1127_v13, %v1143_v17 }
 0x211   : > { %v964_v28 = vshrl.u32 %v916_v20, 16  ;;  %v972_v29 = vshrl.u32 %v915_v12, 16  ;;  %v942_v30 = vrot.slane %v934_v2, %v3373_v36  ;;  %v949_v31 = vrot.slane %v935_v3, %v3373_v36 }
 0x212   : > { %v1186_v33 = vcombine.low %v1135_v21, %v1151_v24  ;;  %v980_v34 = vshrl.u32 %v917_v23, 16  ;;  %v1168_v35 = vrot.slane %v1161_v22, %v3370_v32  ;;  %v1185_v37 = vrot.slane %v1178_v26, %v3370_v32 }
 0x213   : > { %v950_v38 = vcombine.high %v942_v30, %v3022_v46  ;;  %v951_v39 = vcombine.high %v949_v31, %v3022_v46  ;;  %v954_v40 = vpack.i.b16 %v942_v30, %v908_v11  ;;  %v957_v41 = vshrl.u32 %v942_v30, 16 }
 0x214   : > { %v970_v42 = vpack.i.b16 %v949_v31, %v915_v12  ;;  %v973_v43 = vshrl.u32 %v949_v31, 16  ;;  %v1169_v44 = vcombine.low %v1160_v25, %v1168_v35  ;;  %v1193_v45 = vrot.slane %v1186_v33, %v3370_v32  ;;  %v871_v33 = vpop.f32.mrb[4].mxu0 }
 0x215   : > { %v958_v47 = vpack.i.b16 %v957_v41, %v956_v27  ;;  %v962_v48 = vpack.i.b16 %v950_v38, %v916_v20  ;;  %v965_v49 = vshrl.u32 %v950_v38, 16  ;;  %v978_v50 = vpack.i.b16 %v951_v39, %v917_v23 }
 0x216   : > { %v974_v51 = vpack.i.b16 %v973_v43, %v972_v29  ;;  %v981_v52 = vshrl.u32 %v951_v39, 16  ;;  %v984_v53 = vcombine.low %v954_v40, %v970_v42  ;;  %v1176_v54 = vrot.slane %v1169_v44, %v3373_v36 }
 0x217   : > { %v966_v55 = vpack.i.b16 %v965_v49, %v964_v28  ;;  %v992_v56 = vcombine.low %v962_v48, %v978_v50  ;;  %v1194_v57 = vcombine.low %v1185_v37, %v1193_v45 }
 0x218   : > { %v982_v58 = vpack.i.b16 %v981_v52, %v980_v34  ;;  %v1009_v59 = vcombine.low %v958_v47, %v974_v51  ;;  %v991_v60 = vrot.slane %v984_v53, %v3370_v32  ;;  %v1206_v1 = vshrl.u32 %v1176_v54, 16  ;;  %v2545_v34 = vpop.f32.mrb[5].mxu0 }
 0x219   : > { %v999_v61 = vrot.slane %v992_v56, %v3370_v32  ;;  %v1201_v62 = vrot.slane %v1194_v57, %v3373_v36  ;;  %v1177_v11 = vcombine.high %v1176_v54, %v3022_v46  ;;  %v874_v35 = vpop.f32.mrb[6].mxu0  ;;  %v2451_v56 = vld [vmem:[#allocation7] ss:$0 sm:$0xff] }
 0x21a   : > { %v1017_v63 = vcombine.low %v966_v55, %v982_v58  ;;  %v1016_v7 = vrot.slane %v1009_v59, %v3370_v32  ;;  %v2546_v37 = vpop.f32.mrb[7].mxu0 }
 0x21b   : > { %v1000_v2 = vcombine.low %v991_v60, %v999_v61  ;;  %v1205_v3 = vpack.i.b16 %v1201_v62, %v1176_v54  ;;  %v1207_v4 = vshrl.u32 %v1201_v62, 16  ;;  %v1202_v6 = vcombine.high %v1201_v62, %v3022_v46 }
 0x21c   : > { %v1024_v8 = vrot.slane %v1017_v63, %v3370_v32  ;;  %v1212_v18 = vshrl.u32 %v1177_v11, 16  ;;  %v872_v60 = vadd.f32 %v2451_v56, %v871_v33 }
 0x21d   : > { %v1389_v9 = vsel %vm1384_vm2, %v1205_v3, 0  ;;  %v1208_v10 = vpack.i.b16 %v1207_v4, %v1206_v1  ;;  %v1007_v14 = vrot.slane %v1000_v2, %v3373_v36  ;;  %v1213_v15 = vshrl.u32 %v1202_v6, 16 }
 0x21e   : > { %v1025_v12 = vcombine.low %v1016_v7, %v1024_v8  ;;  %2548 = vmatpush3.bf16.xpose.msra.mxu1 %v1389_v9  ;;  %v1211_v17 = vpack.i.b16 %v1202_v6, %v1177_v11  ;;  %v1215_v61 = vpack.c.bf16 %v872_v60, %v872_v60 }
 0x21f   : > { %v1435_v13 = vsel %vm1384_vm2, %v1208_v10, 0  ;;  %2559 = vmatprep.subr.bf16.mxu1 %v3015_v0  ;;  %v1037_v21 = vshrl.u32 %v1007_v14, 16  ;;  %v1214_v22 = vpack.i.b16 %v1213_v15, %v1212_v18  ;;  %v1008_v27 = vcombine.high %v1007_v14, %v3022_v46 }
 0x220   : > { %2554 = vmatpush3.bf16.xpose.msra.mxu0 %v1435_v13  ;;  %v1032_v16 = vrot.slane %v1025_v12, %v3373_v36  ;;  %v1481_v23 = vsel %vm1384_vm2, %v1211_v17, 0 }
 0x221   : > { %2565 = vmatprep.subr.bf16.mxu0 %v3015_v0  ;;  %v1527_v26 = vsel %vm1384_vm2, %v1214_v22, 0  ;;  %v1043_v30 = vshrl.u32 %v1008_v27, 16 }
 0x222   : > { %v1038_v19 = vshrl.u32 %v1032_v16, 16  ;;  %v1036_v20 = vpack.i.b16 %v1032_v16, %v1007_v14  ;;  %v1033_v25 = vcombine.high %v1032_v16, %v3022_v46 }
 0x224   : > { %v1039_v24 = vpack.i.b16 %v1038_v19, %v1037_v21  ;;  %v1044_v28 = vshrl.u32 %v1033_v25, 16  ;;  %v1042_v29 = vpack.i.b16 %v1033_v25, %v1008_v27 }
 0x225   : > { %2550 = vmatmul.mubr.msk.bf16.vlgmr.msra.gmra.mrb[4].mxu1 %vm1384_vm2, %v1036_v20 }
 0x226   : > { %2560 = vmatpush3.bf16.xpose.msra.mxu1 %v1481_v23  ;;  %2561 = vmatprep.mubr.msk.bf16.mxu1 %vm3016_vm1, %v3015_v0  ;;  %v1045_v31 = vpack.i.b16 %v1044_v28, %v1043_v30 }
 0x227   : > { %2556 = vmatmul.mubr.msk.bf16.vlgmr.msra.gmra.mrb[8].mxu0 %vm1384_vm2, %v1039_v24  ;;  %2571 = vmatprep.subr.bf16.mxu1 %v3015_v0 }
 0x228   : > { %2566 = vmatpush3.bf16.xpose.msra.mxu0 %v1527_v26  ;;  %2567 = vmatprep.mubr.msk.bf16.mxu0 %vm3016_vm1, %v3015_v0 }
 0x229   : > { %2577 = vmatprep.subr.bf16.mxu0 %v3015_v0 }
 0x22d   : > { %2562 = vmatmul.mubr.msk.bf16.vlgmr.msra.gmra.mrb[8].mxu1 %vm1384_vm2, %v1042_v29  ;;  %v1229_v29 = vrot.slane %v1215_v61, %v3370_v32 }
 0x22e   : > { %2573 = vmatprep.mubr.msk.bf16.mxu1 %vm3016_vm1, %v3015_v0 }
 0x22f   : > { %2568 = vmatmul.mubr.msk.bf16.vlgmr.msra.gmra.mrb[12].mxu0 %vm1384_vm2, %v1045_v31 }
 0x230   : > { %2579 = vmatprep.mubr.msk.bf16.mxu0 %vm3016_vm1, %v3015_v0 }
 0x2f8   : > { %v1425_v38 = vpop.f32.mrb[4].mxu1 }
 0x2f9   : > { %v2551_v39 = vpop.f32.mrb[5].mxu1  ;;  %v1569_v40 = vsel %vm1384_vm2, %v1425_v38, -inf }
 0x2fa   : > { %1570 = vmax.xlane.f32.xlu0 %v1569_v40  ;;  %v1428_v41 = vpop.f32.mrb[6].mxu1  ;;  %v1471_v42 = vpop.f32.mrb[8].mxu0 }
 0x2fb   : > { %v2552_v43 = vpop.f32.mrb[7].mxu1  ;;  %v2557_v44 = vpop.f32.mrb[9].mxu0  ;;  %v1572_v45 = vsel %vm1384_vm2, %v1471_v42, -inf }
 0x2fc   : > { %1573 = vmax.xlane.f32.xlu1 %v1572_v45  ;;  %v1474_v47 = vpop.f32.mrb[10].mxu0 }
 0x2fd   : > { %v2558_v48 = vpop.f32.mrb[11].mxu0 }
 0x300   : > { %v1517_v49 = vpop.f32.mrb[8].mxu1 }
 0x301   : > { %v2563_v50 = vpop.f32.mrb[9].mxu1  ;;  %v1575_v51 = vsel %vm1384_vm2, %v1517_v49, -inf }
 0x302   : > { %1576 = vmax.xlane.f32.xlu0 %v1575_v51  ;;  %v1520_v52 = vpop.f32.mrb[10].mxu1  ;;  %v1563_v53 = vpop.f32.mrb[12].mxu0 }
 0x303   : > { %v2564_v54 = vpop.f32.mrb[11].mxu1  ;;  %v2569_v55 = vpop.f32.mrb[13].mxu0  ;;  %v1578_v59 = vsel %vm1384_vm2, %v1563_v53, -inf }
 0x304   : > { %v1566_v57 = vpop.f32.mrb[14].mxu0 }
 0x305   : > { %v2570_v58 = vpop.f32.mrb[15].mxu0 }
 0x306   : > { %1579 = vmax.xlane.f32.xlu0 %v1578_v59 }
 0x30d   : > { %1217 = vrot.lane.b32.xlu1 %v1215_v61, %s3018_s19 }
 0x387   : > { %v1571_v62 = vpop.xlane.xlu0 %1570 }
 0x388   : > { %v1581_v63 = vsub.f32 %v1425_v38, %v1571_v62 }
 0x389   : > { %v1574_v1 = vpop.xlane.xlu1 %1573 }
 0x38a   : > { %v1585_v2 = vmul.f32 1.442695, %v1581_v63  ;;  %v1582_v3 = vsub.f32 %v1471_v42, %v1574_v1 }
 0x38c   : > { %2756 = vpow2.f32 %v1585_v2  ;;  %v1587_v4 = vmul.f32 1.442695, %v1582_v3 }
 0x38d   : > { %v1218_v20 = vpop.permute.xlu1 %1217 }
 0x38e   : > { %2758 = vpow2.f32 %v1587_v4  ;;  %v1263_v24 = vrot.slane %v1218_v20, %v3370_v32 }
 0x38f   : > { %v1577_v10 = vpop.xlane.xlu0 %1576 }
 0x390   : > { %v1583_v12 = vsub.f32 %v1517_v49, %v1577_v10 }
 0x392   : > { %v1589_v14 = vmul.f32 1.442695, %v1583_v12 }
 0x393   : > { %v1580_v11 = vpop.xlane.xlu0 %1579 }
 0x394   : > { %v1584_v13 = vsub.f32 %v1563_v53, %v1580_v11  ;;  %2760 = vpow2.f32 %v1589_v14 }
 0x396   : > { %v3439_v6 = vpop.eup %2756  ;;  %v1591_v15 = vmul.f32 1.442695, %v1584_v13 }
 0x397   : > { %v1593_v7 = vsel %vm1384_vm2, %v3439_v6, 0.0 }
 0x398   : > { %v3443_v8 = vpop.eup %2758  ;;  %1594 = vadd.xlane.f32.xlu1 %v1593_v7  ;;  %2762 = vpow2.f32 %v1591_v15 }
 0x399   : > { %v1596_v9 = vsel %vm1384_vm2, %v3443_v8, 0.0 }
 0x39a   : > { %1597 = vadd.xlane.f32.xlu0 %v1596_v9 }
 0x39e   : > { %v3449_v16 = vpop.eup %2760 }
 0x39f   : > { %v1599_v18 = vsel %vm1384_vm2, %v3449_v16, 0.0 }
 0x3a2   : > { %v3451_v17 = vpop.eup %2762 }
 0x3a3   : > { %v1602_v19 = vsel %vm1384_vm2, %v3451_v17, 0.0 }
 0x3a9   : > { %1221 = vrot.lane.b32.xlu1 %v1215_v61, %s3017_s24  ;;  %s658_s24 = scalar_lea.vmem [#allocation13], %s2441_s15  ;;  %s2920_s15 = sshll.u32 %s3026_s27, 4  ;;  %s2921_s15 = int_to_ptr.vmem [resolvable:$false] %s2920_s15 }
 0x3aa   : > { %s2264_s19 = sshll.u32 %s658_s24, 4  ;;  %s2922_s17 = scalar_lea.vmem %s2921_s15, 256  ;;  %s3575_s19 = int_to_ptr.vmem [resolvable:$true] %s2264_s19 }
 0x3ab   : > { %s2916_s6 = scalar_lea.vmem %s3575_s19, 128  ;;  %p2923_p11 = scmp.lt.s32.totalorder %s3575_s19, %s2921_s15 }
 0x3ac   : > { %p2917_p2 = scmp.ne.s32.totalorder %s3575_s19, %s2916_s6  ;;  %p2924_p3 = scmp.lt.s32.totalorder %s2922_s17, %s2916_s6 }
 0x3ae   : > { %p2918_p8 = pnand %p2917_p2, %p3685_p4  ;;  %p2925_p5 = por %p2924_p3, %p2923_p11 }
 0x3b0   : > { %1219 = vrot.lane.b32.xlu0 %v1215_v61, %s3019_s30  ;;  %p2919_p10 = pneg %p2918_p8 }
 0x3b2   : > { %p2926_p6 = pnand %p2925_p5, %p2919_p10 }
 0x3cd   : > { %1600 = vadd.xlane.f32.xlu1 %v1599_v18 }
 0x3cf   : > { %1603 = vadd.xlane.f32.xlu0 %v1602_v19 }
 0x425   : > { %v1595_v21 = vpop.xlane.xlu1 %1594 }
 0x426   : > { %2764 = vrcp.f32 %v1595_v21 }
 0x427   : > { %v1598_v22 = vpop.xlane.xlu0 %1597 }
 0x428   : > { %2766 = vrcp.f32 %v1598_v22 }
 0x429   : > { %v1222_v23 = vpop.permute.xlu1 %1221 }
 0x42a   : > { %v1271_v25 = vrot.slane %v1222_v23, %v3370_v32 }
 0x42b   : > { %v1220_v26 = vpop.permute.xlu0 %1219 }
 0x42c   : > { %v1272_v27 = vcombine.low %v1263_v24, %v1271_v25  ;;  %v1273_v28 = vcombine.high %v1263_v24, %v1271_v25  ;;  %v1237_v30 = vrot.slane %v1220_v26, %v3370_v32 }
 0x42e   : > { %v1280_v31 = vrot.slane %v1272_v27, %v3373_v36  ;;  %v1287_v33 = vrot.slane %v1273_v28, %v3373_v36  ;;  %v1238_v34 = vcombine.low %v1229_v29, %v1237_v30  ;;  %v1239_v35 = vcombine.high %v1229_v29, %v1237_v30 }
 0x430   : > { %v1288_v37 = vcombine.high %v1280_v31, %v3022_v46  ;;  %v1289_v38 = vcombine.high %v1287_v33, %v3022_v46  ;;  %v1246_v39 = vrot.slane %v1238_v34, %v3373_v36  ;;  %v1253_v40 = vrot.slane %v1239_v35, %v3373_v36  ;;  %v2765_v3 = vpop.eup %2764 }
 0x431   : > { %v1295_v41 = vshrl.u32 %v1280_v31, 16  ;;  %v1311_v42 = vshrl.u32 %v1287_v33, 16  ;;  %v1609_v15 = vmul.f32 %v2765_v3, %v3439_v6 }
 0x432   : > { %v1303_v43 = vshrl.u32 %v1288_v37, 16  ;;  %v1254_v44 = vcombine.high %v1246_v39, %v3022_v46  ;;  %v1255_v45 = vcombine.high %v1253_v40, %v3022_v46  ;;  %v1292_v47 = vpack.i.b16 %v1280_v31, %v1246_v39  ;;  %v2767_v10 = vpop.eup %2766 }
 0x433   : > { %v1319_v48 = vshrl.u32 %v1289_v38, 16  ;;  %v1294_v49 = vshrl.u32 %v1246_v39, 16  ;;  %v1308_v50 = vpack.i.b16 %v1287_v33, %v1253_v40  ;;  %v1310_v51 = vshrl.u32 %v1253_v40, 16 }
 0x434   : > { %v1300_v52 = vpack.i.b16 %v1288_v37, %v1254_v44  ;;  %v1302_v53 = vshrl.u32 %v1254_v44, 16  ;;  %v1316_v54 = vpack.i.b16 %v1289_v38, %v1255_v45  ;;  %v1318_v55 = vshrl.u32 %v1255_v45, 16 }
 0x435   : > { %v1296_v56 = vpack.i.b16 %v1295_v41, %v1294_v49  ;;  %v1312_v57 = vpack.i.b16 %v1311_v42, %v1310_v51  ;;  %v1322_v58 = vcombine.low %v1292_v47, %v1308_v50  ;;  %v1610_v22 = vmul.f32 %v2767_v10, %v3443_v8 }
 0x436   : > { %v1304_v59 = vpack.i.b16 %v1303_v43, %v1302_v53  ;;  %v1320_v60 = vpack.i.b16 %v1319_v48, %v1318_v55  ;;  %v1330_v61 = vcombine.low %v1300_v52, %v1316_v54  ;;  %v1613_v29 = vpack.c.bf16 %v1609_v15, %v1609_v15 }
 0x437   : > { %v1347_v62 = vcombine.low %v1296_v56, %v1312_v57  ;;  %v1329_v63 = vrot.slane %v1322_v58, %v3370_v32  ;;  %v1614_v30 = vpack.c.bf16 %v1610_v22, %v1610_v22 }
 0x438   : > { %v1355_v1 = vcombine.low %v1304_v59, %v1320_v60  ;;  %v1337_v2 = vrot.slane %v1330_v61, %v3370_v32 }
 0x439   : > { %v1354_v7 = vrot.slane %v1347_v62, %v3370_v32 }
 0x43a   : > { %v1338_v4 = vcombine.low %v1329_v63, %v1337_v2  ;;  %v1362_v9 = vrot.slane %v1355_v1, %v3370_v32 }
 0x43c   : > { %v1345_v11 = vrot.slane %v1338_v4, %v3373_v36  ;;  %v1363_v12 = vcombine.low %v1354_v7, %v1362_v9  ;;  %v2748_v7 = vld [vmem:[#allocation9] sm:$0xff]  }
 0x43e   : > { %v1370_v13 = vrot.slane %v1363_v12, %v3373_v36  ;;  %v1346_v14 = vcombine.high %v1345_v11, %v3022_v46  ;;  %v1375_v19 = vshrl.u32 %v1345_v11, 16 }
 0x440   : > { %v1374_v18 = vpack.i.b16 %v1370_v13, %v1345_v11  ;;  %v1376_v20 = vshrl.u32 %v1370_v13, 16  ;;  %v1371_v21 = vcombine.high %v1370_v13, %v3022_v46  ;;  %v1381_v23 = vshrl.u32 %v1346_v14, 16 }
 0x442   : > { %v1622_v24 = vsel %vm1620_vm3, %v1374_v18, 0  ;;  %v1377_v25 = vpack.i.b16 %v1376_v20, %v1375_v19  ;;  %v1380_v26 = vpack.i.b16 %v1371_v21, %v1346_v14  ;;  %v1382_v27 = vshrl.u32 %v1371_v21, 16 }
 0x443   : > { %2572 = vmatpush3.bf16.msra.mxu1 %v1622_v24 }
 0x444   : > { %v1668_v28 = vsel %vm1620_vm3, %v1377_v25, 0  ;;  %2583 = vmatprep.subr.bf16.mxu1 %v3015_v0  ;;  %v1383_v6 = vpack.i.b16 %v1382_v27, %v1381_v23  ;;  %v1714_v46 = vsel %vm1620_vm3, %v1380_v26, 0  ;;  %v2749_v23 = vld [vmem:[#allocation9 + $0x8] sm:$0xff]  }
 0x445   : > { %2578 = vmatpush3.bf16.msra.mxu0 %v1668_v28 }
 0x446   : > { %2574 = vmatmul.mubr.msk.bf16.vlgmr.msra.gmra.mrb[12].mxu1 %vm1384_vm2, %v1613_v29  ;;  %2589 = vmatprep.subr.bf16.mxu0 %v3015_v0  ;;  %v1760_v8 = vsel %vm1620_vm3, %v1383_v6, 0 }
 0x447   : > { %2584 = vmatpush3.bf16.msra.mxu1 %v1714_v46  ;;  %2585 = vmatprep.mubr.msk.bf16.mxu1 %vm3016_vm1, %v3015_v0 }
 0x448   : > { %2580 = vmatmul.mubr.msk.bf16.vlgmr.msra.gmra.mrb[16].mxu0 %vm1384_vm2, %v1614_v30  ;;  %2595 = vmatprep.subr.bf16.mxu1 %v3015_v0 }
 0x449   : > { %2590 = vmatpush3.bf16.msra.mxu0 %v1760_v8  ;;  %2591 = vmatprep.mubr.msk.bf16.mxu0 %vm3016_vm1, %v3015_v0 }
 0x44a   : > { %2603 = vmatprep.subr.bf16.mxu0 %v3015_v0 }
 0x45a   : > { %v1601_v31 = vpop.xlane.xlu1 %1600 }
 0x45b   : > { %2768 = vrcp.f32 %v1601_v31 }
 0x45c   : > { %v1604_v33 = vpop.xlane.xlu0 %1603 }
 0x45d   : > { %2770 = vrcp.f32 %v1604_v33 }
 0x465   : > { %v2769_v34 = vpop.eup %2768 }
 0x466   : > { %v1611_v35 = vmul.f32 %v2769_v34, %v3449_v16 }
 0x467   : > { %v2771_v37 = vpop.eup %2770 }
 0x468   : > { %v1612_v38 = vmul.f32 %v2771_v37, %v3451_v17  ;;  %v1615_v39 = vpack.c.bf16 %v1611_v35, %v1611_v35 }
 0x46a   : > { %2586 = vmatmul.mubr.msk.bf16.vlgmr.msra.gmra.mrb[16].mxu1 %vm1384_vm2, %v1615_v39  ;;  %v1616_v40 = vpack.c.bf16 %v1612_v38, %v1612_v38 }
 0x46b   : > { %2599 = vmatprep.mubr.msk.bf16.mxu1 %vm3016_vm1, %v3015_v0  ;;  %2596 = vmatpush3.bf16.msra.mxu1 %v2748_v7  ;;  %v2471_v7 = vld [vmem:[%s3633_s12] ss:$0 sm:$0xff] }
 0x46c   : > { %2592 = vmatmul.mubr.msk.bf16.vlgmr.msra.gmra.mrb[20].mxu0 %vm1384_vm2, %v1616_v40  ;;  %2597 = vmatprep.subr.bf16.mxu1 %v3015_v0  ;;  %v2465_v40 = vld [vmem:[#allocation10] ss:$0 sm:$0xff] }
 0x46d   : > { %2607 = vmatprep.mubr.msk.bf16.mxu0 %vm3016_vm1, %v3015_v0 }
 0x46f   : > { %2598 = vmatpush3.bf16.msra.mxu1 %v2749_v23  ;;  %v2480_v23 = vld [vmem:[%s3635_s14] ss:$0 sm:$0xff] }
 0x470   : > { %2611 = vmatprep.subr.bf16.mxu1 %v3015_v0 }
 0x519   : > { %v1658_v41 = vpop.f32.mrb[12].mxu1 }
 0x51a   : > { %v2575_v42 = vpop.f32.mrb[13].mxu1 }
 0x51b   : > { %v1661_v43 = vpop.f32.mrb[14].mxu1  ;;  %v1704_v44 = vpop.f32.mrb[16].mxu0 }
 0x51c   : > { %v2576_v16 = vpop.f32.mrb[15].mxu1  ;;  %v2581_v45 = vpop.f32.mrb[17].mxu0 }
 0x51d   : > { %v1707_v47 = vpop.f32.mrb[18].mxu0 }
 0x51e   : > { %v2582_v17 = vpop.f32.mrb[19].mxu0 }
 0x53d   : > { %v1750_v48 = vpop.f32.mrb[16].mxu1 }
 0x53e   : > { %v1802_v49 = vcombine.low %v1658_v41, %v1750_v48  ;;  %v1803_v50 = vcombine.high %v1658_v41, %v1750_v48  ;;  %v2587_v51 = vpop.f32.mrb[17].mxu1 }
 0x53f   : > { %v1753_v52 = vpop.f32.mrb[18].mxu1  ;;  %v1796_v53 = vpop.f32.mrb[20].mxu0 }
 0x540   : > { %v1818_v54 = vcombine.low %v1704_v44, %v1796_v53  ;;  %v1819_v55 = vcombine.high %v1704_v44, %v1796_v53  ;;  %v2588_v56 = vpop.f32.mrb[19].mxu1  ;;  %v2593_v57 = vpop.f32.mrb[21].mxu0  ;;  %v1810_v59 = vrot.slane %v1802_v49, %v3370_v32  ;;  %v1817_v60 = vrot.slane %v1803_v50, %v3370_v32  ;;  %v2750_v52 = vld [vmem:[%s3632_s11] sm:$0xff]   ;;  %v2751_v53 = vld [vmem:[%s3632_s11 + $0x8] sm:$0xff]  }
 0x541   : > { %v1799_v58 = vpop.f32.mrb[22].mxu0  ;;  %2604 = vmatpush3.bf16.msra.mxu0 %v2750_v52 }
 0x542   : > { %v1826_v61 = vrot.slane %v1818_v54, %v3370_v32  ;;  %v1833_v62 = vrot.slane %v1819_v55, %v3370_v32  ;;  %v2594_v63 = vpop.f32.mrb[23].mxu0  ;;  %2605 = vmatprep.subr.bf16.mxu0 %v3015_v0  ;;  %v2753_v54 = vld [vmem:[%s3634_s13 + $0x8] sm:$0xff]  }
 0x544   : > { %v1834_v1 = vcombine.low %v1810_v59, %v1826_v61  ;;  %v1835_v2 = vcombine.high %v1810_v59, %v1826_v61  ;;  %v1850_v3 = vcombine.low %v1817_v60, %v1833_v62  ;;  %v1851_v4 = vcombine.high %v1817_v60, %v1833_v62  ;;  %v2469_v59 = vld [vmem:[#allocation12] ss:$0 sm:$0xff]  ;;  %v2470_v61 = vld [vmem:[%s3631_s10] ss:$0 sm:$0xff] }
 0x545   : > { %2606 = vmatpush3.bf16.msra.mxu0 %v2751_v53 }
 0x546   : > { %v1842_v9 = vrot.slane %v1834_v1, %v3373_v36  ;;  %v1849_v10 = vrot.slane %v1835_v2, %v3373_v36  ;;  %v1858_v11 = vrot.slane %v1850_v3, %v3373_v36  ;;  %v1865_v12 = vrot.slane %v1851_v4, %v3373_v36  ;;  %v2754_v3 = vld [vmem:[%s3634_s13 + $0x10] sm:$0xff]   ;;  %v2755_v4 = vld [vmem:[%s3634_s13 + $0x18] sm:$0xff]  }
 0x548   : > { %v1870_v13 = vcombine.low %v1842_v9, %v1849_v10  ;;  %v2463_v14 = vcombine.high %v1842_v9, %v1849_v10  ;;  %v1886_v15 = vcombine.low %v1858_v11, %v1865_v12  ;;  %v2464_v18 = vcombine.high %v1858_v11, %v1865_v12 }
 0x54a   : > { %v1877_v19 = vrot.slane %v1870_v13, %v3370_v32  ;;  %v1885_v20 = vrot.slane %v2463_v14, %v3370_v32  ;;  %v1893_v21 = vrot.slane %v1886_v15, %v3370_v32  ;;  %v1901_v22 = vrot.slane %v2464_v18, %v3370_v32  ;;  %v2125_v18 = vld [vmem:[#allocation3] sm:$0xff] }
 0x54c   : > { %v1903_v24 = vcombine.high %v1877_v19, %v1885_v20  ;;  %v1919_v25 = vcombine.high %v1893_v21, %v1901_v22  ;;  %v1902_v26 = vcombine.low %v1877_v19, %v1885_v20  ;;  %v1918_v27 = vcombine.low %v1893_v21, %v1901_v22 }
 0x54e   : > { %v1917_v28 = vrot.slane %v1903_v24, %v3373_v36  ;;  %v1933_v29 = vrot.slane %v1919_v25, %v3373_v36  ;;  %v1910_v6 = vrot.slane %v1902_v26, %v3373_v36  ;;  %v1926_v46 = vrot.slane %v1918_v27, %v3373_v36 }
 0x550   : > { %v1936_v30 = vcombine.low %v1917_v28, %v1933_v29  ;;  %v1935_v8 = vcombine.high %v1910_v6, %v1926_v46  ;;  %v1937_v31 = vcombine.high %v1917_v28, %v1933_v29  ;;  %v1934_v32 = vcombine.low %v1910_v6, %v1926_v46 }
 0x552   : > { %1943 = vrot.lane.b32.xlu1 %v1936_v30, %s3023_s29  ;;  %1939 = vrot.lane.b32.xlu0 %v1935_v8, %s3024_s8  ;;  %s3684_s8 = sld [smem:[#allocation32_spill]] }
 0x556   : > { %1947 = vrot.lane.b32.xlu1 %v1937_v31, %s3025_s26 }
 0x558   : > { %s3573_s26 = scalar_lea.hbm %s3684_s8, %s2484_s23 }
 0x5c4   : > { %v1944_v33 = vpop.permute.xlu1 %1943  ;;  %v1940_v34 = vpop.permute.xlu0 %1939 }
 0x5c5   : > { %v1950_v35 = vsel %vm1384_vm2, %v1934_v32, %v1940_v34  ;;  %v2481_v34 = vld [vmem:[%s3682_s16] ss:$0 sm:$0xff] }
 0x5c6   : > { %v1952_v38 = vsel %vm1951_vm4, %v1950_v35, %v1944_v33 }
 0x5c8   : > { %v1948_v37 = vpop.permute.xlu1 %1947 }
 0x5c9   : > { %v1954_v39 = vsel %vm1953_vm5, %v1952_v38, %v1948_v37  ;;  %v2482_v37 = vld [vmem:[%s3683_s0] ss:$0 sm:$0xff] }
 0x5ca   : > { %v1955_v36 = vpack.c.bf16 %v1954_v39, %v1954_v39 }
 0x5cc   : > { %2600 = vmatmul.mubr.msk.bf16.vlgmr.msra.gmra.mrb[20].mxu1 %vm706_vm0, %v1955_v36 }
 0x5cd   : > { %2619 = vmatprep.mubr.msk.bf16.mxu1 %vm3016_vm1, %v3015_v0 }
 0x69f   : > { %v2016_v41 = vpop.f32.mrb[20].mxu1 }
 0x6a0   : > { %v2017_v42 = vadd.f32 %v2465_v40, %v2016_v41  ;;  %v2601_v43 = vpop.f32.mrb[21].mxu1 }
 0x6a1   : > { %v2019_v44 = vpop.f32.mrb[22].mxu1 }
 0x6a2   : > { %v2602_v16 = vpop.f32.mrb[23].mxu1  ;;  %v2022_v45 = vadd.f32 %v2017_v42, %v3341_v5  ;;  %v2752_v5 = vld [vmem:[%s3634_s13] sm:$0xff]  }
 0x6a3   : > { %2612 = vmatpush3.bf16.msra.mxu1 %v2752_v5 }
 0x6a4   : > { %v2023_v47 = vsel %vm706_vm0, %v2022_v45, 0.0  ;;  %2613 = vmatprep.subr.bf16.mxu1 %v3015_v0 }
 0x6a5   : > { %2024 = vadd.xlane.f32.xlu0 %v2023_v47 }
 0x6a7   : > { %2614 = vmatpush3.bf16.msra.mxu1 %v2753_v54 }
 0x6a8   : > { %2615 = vmatprep.subr.bf16.mxu1 %v3015_v0 }
 0x6ab   : > { %2616 = vmatpush3.bf16.msra.mxu1 %v2754_v3 }
 0x6ac   : > { %2617 = vmatprep.subr.bf16.mxu1 %v3015_v0 }
 0x6af   : > { %2618 = vmatpush3.bf16.msra.mxu1 %v2755_v4 }
 0x732   : > { %v2025_v17 = vpop.xlane.xlu0 %2024 }
 0x733   : > { %v2027_v48 = vmul.f32 0.03125, %v2025_v17 }
 0x735   : > { %v2028_v49 = vsub.f32 %v2022_v45, %v2027_v48 }
 0x737   : > { %v2029_v50 = vmul.f32 %v2028_v49, %v2028_v49 }
 0x739   : > { %v2030_v51 = vsel %vm706_vm0, %v2029_v50, 0.0 }
 0x73a   : > { %2031 = vadd.xlane.f32.xlu1 %v2030_v51 }
 0x7c7   : > { %v2032_v55 = vpop.xlane.xlu1 %2031 }
 0x7c8   : > { %v2033_v56 = vmul.f32 0.03125, %v2032_v55 }
 0x7ca   : > { %v2034_v57 = vadd.f32 1e-05, %v2033_v56 }
 0x7cc   : > { %2772 = vrsqrt.f32 %v2034_v57 }
 0x7d6   : > { %v2773_v58 = vpop.eup %2772 }
 0x7d7   : > { %v2036_v60 = vmul.f32 %v2773_v58, %v2028_v49 }
 0x7d9   : > { %v2044_v62 = vmul.f32 %v2469_v59, %v2036_v60 }
 0x7db   : > { %v2052_v63 = vadd.f32 %v2470_v61, %v2044_v62 }
 0x7dd   : > { %2053 = vst.msk [vmem:[#allocation2] sm:$0xff] %vm706_vm0, %v2052_v63 }
 0x7e4   : > { %v2055_v1 = vld [vmem:[#allocation2] sm:$0xff] }
 0x7e5   : > { %v2056_v2 = vpack.c.bf16 %v2055_v1, %v2055_v1 }
 0x7e7   : > { %2608 = vmatmul.mubr.msk.bf16.vlgmr.msra.gmra.mrb[24].mxu0 %vm706_vm0, %v2056_v2 }
 0x8ba   : > { %v2118_v9 = vpop.f32.mrb[24].mxu0 }
 0x8bb   : > { %v2119_v10 = vadd.f32 %v2471_v7, %v2118_v9  ;;  %v2609_v11 = vpop.f32.mrb[25].mxu0 }
 0x8bc   : > { %v2121_v12 = vpop.f32.mrb[26].mxu0 }
 0x8bd   : > { %v2124_v13 = vmax.f32 %v2119_v10, 0.0  ;;  %v2610_v14 = vpop.f32.mrb[27].mxu0 }
 0x8bf   : > { %v2126_v15 = vpack.c.bf16 %v2124_v13, %v2124_v13 }
 0x8c1   : > { %2620 = vmatmul.mubr.msk.bf16.vlgmr.msra.gmra.mrb[24].mxu1 %vm2159_vm6, %v2126_v15 }
 0x994   : > { %v2197_v0 = vpop.f32.mrb[24].mxu1 }
 0x995   : > { %v2203_v19 = vadd.f32 %v2197_v0, %v2125_v18  ;;  %v2621_v20 = vpop.f32.mrb[25].mxu1 }
 0x996   : > { %v2200_v21 = vpop.f32.mrb[26].mxu1 }
 0x997   : > { %2204 = vst.msk [vmem:[#allocation3] sm:$0xff] %vm706_vm0, %v2203_v19  ;;  %v2622_v22 = vpop.f32.mrb[27].mxu1 }
 0x99e   : > { %v2209_v24 = vld [vmem:[#allocation3] sm:$0xff] }
 0x99f   : > { %v2217_v25 = vadd.f32 %v2480_v23, %v2209_v24 }
 0x9a1   : > { %v2218_v26 = vadd.f32 %v2217_v25, %v2055_v1 }
 0x9a3   : > { %v2219_v27 = vsel %vm706_vm0, %v2218_v26, 0.0 }
 0x9a4   : > { %2220 = vadd.xlane.f32.xlu0 %v2219_v27 }
 0xa31   : > { %v2221_v28 = vpop.xlane.xlu0 %2220 }
 0xa32   : > { %v2223_v29 = vmul.f32 0.03125, %v2221_v28 }
 0xa34   : > { %v2224_v6 = vsub.f32 %v2218_v26, %v2223_v29 }
 0xa36   : > { %v2225_v46 = vmul.f32 %v2224_v6, %v2224_v6 }
 0xa38   : > { %v2226_v30 = vsel %vm706_vm0, %v2225_v46, 0.0 }
 0xa39   : > { %2227 = vadd.xlane.f32.xlu0 %v2226_v30 }
 0xac6   : > { %v2228_v8 = vpop.xlane.xlu0 %2227 }
 0xac7   : > { %v2229_v31 = vmul.f32 0.03125, %v2228_v8 }
 0xac9   : > { %v2230_v32 = vadd.f32 1e-05, %v2229_v31 }
 0xacb   : > { %2774 = vrsqrt.f32 %v2230_v32 }
 0xad5   : > { %v2775_v33 = vpop.eup %2774 }
 0xad6   : > { %v2232_v35 = vmul.f32 %v2775_v33, %v2224_v6 }
 0xad8   : > { %v2240_v38 = vmul.f32 %v2481_v34, %v2232_v35 }
 0xada   : > { %v2248_v39 = vadd.f32 %v2482_v37, %v2240_v38 }
 0xadc   : > { %2249 = vst.msk [vmem:[%s658_s24] sm:$0xff] %vm706_vm0, %v2248_v39 }
 0xadd   : > { %2929 = shalt.err (!%p2926_p6)
}
 0xade   : > { %s2930_s20 = scalar_lea.hbm %s3573_s26, 128  ;;  %s2934_s18 = scalar_lea.hbm %s3684_s8, 256 }
 0xadf   : > { %p2931_p7 = scmp.ne.s32.totalorder %s3573_s26, %s2930_s20  ;;  %p2935_p0 = scmp.lt.u32.totalorder %s3573_s26, %s3684_s8 }
 0xae0   : > { %p2936_p1 = scmp.lt.u32.totalorder %s2934_s18, %s2930_s20  ;;  %p2938_p2 = scmp.lt.u32.totalorder %s2930_s20, %s3573_s26 }
 0xae1   : > { %p2932_p9 = pnand %p2931_p7, %p3685_p4 }
 0xae2   : > { %p2937_p13 = por %p2936_p1, %p2935_p0 }
 0xae3   : > { %p2933_p12 = pneg %p2932_p9 }
 0xae4   : > { %p2939_p8 = por %p2938_p2, %p2937_p13 }
 0xae6   : > { %p2940_p10 = pnand %p2939_p8, %p2933_p12 }
 0xae8   : > { %2943 = shalt.err (!%p2940_p10)
}
 0xae9   : > { %2643 = dma.vmem_to_hbm [thread:$0]  (%p3685_p4), %s3575_s19, 128, %s3573_s26, %s2251_s22  }
 0xaea PF: > { %s3686_s24 = sld [smem:[#allocation21_spill]]  ;;  %s3687_s30 = sld [smem:[#allocation18_spill]] }
 0xaeb   : > { %s3688_s29 = sld [smem:[#allocation24_spill]] }
 0xaf0   : > { %p2675_p11 = scmp.ge.s32.totalorder %s3686_s24, 2  ;;  %s2276_s6 = sand.u32 1, %s3687_s30  }
 0xaf1   : > { %p3689_p3 = scmp.ne.s32.totalorder %s3688_s29, 0  ;;  %s2277_s27 = scalar_lea.sflag [#allocation6], %s2276_s6 }
 0xaf3   : > { %p2662_p5 = pnand %p2675_p11, %p3689_p3 }
 0xaf5   : > { %2981 = dma.done.wait (!%p2662_p5), %s2277_s27, 128  }
 0xaf6   : > { %2983 = vsyncadd (!%p2662_p5), %s2277_s27, 4294967168  ;;  %s33_s29 = sadd.s32 1, %s3686_s24   ;;  %s3690_s15 = sld [smem:[#allocation19_spill]] }
 0xaf7   : > { %p30_p6 = scmp.ge.s32.totalorder %s33_s29, 4   ;;  %s3691_s26 = sld [smem:[#allocation25_spill]] }
 0xaf8   : > { %s3692_s27 = sld [smem:[#allocation20_spill]]  ;;  %s3693_s28 = sld [smem:[#allocation22_spill]] }
 0xaf9   : > { %s3694_s24 = smov %s2990_s25  ;;  %32 = sbr.rel (!%p30_p6) target bundleno = 15 (0xf), region = 161 }
 0xafc   : > { %s3695_s25 = smov %s3690_s15 }
 0xb00   :  { %2282 = vsyncpa [#allocation5], 1 }
 0xb01   :  { %2284 = vsyncpa [#allocation5 + $0x1], 1 }
 0xb02   :  { %2285 = vsyncpa [#allocation8], 1 }
 0xb03   :  { %2286 = vsyncpa [#allocation11], 1 }
 0xb04   :  { %2287 = vsyncpa [#allocation6], 1 }
 0xb05   :  { %2289 = vsyncpa [#allocation6 + $0x1], 1 }

</bundles_post_ra>
